<compile_context>
chip_gen: v7x
topology: tpu7x:2x2x1
jax: 0.10.0
libtpu: 0.0.40
codegen_flags: <defaults>
</compile_context>

<pallas_src>
import math

import jax
import jax.numpy as jnp
from jax.experimental import pallas as pl
from jax.experimental.pallas import tpu as pltpu


def _round_up(x, m):
    return (x + m - 1) // m * m


def _kata_kernel(msw_ref,    # SMEM (N,)               f32 : mask_sum_hw per sample
                 x_ref,      # VMEM (nb, H+2, W+2, Ci) bf16: zero-padded NHWC input
                 mask_ref,   # VMEM (nb, HW, 1)        f32 : flattened mask
                 w_ref,      # VMEM (9, Ci, Cop+Cgp)   bf16: fused tap-major conv w
                 beta_ref,   # VMEM (1, 1, Cgp)        f32 : NormMask beta
                 wlin_ref,   # VMEM (3*Cgp, Cop)       f32 : fused linear_g
                 out_ref):   # VMEM (nb, HW, Cop)      bf16
    nb, hp2, wp2, ci = x_ref.shape
    h, w = hp2 - 2, wp2 - 2
    hw = h * w
    c_out_p = out_ref.shape[2]
    c_g_p = beta_ref.shape[2]
    c_tot = c_out_p + c_g_p

    # --- fused 3x3 convs: in-kernel im2col as 9 accumulated tap matmuls ------
    acc = jnp.zeros((nb * hw, c_tot), jnp.float32)
    for tap in range(9):                                   # unrolled at trace time
        dy, dx = tap // 3, tap % 3
        xt = x_ref[:, dy:dy + h, dx:dx + w, :].reshape(nb * hw, ci)
        acc = acc + jnp.dot(xt, w_ref[tap], preferred_element_type=jnp.float32)

    # split on a 128-lane boundary (Cop, Cgp are multiples of 128).
    # r-branch: store immediately -> short live range for the f32 temp.
    out_ref[...] = acc[:, :c_out_p].reshape(nb, hw, c_out_p).astype(out_ref.dtype)
    accg = acc[:, c_out_p:].reshape(nb, hw, c_g_p)

    mask = mask_ref[...]                                   # (nb, HW, 1) f32
    base = pl.program_id(0) * nb
    msw = jnp.stack([msw_ref[base + i] for i in range(nb)]).reshape(nb, 1, 1)

    # --- NormMask ('fixscale', no gamma, scale unset): (x + beta) * mask -----
    outg = (accg + beta_ref[...]) * mask
    # --- activation: relu -----------------------------------------------------
    outg = jnp.maximum(outg, 0.0)

    # --- KataGPool (per sample, f32) ------------------------------------------
    layer_mean = jnp.sum(outg, axis=1, keepdims=True) / msw            # (nb,1,Cgp)
    layer_max = jnp.max(outg + (mask - 1.0), axis=1, keepdims=True)    # (nb,1,Cgp)
    sqrt_off = (jnp.sqrt(msw) - 14.0) / 10.0                           # (nb,1,1)

    # --- linear_g on concat([mean, mean*s, max]) as ONE f32 matmul ------------
    pooled = jnp.concatenate(
        [layer_mean, layer_mean * sqrt_off, layer_max], axis=2)        # (nb,1,3Cgp)
    biasv = jnp.dot(pooled.reshape(nb, 3 * c_g_p), wlin_ref[...],
                    preferred_element_type=jnp.float32)                # (nb, Cop)

    # --- residual-style combine: out += broadcast(bias) -----------------------
    out_ref[...] = (out_ref[...].astype(jnp.float32)
                    + biasv.reshape(nb, 1, c_out_p)).astype(out_ref.dtype)


def _vmem_limit_bytes(nb, h, w, c_in, hw, cop, cgp, ctot):
    """Explicit scoped-VMEM budget from the real block footprint (v7x-safe)."""
    su = lambda v: _round_up(v, 8)      # sublane padding
    ln = lambda v: _round_up(v, 128)    # lane padding
    x_blk = nb * (h + 2) * su(w + 2) * ln(c_in) * 2          # bf16, grid-streamed
    mask_blk = nb * su(hw) * 128 * 4                         # f32, grid-streamed
    out_blk = nb * su(hw) * ln(cop) * 2                      # bf16, grid-streamed
    w_res = (9 * su(c_in) * ln(ctot) * 2                     # conv weights (resident)
             + 8 * ln(cgp) * 4 + su(3 * cgp) * ln(cop) * 4)  # beta + linear_g
    acc = nb * su(hw) * ln(ctot) * 4                         # f32 conv accumulator
    est = 2 * (x_blk + mask_blk + out_blk) + w_res + 2 * acc
    # generous headroom, but stay well inside v7x's 64 MiB physical VMEM
    return int(min(48 << 20, max(2 * est, 16 << 20)))


def kata_conv_and_gpool(x_nchw, mask_n1hw, mask_sum_hw_n111, params, *, nb=1):
    """PyTorch-parity wrapper: NCHW in, NCHW out."""
    wr = params["conv1r"]      # (Co, Ci, 3, 3)
    wg = params["conv1g"]      # (Cg, Ci, 3, 3)
    wlin = params["linear_g"]  # (Co, 3*Cg)
    beta = params["beta"]      # (1, Cg, 1, 1)

    N, C_in, H, W = x_nchw.shape
    C_out, C_g = wr.shape[0], wg.shape[0]
    HW = H * W
    Cop = _round_up(C_out, 128)            # lane-dense output / split boundary
    Cgp = _round_up(C_g, 128)
    Ctot = _round_up(Cop + Cgp, 256)       # clean 256-wide v6e/v7x MXU passes
    Cgp = Ctot - Cop

    # keep >= 2 grid steps so both v7x TensorCores get work; nb must divide N.
    nb = max(1, min(nb, max(N // 2, 1)))
    while N % nb:
        nb -= 1

    # --- activation glue: NCHW -> zero-padded NHWC bf16 (im2col is in-kernel) --
    x = jnp.transpose(x_nchw, (0, 2, 3, 1))
    x_pad = jnp.pad(x, ((0, 0), (1, 1), (1, 1), (0, 0))).astype(jnp.bfloat16)

    mask_flat = mask_n1hw.reshape(N, HW, 1).astype(jnp.float32)
    msw_1d = mask_sum_hw_n111.reshape(N).astype(jnp.float32)   # -> SMEM prefetch

    # --- one-time weight glue: fuse r/g, tap-major, pad channels, cast bf16 ---
    def conv_w_taps(w_conv, c_pad):
        c = w_conv.shape[0]
        wt = jnp.transpose(w_conv, (2, 3, 1, 0)).reshape(9, C_in, c)  # (9, Ci, C)
        return jnp.pad(wt, ((0, 0), (0, 0), (0, c_pad - c)))

    w_cat = jnp.concatenate(
        [conv_w_taps(wr, Cop), conv_w_taps(wg, Cgp)],
        axis=2).astype(jnp.bfloat16)                           # (9, Ci, Cop+Cgp)

    beta_p = jnp.pad(beta.reshape(1, 1, C_g),
                     ((0, 0), (0, 0), (0, Cgp - C_g))).astype(jnp.float32)

    # linear_g (Co, 3*Cg) -> (3, Cg, Co) -> pad -> (3*Cgp, Cop), kept in f32.
    wlin3 = jnp.transpose(wlin.reshape(C_out, 3, C_g), (1, 2, 0))
    wlin_p = jnp.pad(wlin3, ((0, 0), (0, Cgp - C_g), (0, Cop - C_out)))
    wlin_p = wlin_p.reshape(3 * Cgp, Cop).astype(jnp.float32)

    cost = pl.CostEstimate(
        flops=2 * N * HW * 9 * C_in * Ctot + 2 * N * 3 * Cgp * Cop,
        transcendentals=2 * N,
        bytes_accessed=int(x_pad.size * 2 + mask_flat.size * 4 + msw_1d.size * 4
                           + w_cat.size * 2 + beta_p.size * 4 + wlin_p.size * 4
                           + N * HW * Cop * 2))

    out = pl.pallas_call(
        _kata_kernel,
        out_shape=jax.ShapeDtypeStruct((N, HW, Cop), jnp.bfloat16),
        grid_spec=pltpu.PrefetchScalarGridSpec(
            num_scalar_prefetch=1,
            grid=(N // nb,),
            in_specs=[
                pl.BlockSpec((nb, H + 2, W + 2, C_in), lambda n, msw: (n, 0, 0, 0)),
                pl.BlockSpec((nb, HW, 1), lambda n, msw: (n, 0, 0)),
                pl.BlockSpec((9, C_in, Ctot), lambda n, msw: (0, 0, 0)),
                pl.BlockSpec((1, 1, Cgp), lambda n, msw: (0, 0, 0)),
                pl.BlockSpec((3 * Cgp, Cop), lambda n, msw: (0, 0)),
            ],
            out_specs=pl.BlockSpec((nb, HW, Cop), lambda n, msw: (n, 0, 0)),
        ),
        compiler_params=pltpu.CompilerParams(
            dimension_semantics=("parallel",),
            vmem_limit_bytes=_vmem_limit_bytes(nb, H, W, C_in, HW, Cop, Cgp, Ctot)),
        cost_estimate=cost,
    )(msw_1d, x_pad, mask_flat, w_cat, beta_p, wlin_p)

    # TODO(synk): a production trunk would consume the padded NHWC bf16 slab
    #             directly; the slice/transpose below is PyTorch-parity glue.
    out = out[:, :, :C_out].astype(jnp.float32).reshape(N, H, W, C_out)
    return jnp.transpose(out, (0, 3, 1, 2))                    # NCHW


def init_params(key, c_in, c_out, c_gpool, scale=1.0):
    """Deterministic init mirroring KataConvAndGPool.initialize (relu gain,
    fixscale branch, trunc-normal)."""
    gain = math.sqrt(2.0)  # relu
    r_scale, g_scale = 0.8, 0.6

    def trunc(k, shape, target_std):
        std = target_std / 0.8796256610342398
        return jax.random.truncated_normal(k, -2.0, 2.0, shape,
                                           jnp.float32) * std

    k1, k2, k3 = jax.random.split(key, 3)
    wr = trunc(k1, (c_out, c_in, 3, 3),
               scale * r_scale * gain / math.sqrt(c_in * 9))
    wg = trunc(k2, (c_gpool, c_in, 3, 3),
               math.sqrt(scale) * math.sqrt(g_scale) * gain / math.sqrt(c_in * 9))
    wlin = trunc(k3, (c_out, 3 * c_gpool),
                 math.sqrt(scale) * math.sqrt(g_scale) * gain
                 / math.sqrt(3 * c_gpool))
    beta = jnp.zeros((1, c_gpool, 1, 1), jnp.float32)
    return {"conv1r": wr, "conv1g": wg, "linear_g": wlin, "beta": beta}


def reference(x, mask, mask_sum_hw, params):
    """Pure-JAX f32 reference of the PyTorch forward (NCHW)."""
    dn = ("NCHW", "OIHW", "NCHW")
    outr = jax.lax.conv_general_dilated(x, params["conv1r"], (1, 1), "SAME",
                                        dimension_numbers=dn)
    outg = jax.lax.conv_general_dilated(x, params["conv1g"], (1, 1), "SAME",
                                        dimension_numbers=dn)
    outg = (outg + params["beta"]) * mask
    outg = jnp.maximum(outg, 0.0)
    mean = jnp.sum(outg, axis=(2, 3), keepdims=True) / mask_sum_hw
    maxv = jnp.max(outg + (mask - 1.0), axis=(2, 3), keepdims=True)
    s = (jnp.sqrt(mask_sum_hw) - 14.0) / 10.0
    pooled = jnp.concatenate([mean, mean * s, maxv], axis=1)[:, :, 0, 0]
    biasv = pooled @ params["linear_g"].T
    return outr + biasv[:, :, None, None]


if __name__ == "__main__":
    N, C_in, C_out, C_g, H, W = 2, 4, 8, 4, 16, 16

    key = jax.random.PRNGKey(0)
    kx, kp = jax.random.split(key)
    params = init_params(kp, C_in, C_out, C_g)

    # mask: batch 0 = full board, batch 1 = only first 12 rows valid
    rows = jnp.arange(H)[None, :, None]                       # (1,H,1)
    valid = jnp.array([H, 12], jnp.int32)[:, None, None]      # (N,1,1)
    mask = jnp.broadcast_to((rows < valid).astype(jnp.float32)[:, None, :, :],
                            (N, 1, H, W))
    x = jax.random.normal(kx, (N, C_in, H, W), jnp.float32) * mask
    mask_sum_hw = jnp.sum(mask, axis=(2, 3), keepdims=True)   # (N,1,1,1)

    out = kata_conv_and_gpool(x, mask, mask_sum_hw, params, nb=1)
    out = jax.block_until_ready(out)

    ref = reference(x, mask, mask_sum_hw, params)
    assert out.shape == (N, C_out, H, W)
    # bf16 matmul inputs / bf16 writeback with f32 accumulation -> loose tol.
    assert jnp.allclose(out, ref, atol=3e-2, rtol=3e-2), float(
        jnp.max(jnp.abs(out - ref)))
    print("KERNEL_OK")
</pallas_src>

<mosaic_0001>
module attributes {stable_mosaic.version = 11 : i64} {
  func.func @_kata_kernel(%arg0: i32, %arg1: memref<2xf32, #tpu.memory_space<smem>>, %arg2: memref<1x18x18x4xbf16, #tpu.memory_space<vmem>>, %arg3: memref<1x256x1xf32, #tpu.memory_space<vmem>>, %arg4: memref<9x4x256xbf16, #tpu.memory_space<vmem>>, %arg5: memref<1x1x128xf32, #tpu.memory_space<vmem>>, %arg6: memref<384x128xf32, #tpu.memory_space<vmem>>, %arg7: memref<1x256x128xbf16, #tpu.memory_space<vmem>>) attributes {dimension_semantics = [#tpu.dimension_semantics<parallel>], iteration_bounds = array<i64: 2>, scalar_prefetch = 1 : i64, scratch_operands = 0 : i64, tpu.core_type = #tpu.core_type<tc>, window_params = [{transform_indices = @transform_0, window_bounds = array<i64: 1, 18, 18, 4>}, {transform_indices = @transform_1, window_bounds = array<i64: 1, 256, 1>}, {pipeline_mode = #tpu.pipeline_mode<synchronous>, transform_indices = @transform_2, window_bounds = array<i64: 9, 4, 256>}, {pipeline_mode = #tpu.pipeline_mode<synchronous>, transform_indices = @transform_3, window_bounds = array<i64: 1, 1, 128>}, {pipeline_mode = #tpu.pipeline_mode<synchronous>, transform_indices = @transform_4, window_bounds = array<i64: 384, 128>}, {transform_indices = @transform_5, window_bounds = array<i64: 1, 256, 128>}]} {
    %cst = arith.constant 0.000000e+00 : f32
    %0 = vector.broadcast %cst : f32 to vector<256x256xf32>
    %c0 = arith.constant 0 : index
    %c0_0 = arith.constant 0 : index
    %c0_1 = arith.constant 0 : index
    %c0_2 = arith.constant 0 : index
    %1 = vector.load %arg2[%c0, %c0_0, %c0_1, %c0_2] : memref<1x18x18x4xbf16, #tpu.memory_space<vmem>>, vector<1x16x16x4xbf16>
    %2 = vector.shape_cast %1 : vector<1x16x16x4xbf16> to vector<256x4xbf16>
    %c0_3 = arith.constant 0 : index
    %c0_4 = arith.constant 0 : index
    %c0_5 = arith.constant 0 : index
    %3 = vector.load %arg4[%c0_3, %c0_4, %c0_5] : memref<9x4x256xbf16, #tpu.memory_space<vmem>>, vector<1x4x256xbf16>
    %4 = vector.shape_cast %3 : vector<1x4x256xbf16> to vector<4x256xbf16>
    %cst_6 = arith.constant dense<0.000000e+00> : vector<256x256xf32>
    %5 = tpu.matmul %2, %4, %cst_6 {dimension_numbers = #tpu.dot_dimension_numbers<[1], [0], [0], [1], [0, 0, 1, 1], [], []>} : vector<256x4xbf16>, vector<4x256xbf16>, vector<256x256xf32> -> vector<256x256xf32>
    %6 = arith.addf %0, %5 : vector<256x256xf32>
    %c0_7 = arith.constant 0 : index
    %c0_8 = arith.constant 0 : index
    %c1 = arith.constant 1 : index
    %c0_9 = arith.constant 0 : index
    %7 = vector.load %arg2[%c0_7, %c0_8, %c1, %c0_9] : memref<1x18x18x4xbf16, #tpu.memory_space<vmem>>, vector<1x16x16x4xbf16>
    %8 = vector.shape_cast %7 : vector<1x16x16x4xbf16> to vector<256x4xbf16>
    %c1_10 = arith.constant 1 : index
    %c0_11 = arith.constant 0 : index
    %c0_12 = arith.constant 0 : index
    %9 = vector.load %arg4[%c1_10, %c0_11, %c0_12] : memref<9x4x256xbf16, #tpu.memory_space<vmem>>, vector<1x4x256xbf16>
    %10 = vector.shape_cast %9 : vector<1x4x256xbf16> to vector<4x256xbf16>
    %cst_13 = arith.constant dense<0.000000e+00> : vector<256x256xf32>
    %11 = tpu.matmul %8, %10, %cst_13 {dimension_numbers = #tpu.dot_dimension_numbers<[1], [0], [0], [1], [0, 0, 1, 1], [], []>} : vector<256x4xbf16>, vector<4x256xbf16>, vector<256x256xf32> -> vector<256x256xf32>
    %12 = arith.addf %6, %11 : vector<256x256xf32>
    %c0_14 = arith.constant 0 : index
    %c0_15 = arith.constant 0 : index
    %c2 = arith.constant 2 : index
    %c0_16 = arith.constant 0 : index
    %13 = vector.load %arg2[%c0_14, %c0_15, %c2, %c0_16] : memref<1x18x18x4xbf16, #tpu.memory_space<vmem>>, vector<1x16x16x4xbf16>
    %14 = vector.shape_cast %13 : vector<1x16x16x4xbf16> to vector<256x4xbf16>
    %c2_17 = arith.constant 2 : index
    %c0_18 = arith.constant 0 : index
    %c0_19 = arith.constant 0 : index
    %15 = vector.load %arg4[%c2_17, %c0_18, %c0_19] : memref<9x4x256xbf16, #tpu.memory_space<vmem>>, vector<1x4x256xbf16>
    %16 = vector.shape_cast %15 : vector<1x4x256xbf16> to vector<4x256xbf16>
    %cst_20 = arith.constant dense<0.000000e+00> : vector<256x256xf32>
    %17 = tpu.matmul %14, %16, %cst_20 {dimension_numbers = #tpu.dot_dimension_numbers<[1], [0], [0], [1], [0, 0, 1, 1], [], []>} : vector<256x4xbf16>, vector<4x256xbf16>, vector<256x256xf32> -> vector<256x256xf32>
    %18 = arith.addf %12, %17 : vector<256x256xf32>
    %c0_21 = arith.constant 0 : index
    %c1_22 = arith.constant 1 : index
    %c0_23 = arith.constant 0 : index
    %c0_24 = arith.constant 0 : index
    %19 = vector.load %arg2[%c0_21, %c1_22, %c0_23, %c0_24] : memref<1x18x18x4xbf16, #tpu.memory_space<vmem>>, vector<1x16x16x4xbf16>
    %20 = vector.shape_cast %19 : vector<1x16x16x4xbf16> to vector<256x4xbf16>
    %c3 = arith.constant 3 : index
    %c0_25 = arith.constant 0 : index
    %c0_26 = arith.constant 0 : index
    %21 = vector.load %arg4[%c3, %c0_25, %c0_26] : memref<9x4x256xbf16, #tpu.memory_space<vmem>>, vector<1x4x256xbf16>
    %22 = vector.shape_cast %21 : vector<1x4x256xbf16> to vector<4x256xbf16>
    %cst_27 = arith.constant dense<0.000000e+00> : vector<256x256xf32>
    %23 = tpu.matmul %20, %22, %cst_27 {dimension_numbers = #tpu.dot_dimension_numbers<[1], [0], [0], [1], [0, 0, 1, 1], [], []>} : vector<256x4xbf16>, vector<4x256xbf16>, vector<256x256xf32> -> vector<256x256xf32>
    %24 = arith.addf %18, %23 : vector<256x256xf32>
    %c0_28 = arith.constant 0 : index
    %c1_29 = arith.constant 1 : index
    %c1_30 = arith.constant 1 : index
    %c0_31 = arith.constant 0 : index
    %25 = vector.load %arg2[%c0_28, %c1_29, %c1_30, %c0_31] : memref<1x18x18x4xbf16, #tpu.memory_space<vmem>>, vector<1x16x16x4xbf16>
    %26 = vector.shape_cast %25 : vector<1x16x16x4xbf16> to vector<256x4xbf16>
    %c4 = arith.constant 4 : index
    %c0_32 = arith.constant 0 : index
    %c0_33 = arith.constant 0 : index
    %27 = vector.load %arg4[%c4, %c0_32, %c0_33] : memref<9x4x256xbf16, #tpu.memory_space<vmem>>, vector<1x4x256xbf16>
    %28 = vector.shape_cast %27 : vector<1x4x256xbf16> to vector<4x256xbf16>
    %cst_34 = arith.constant dense<0.000000e+00> : vector<256x256xf32>
    %29 = tpu.matmul %26, %28, %cst_34 {dimension_numbers = #tpu.dot_dimension_numbers<[1], [0], [0], [1], [0, 0, 1, 1], [], []>} : vector<256x4xbf16>, vector<4x256xbf16>, vector<256x256xf32> -> vector<256x256xf32>
    %30 = arith.addf %24, %29 : vector<256x256xf32>
    %c0_35 = arith.constant 0 : index
    %c1_36 = arith.constant 1 : index
    %c2_37 = arith.constant 2 : index
    %c0_38 = arith.constant 0 : index
    %31 = vector.load %arg2[%c0_35, %c1_36, %c2_37, %c0_38] : memref<1x18x18x4xbf16, #tpu.memory_space<vmem>>, vector<1x16x16x4xbf16>
    %32 = vector.shape_cast %31 : vector<1x16x16x4xbf16> to vector<256x4xbf16>
    %c5 = arith.constant 5 : index
    %c0_39 = arith.constant 0 : index
    %c0_40 = arith.constant 0 : index
    %33 = vector.load %arg4[%c5, %c0_39, %c0_40] : memref<9x4x256xbf16, #tpu.memory_space<vmem>>, vector<1x4x256xbf16>
    %34 = vector.shape_cast %33 : vector<1x4x256xbf16> to vector<4x256xbf16>
    %cst_41 = arith.constant dense<0.000000e+00> : vector<256x256xf32>
    %35 = tpu.matmul %32, %34, %cst_41 {dimension_numbers = #tpu.dot_dimension_numbers<[1], [0], [0], [1], [0, 0, 1, 1], [], []>} : vector<256x4xbf16>, vector<4x256xbf16>, vector<256x256xf32> -> vector<256x256xf32>
    %36 = arith.addf %30, %35 : vector<256x256xf32>
    %c0_42 = arith.constant 0 : index
    %c2_43 = arith.constant 2 : index
    %c0_44 = arith.constant 0 : index
    %c0_45 = arith.constant 0 : index
    %37 = vector.load %arg2[%c0_42, %c2_43, %c0_44, %c0_45] : memref<1x18x18x4xbf16, #tpu.memory_space<vmem>>, vector<1x16x16x4xbf16>
    %38 = vector.shape_cast %37 : vector<1x16x16x4xbf16> to vector<256x4xbf16>
    %c6 = arith.constant 6 : index
    %c0_46 = arith.constant 0 : index
    %c0_47 = arith.constant 0 : index
    %39 = vector.load %arg4[%c6, %c0_46, %c0_47] : memref<9x4x256xbf16, #tpu.memory_space<vmem>>, vector<1x4x256xbf16>
    %40 = vector.shape_cast %39 : vector<1x4x256xbf16> to vector<4x256xbf16>
    %cst_48 = arith.constant dense<0.000000e+00> : vector<256x256xf32>
    %41 = tpu.matmul %38, %40, %cst_48 {dimension_numbers = #tpu.dot_dimension_numbers<[1], [0], [0], [1], [0, 0, 1, 1], [], []>} : vector<256x4xbf16>, vector<4x256xbf16>, vector<256x256xf32> -> vector<256x256xf32>
    %42 = arith.addf %36, %41 : vector<256x256xf32>
    %c0_49 = arith.constant 0 : index
    %c2_50 = arith.constant 2 : index
    %c1_51 = arith.constant 1 : index
    %c0_52 = arith.constant 0 : index
    %43 = vector.load %arg2[%c0_49, %c2_50, %c1_51, %c0_52] : memref<1x18x18x4xbf16, #tpu.memory_space<vmem>>, vector<1x16x16x4xbf16>
    %44 = vector.shape_cast %43 : vector<1x16x16x4xbf16> to vector<256x4xbf16>
    %c7 = arith.constant 7 : index
    %c0_53 = arith.constant 0 : index
    %c0_54 = arith.constant 0 : index
    %45 = vector.load %arg4[%c7, %c0_53, %c0_54] : memref<9x4x256xbf16, #tpu.memory_space<vmem>>, vector<1x4x256xbf16>
    %46 = vector.shape_cast %45 : vector<1x4x256xbf16> to vector<4x256xbf16>
    %cst_55 = arith.constant dense<0.000000e+00> : vector<256x256xf32>
    %47 = tpu.matmul %44, %46, %cst_55 {dimension_numbers = #tpu.dot_dimension_numbers<[1], [0], [0], [1], [0, 0, 1, 1], [], []>} : vector<256x4xbf16>, vector<4x256xbf16>, vector<256x256xf32> -> vector<256x256xf32>
    %48 = arith.addf %42, %47 : vector<256x256xf32>
    %c0_56 = arith.constant 0 : index
    %c2_57 = arith.constant 2 : index
    %c2_58 = arith.constant 2 : index
    %c0_59 = arith.constant 0 : index
    %49 = vector.load %arg2[%c0_56, %c2_57, %c2_58, %c0_59] : memref<1x18x18x4xbf16, #tpu.memory_space<vmem>>, vector<1x16x16x4xbf16>
    %50 = vector.shape_cast %49 : vector<1x16x16x4xbf16> to vector<256x4xbf16>
    %c8 = arith.constant 8 : index
    %c0_60 = arith.constant 0 : index
    %c0_61 = arith.constant 0 : index
    %51 = vector.load %arg4[%c8, %c0_60, %c0_61] : memref<9x4x256xbf16, #tpu.memory_space<vmem>>, vector<1x4x256xbf16>
    %52 = vector.shape_cast %51 : vector<1x4x256xbf16> to vector<4x256xbf16>
    %cst_62 = arith.constant dense<0.000000e+00> : vector<256x256xf32>
    %53 = tpu.matmul %50, %52, %cst_62 {dimension_numbers = #tpu.dot_dimension_numbers<[1], [0], [0], [1], [0, 0, 1, 1], [], []>} : vector<256x4xbf16>, vector<4x256xbf16>, vector<256x256xf32> -> vector<256x256xf32>
    %54 = arith.addf %48, %53 : vector<256x256xf32>
    %55 = vector.extract_strided_slice %54 {offsets = [0, 0], sizes = [256, 128], strides = [1, 1]} : vector<256x256xf32> to vector<256x128xf32>
    %56 = vector.shape_cast %55 : vector<256x128xf32> to vector<1x256x128xf32>
    %57 = arith.truncf %56 : vector<1x256x128xf32> to vector<1x256x128xbf16>
    %c0_63 = arith.constant 0 : index
    %c0_64 = arith.constant 0 : index
    %c0_65 = arith.constant 0 : index
    %58 = vector.load %arg7[%c0_63, %c0_64, %c0_65] : memref<1x256x128xbf16, #tpu.memory_space<vmem>>, vector<1x256x128xbf16>
    tpu.vector_store %arg7[%c0_63, %c0_64, %c0_65], %57 {strides = array<i32>} : memref<1x256x128xbf16, #tpu.memory_space<vmem>>, vector<1x256x128xbf16>,
    %59 = vector.extract_strided_slice %54 {offsets = [0, 128], sizes = [256, 128], strides = [1, 1]} : vector<256x256xf32> to vector<256x128xf32>
    %60 = vector.shape_cast %59 : vector<256x128xf32> to vector<1x256x128xf32>
    %c0_66 = arith.constant 0 : index
    %c0_67 = arith.constant 0 : index
    %c0_68 = arith.constant 0 : index
    %61 = vector.load %arg3[%c0_66, %c0_67, %c0_68] : memref<1x256x1xf32, #tpu.memory_space<vmem>>, vector<1x256x1xf32>
    %c1_i32 = arith.constant 1 : i32
    %62 = arith.muli %arg0, %c1_i32 : i32
    %c0_i32 = arith.constant 0 : i32
    %63 = arith.addi %62, %c0_i32 : i32
    %64 = arith.index_cast %63 : i32 to index
    %65 = memref.load %arg1[%64] : memref<2xf32, #tpu.memory_space<smem>>
    %66 = vector.broadcast %65 : f32 to vector<1xf32>
    %67 = vector.shape_cast %66 : vector<1xf32> to vector<1x1x1xf32>
    %c0_69 = arith.constant 0 : index
    %c0_70 = arith.constant 0 : index
    %c0_71 = arith.constant 0 : index
    %68 = vector.load %arg5[%c0_69, %c0_70, %c0_71] : memref<1x1x128xf32, #tpu.memory_space<vmem>>, vector<1x1x128xf32>
    %69 = vector.broadcast %68 : vector<1x1x128xf32> to vector<1x256x128xf32>
    %70 = arith.addf %60, %69 : vector<1x256x128xf32>
    %71 = vector.broadcast %61 : vector<1x256x1xf32> to vector<1x256x128xf32>
    %72 = arith.mulf %70, %71 : vector<1x256x128xf32>
    %cst_72 = arith.constant 0.000000e+00 : f32
    %73 = vector.broadcast %cst_72 : f32 to vector<1x256x128xf32>
    %74 = arith.maximumf %72, %73 : vector<1x256x128xf32>
    %cst_73 = arith.constant dense<0.000000e+00> : vector<1x128xf32>
    %75 = vector.multi_reduction <add>, %74, %cst_73 [1] : vector<1x256x128xf32> to vector<1x128xf32>
    %76 = vector.shape_cast %75 : vector<1x128xf32> to vector<1x1x128xf32>
    %77 = vector.broadcast %67 : vector<1x1x1xf32> to vector<1x1x128xf32>
    %78 = arith.divf %76, %77 : vector<1x1x128xf32>
    %cst_74 = arith.constant 1.000000e+00 : f32
    %79 = vector.broadcast %cst_74 : f32 to vector<1x256x1xf32>
    %80 = arith.subf %61, %79 : vector<1x256x1xf32>
    %81 = vector.broadcast %80 : vector<1x256x1xf32> to vector<1x256x128xf32>
    %82 = arith.addf %74, %81 : vector<1x256x128xf32>
    %cst_75 = arith.constant dense<0xFF800000> : vector<1x128xf32>
    %83 = vector.multi_reduction <maximumf>, %82, %cst_75 [1] : vector<1x256x128xf32> to vector<1x128xf32>
    %84 = vector.shape_cast %83 : vector<1x128xf32> to vector<1x1x128xf32>
    %85 = math.sqrt %67 : vector<1x1x1xf32>
    %cst_76 = arith.constant 1.400000e+01 : f32
    %86 = vector.broadcast %cst_76 : f32 to vector<1x1x1xf32>
    %87 = arith.subf %85, %86 : vector<1x1x1xf32>
    %cst_77 = arith.constant 1.000000e+01 : f32
    %88 = vector.broadcast %cst_77 : f32 to vector<1x1x1xf32>
    %89 = arith.divf %87, %88 : vector<1x1x1xf32>
    %90 = vector.broadcast %89 : vector<1x1x1xf32> to vector<1x1x128xf32>
    %91 = arith.mulf %78, %90 : vector<1x1x128xf32>
    %92 = tpu.concatenate %78, %91, %84 in 2 : vector<1x1x128xf32>, vector<1x1x128xf32>, vector<1x1x128xf32> -> vector<1x1x384xf32>
    %93 = vector.shape_cast %92 : vector<1x1x384xf32> to vector<1x384xf32>
    %c0_78 = arith.constant 0 : index
    %c0_79 = arith.constant 0 : index
    %94 = vector.load %arg6[%c0_78, %c0_79] : memref<384x128xf32, #tpu.memory_space<vmem>>, vector<384x128xf32>
    %cst_80 = arith.constant dense<0.000000e+00> : vector<1x128xf32>
    %95 = tpu.matmul %93, %94, %cst_80 {dimension_numbers = #tpu.dot_dimension_numbers<[1], [0], [0], [1], [0, 0, 1, 1], [], []>} : vector<1x384xf32>, vector<384x128xf32>, vector<1x128xf32> -> vector<1x128xf32>
    %c0_81 = arith.constant 0 : index
    %c0_82 = arith.constant 0 : index
    %c0_83 = arith.constant 0 : index
    %96 = vector.load %arg7[%c0_81, %c0_82, %c0_83] : memref<1x256x128xbf16, #tpu.memory_space<vmem>>, vector<1x256x128xbf16>
    %97 = arith.extf %96 : vector<1x256x128xbf16> to vector<1x256x128xf32>
    %98 = vector.shape_cast %95 : vector<1x128xf32> to vector<1x1x128xf32>
    %99 = vector.broadcast %98 : vector<1x1x128xf32> to vector<1x256x128xf32>
    %100 = arith.addf %97, %99 : vector<1x256x128xf32>
    %101 = arith.truncf %100 : vector<1x256x128xf32> to vector<1x256x128xbf16>
    %c0_84 = arith.constant 0 : index
    %c0_85 = arith.constant 0 : index
    %c0_86 = arith.constant 0 : index
    %102 = vector.load %arg7[%c0_84, %c0_85, %c0_86] : memref<1x256x128xbf16, #tpu.memory_space<vmem>>, vector<1x256x128xbf16>
    tpu.vector_store %arg7[%c0_84, %c0_85, %c0_86], %101 {strides = array<i32>} : memref<1x256x128xbf16, #tpu.memory_space<vmem>>, vector<1x256x128xbf16>,
    return
  }
  func.func @transform_0(%arg0: i32, %arg1: memref<2xf32, #tpu.memory_space<smem>>) -> (i32, i32, i32, i32) {
    %c0_i32 = arith.constant 0 : i32
    %c0_i32_0 = arith.constant 0 : i32
    %c0_i32_1 = arith.constant 0 : i32
    %c0_i32_2 = arith.constant 0 : i32
    return %arg0, %c0_i32, %c0_i32_0, %c0_i32_1 : i32, i32, i32, i32
  }
  func.func @transform_1(%arg0: i32, %arg1: memref<2xf32, #tpu.memory_space<smem>>) -> (i32, i32, i32) {
    %c0_i32 = arith.constant 0 : i32
    %c0_i32_0 = arith.constant 0 : i32
    %c0_i32_1 = arith.constant 0 : i32
    return %arg0, %c0_i32, %c0_i32_0 : i32, i32, i32
  }
  func.func @transform_2(%arg0: i32, %arg1: memref<2xf32, #tpu.memory_space<smem>>) -> (i32, i32, i32) {
    %c0_i32 = arith.constant 0 : i32
    %c0_i32_0 = arith.constant 0 : i32
    %c0_i32_1 = arith.constant 0 : i32
    %c0_i32_2 = arith.constant 0 : i32
    return %c0_i32, %c0_i32_0, %c0_i32_1 : i32, i32, i32
  }
  func.func @transform_3(%arg0: i32, %arg1: memref<2xf32, #tpu.memory_space<smem>>) -> (i32, i32, i32) {
    %c0_i32 = arith.constant 0 : i32
    %c0_i32_0 = arith.constant 0 : i32
    %c0_i32_1 = arith.constant 0 : i32
    %c0_i32_2 = arith.constant 0 : i32
    return %c0_i32, %c0_i32_0, %c0_i32_1 : i32, i32, i32
  }
  func.func @transform_4(%arg0: i32, %arg1: memref<2xf32, #tpu.memory_space<smem>>) -> (i32, i32) {
    %c0_i32 = arith.constant 0 : i32
    %c0_i32_0 = arith.constant 0 : i32
    %c0_i32_1 = arith.constant 0 : i32
    return %c0_i32, %c0_i32_0 : i32, i32
  }
  func.func @transform_5(%arg0: i32, %arg1: memref<2xf32, #tpu.memory_space<smem>>) -> (i32, i32, i32) {
    %c0_i32 = arith.constant 0 : i32
    %c0_i32_0 = arith.constant 0 : i32
    %c0_i32_1 = arith.constant 0 : i32
    return %arg0, %c0_i32, %c0_i32_0 : i32, i32, i32
  }
}

</mosaic_0001>

<bundles_post_ra>
// kernel: tpu_custom_call.1
= control target key start
LH: loop header
LB: loop body
LE: loop exit
PB: predicated region body
PF: predicated region fallthrough
CT: control target
= control target key end

     0   :  { %s10963_s0 = inlined_call_operand.vmem [shape: f32[2], index: 0, kind: input, shape index: {}]   ;;  %s10964_s1 = inlined_call_operand.vmem [shape: bf16[2,18,18,4], index: 1, kind: input, shape index: {}]   ;;  %s10965_s2 = inlined_call_operand.vmem [shape: f32[2,256,1], index: 2, kind: input, shape index: {}]   ;;  %s10966_s3 = inlined_call_operand.vmem [shape: bf16[9,4,256], index: 3, kind: input, shape index: {}]   ;;  %s10967_s4 = inlined_call_operand.vmem [shape: f32[1,1,128], index: 4, kind: input, shape index: {}]   ;;  %s10968_s5 = inlined_call_operand.vmem [shape: f32[384,128], index: 5, kind: input, shape index: {}]   ;;  %s10969_s6 = inlined_call_operand.hbm [shape: bf16[2,256,128], index: 6, kind: output, shape index: {}]  }
   0x1   :  { %s11_s23 = sshll.u32 %s10963_s0, 4  ;;  %s12_s23 = int_to_ptr.vmem [resolvable:$true] %s11_s23 }
   0x2   :  { %s8687_s24 = scalar_lea.vmem %s12_s23, 16  ;;  %p8692_p1 = scmp.lt.s32.totalorder %s12_s23, %s12_s23 }
   0x3   :  { %p8688_p0 = scmp.ne.s32.totalorder %s12_s23, %s8687_s24  ;;  %p8693_p2 = scmp.lt.s32.totalorder %s8687_s24, %s8687_s24 }
   0x5   :  { %p8694_p3 = por %p8693_p2, %p8692_p1 }
   0x7   :  { %p8695_p4 = pnand %p8694_p3, %p8688_p0 }
   0x9   :  { %8698 = shalt.err (!%p8695_p4)  }
   0xa   :  { %s8765_s25 = smov [#allocation3]  }
   0xb   :  { %14 = dma.vmem_to_smem %s12_s23, 16, %s8765_s25, [#allocation2] }
   0xc   :  { %8743 = dma.done.wait [#allocation2], 16 }
   0xd   :  { %8744 = vsyncadd [#allocation2], 4294967280 }
   0xe   :  { %16 = sfence }
   0xf   :  { %17 = vsyncpa [#allocation5], 0 }
  0x10   :  { %19 = vsyncpa [#allocation5 + $0x1], 0  ;;  %s8811_s26 = smov 0   ;;  %s8813_s27 = smov 0  }
  0x11   :  { %s8815_s0 = smov 0   ;;  %s8817_s28 = smov 0  }
  0x12 LB: > { %s8832_s29 = sadd.s32 4294967295, %s8763_s28   ;;  %s6846_s30 = sadd.s32 4294967294, %s8763_s28   ;;  %s8763_s28 = sphi %s8817_s28, %s11038_s28   ;;  %s8759_s0 = sphi %s8815_s0, %s11037_s0   ;;  %s8755_s27 = sphi %s8813_s27, %s11036_s27   ;;  %s8751_s26 = sphi %s8811_s26, %s11035_s26  }
  0x13   : > { %s8836_s7 = sadd.s32 1, %s8763_s28   ;;  %s147_s8 = sadd.s32 1, %s8759_s0 }
  0x14   : > { %s144_s9 = ssub.s32 %s8763_s28, %s8836_s7  ;;  %p157_p5 = scmp.ne.s32.totalorder %s8759_s0, %s8755_s27 }
  0x15   : > { %p145_p6 = scmp.eq.s32.totalorder %s144_s9, 0  ;;  %p158_p7 = scmp.eq.s32.totalorder %s8832_s29, 1 }
  0x16   : > { %p163_p8 = scmp.ne.s32.totalorder %s8755_s27, %s8751_s26  ;;  %p164_p9 = scmp.eq.s32.totalorder %s6846_s30, 1 }
  0x17   : > { %s8847_s10 = scalar_select %p145_p6, %s8759_s0, %s147_s8  }
  0x18   : > { %p8849_p10 = por %p158_p7, %p157_p5  ;;  %p8853_p11 = por %p164_p9, %p163_p8 }
  0x19   : > { %p6849_p12 = scmp.ge.s32.totalorder %s8763_s28, 1  ;;  %p207_p13 = scmp.lt.s32.totalorder %s8763_s28, 3 }
  0x1b   : > { %p208_p0 = pnand %p6849_p12, %p207_p13 }
  0x1d   : > { %211 = sbr.rel (%p208_p0) target bundleno = 1181 (0x49d), region = 40 }
  0x24   : > { %vm795_vm0 = vcmask 1041408   ;;  %v7106_v0 = vld.sshfl [vmem:[%s10966_s3 + $0x10] sm:$0x33 pattern:$0x76325410]  ;;  %v8766_v4 = vmov 0  }
  0x25   : > { %v8862_v1 = vcombine.high %v7106_v0, %v7106_v0  ;;  %v6871_v2 = vld.sshfl [vmem:[%s10966_s3 + $0x4] sm:$0x33 pattern:$0x76325410]  ;;  %v8868_v3 = vsel %vm795_vm0, %v7106_v0, 0  ;;  %834 = vmatprep.mubr.bf16.mxu1 %v8766_v4  ;;  %2924 = vmatprep.mubr.bf16.mxu0 %v8766_v4  ;;  %p240_p1 = scmp.lt.s32.totalorder %s8832_s29, 1 }
  0x26   : > { %v745_v5 = vcombine.high %v6871_v2, %v6871_v2  ;;  %v797_v6 = vsel %vm795_vm0, %v6871_v2, 0  ;;  %v7205_v7 = vld.sshfl [vmem:[%s10966_s3 + $0x14] sm:$0x33 pattern:$0x76325410]  ;;  %8615 = vset.pattern.permute.xlu1 %v8766_v4  ;;  %8614 = vset.pattern.permute.xlu0 %v8766_v4  ;;  %vm746_vm3 = vcmask 31744  }
  0x27   : > { %7107 = vmatprep.subr.msk.bf16.mxu0 %vm795_vm0, %v8862_v1  ;;  %v3415_v8 = vcombine.high %v7205_v7, %v7205_v7  ;;  %s8882_s19 = scalar_select %p240_p1, %s8832_s29, 1  ;;  %v6905_v9 = vld.sshfl [vmem:[%s10966_s3] sm:$0x33 pattern:$0x76325410]  ;;  %v8902_v12 = vsel %vm795_vm0, %v7205_v7, 0 }
  0x28   : > { %6872 = vmatprep.subr.msk.bf16.mxu1 %vm795_vm0, %v745_v5  ;;  %2893 = vmatpush1.bf16.msra.mxu0 %v8868_v3  ;;  %v1083_v10 = vcombine.high %v6905_v9, %v6905_v9  ;;  %vm300_vm1 = vsmask.f32 3328  ;;  %v8894_v11 = vld.sshfl [vmem:[%s10966_s3 + $0x18] sm:$0x33 pattern:$0x76325410] }
  0x29   : > { %803 = vmatpush1.bf16.msra.mxu1 %v797_v6  ;;  %7206 = vmatprep.subr.msk.bf16.mxu0 %vm795_vm0, %v3415_v8  ;;  %s8567_s22 = smul.u32 216, %s8882_s19  ;;  %vm301_vm2 = vsmask.f32 7440  ;;  %v8906_v13 = vsel %vm795_vm0, %v6905_v9, 0  ;;  %v8910_v14 = vsel %vm795_vm0, %v8894_v11, 0  ;;  %v3850_v27 = vcombine.high %v8894_v11, %v8894_v11  ;;  %s7575_s21 = sshll.u32 %s8882_s19, 8 }
  0x2a   : > { %6906 = vmatprep.subr.msk.bf16.mxu1 %vm795_vm0, %v1083_v10  ;;  %vm8924_vm4 = vmor %vm300_vm1, %vm301_vm2  ;;  %vm1427_vm5 = vcmask 1042432   ;;  %vm1428_vm6 = vcmask 1046532   ;;  %s9670_s24 = scalar_lea.vmem %s10965_s2, %s7575_s21  ;;  %s5734_s30 = sld [smem:[#allocation3 + %s8832_s29]]  ;;  %vm8768_vm10 = vmmov 0  }
  0x2b   : > { %s8899_s8 = scalar_lea.vmem %s10964_s1, %s8567_s22  ;;  %vm9144_vm7 = vmor %vm1427_vm5, %vm1428_vm6  ;;  %s7640_s13 = sshll.u32 %s8832_s29, 11 }
  0x2c   : > { %v251_v15 = vld [vmem:[%s8899_s8] sm:$0xf]  ;;  %v252_v16 = vld [vmem:[%s8899_s8 + $0x4] sm:$0xf]  ;;  %v284_v17 = vld [vmem:[%s8899_s8 + $0x8] sm:$0x1]  ;;  %s10904_s17 = scalar_lea.hbm %s10969_s6, %s7640_s13 }
  0x2d   : > { %v304_v18 = vshrl.u32 %v251_v15, 16  ;;  %v307_v19 = vshll.u32 %v251_v15, 16  ;;  %v313_v20 = vshll.u32 %v252_v16, 16  ;;  %v317_v21 = vshrl.u32 %v252_v16, 16  ;;  %v7041_v22 = vld [vmem:[%s8899_s8 + $0xc] sm:$0xf] }
  0x2e   : > { %v323_v23 = vshll.u32 %v284_v17, 16  ;;  %v7042_v24 = vld [vmem:[%s8899_s8 + $0x10] sm:$0xf]  ;;  %v7043_v25 = vld [vmem:[%s8899_s8 + $0x14] sm:$0x1]  ;;  %v2396_v26 = vshrl.u32 %v7041_v22, 16 }
  0x2f   : > { %v306_v28 = vrot.slane %v304_v18, 4  ;;  %v309_v29 = vrot.slane %v307_v19, 5  ;;  %v315_v30 = vrot.slane %v313_v20, 5  ;;  %v319_v31 = vrot.slane %v317_v21, 4  ;;  %v253_v32 = vld [vmem:[%s8899_s8 + $0xc] sm:$0xf] }
  0x30   : > { %v325_v33 = vrot.slane %v323_v23, 5  ;;  %v2398_v34 = vrot.slane %v2396_v26, 4  ;;  %v2399_v35 = vshll.u32 %v7041_v22, 16  ;;  %v2405_v36 = vshll.u32 %v7042_v24, 16  ;;  %v254_v41 = vld [vmem:[%s8899_s8 + $0x10] sm:$0xf] }
  0x31   : > { %v310_v37 = vor.u32 %v309_v29, %v306_v28  ;;  %v320_v38 = vor.u32 %v319_v31, %v315_v30  ;;  %v2409_v39 = vshrl.u32 %v7042_v24, 16  ;;  %v2415_v40 = vshll.u32 %v7043_v25, 16  ;;  %v285_v51 = vld [vmem:[%s8899_s8 + $0x14] sm:$0x1]  ;;  %v7044_v56 = vld [vmem:[%s8899_s8 + $0x18] sm:$0xf] }
  0x32   : > { %v2401_v43 = vrot.slane %v2399_v35, 5  ;;  %v2407_v44 = vrot.slane %v2405_v36, 5  ;;  %v328_v45 = vshrl.u32 %v253_v32, 16  ;;  %v331_v46 = vshll.u32 %v253_v32, 16  ;;  %v7045_v61 = vld [vmem:[%s8899_s8 + $0x1c] sm:$0xf] }
  0x33   : > { %v311_v47 = vrot.slane %v310_v37, 4  ;;  %v321_v48 = vrot.slane %v320_v38, 4  ;;  %v2411_v49 = vrot.slane %v2409_v39, 4  ;;  %v2417_v50 = vrot.slane %v2415_v40, 5  ;;  %v7046_v8 = vld [vmem:[%s8899_s8 + $0x20] sm:$0x1] }
  0x34   : > { %v2402_v52 = vor.u32 %v2401_v43, %v2398_v34  ;;  %v330_v53 = vrot.slane %v328_v45, 4  ;;  %v333_v54 = vrot.slane %v331_v46, 5  ;;  %v337_v55 = vshll.u32 %v254_v41, 16  ;;  %v255_v18 = vld [vmem:[%s8899_s8 + $0x18] sm:$0xf]  ;;  %s8770_s21 = smov [#allocation4]  }
  0x35   : > { %v316_v57 = vsel %vm8924_vm4, %v311_v47, %v315_v30  ;;  %v326_v58 = vsel %vm8924_vm4, %v321_v48, %v325_v33  ;;  %v2412_v59 = vor.u32 %v2411_v49, %v2407_v44  ;;  %v341_v60 = vshrl.u32 %v254_v41, 16  ;;  %v256_v23 = vld [vmem:[%s8899_s8 + $0x1c] sm:$0xf]  ;;  %v286_v32 = vld [vmem:[%s8899_s8 + $0x20] sm:$0x1]  ;;  %s8703_s22 = sshll.u32 %s8770_s21, 4  ;;  %s8704_s22 = int_to_ptr.vmem [resolvable:$false] %s8703_s22 }
  0x36   : > { %v6855_v62 = vcombine.low %v316_v57, %v326_v58  ;;  %v2403_v63 = vrot.slane %v2402_v52, 4  ;;  %v334_v0 = vor.u32 %v333_v54, %v330_v53  ;;  %v339_v2 = vrot.slane %v337_v55, 5  ;;  %v7047_v38 = vld [vmem:[%s8899_s8 + $0x24] sm:$0xf]  ;;  %v7048_v43 = vld [vmem:[%s8899_s8 + $0x28] sm:$0xf] }
  0x37   : > { %v2413_v5 = vrot.slane %v2412_v59, 4  ;;  %v343_v6 = vrot.slane %v341_v60, 4  ;;  %v347_v7 = vshll.u32 %v285_v51, 16  ;;  %v2420_v9 = vshrl.u32 %v7044_v56, 16  ;;  %v7049_v53 = vld [vmem:[%s8899_s8 + $0x2c] sm:$0x1] }
  0x38   : > { %6873 = vmatmul.mubr.msk.bf16.vlgmr.msra.gmra.mrb[0].mxu1 %vm746_vm3, %v6855_v62  ;;  %v2408_v10 = vsel %vm8924_vm4, %v2403_v63, %v2407_v44  ;;  %v335_v15 = vrot.slane %v334_v0, 4  ;;  %v2423_v16 = vshll.u32 %v7044_v56, 16  ;;  %v2429_v17 = vshll.u32 %v7045_v61, 16  ;;  %v257_v56 = vld [vmem:[%s8899_s8 + $0x24] sm:$0xf]  ;;  %s8705_s23 = scalar_lea.vmem %s8704_s22, 4096 }
  0x39   : > { %v2418_v19 = vsel %vm8924_vm4, %v2413_v5, %v2417_v50  ;;  %844 = vmatprep.mubr.bf16.mxu1 %v8766_v4  ;;  %v344_v20 = vor.u32 %v343_v6, %v339_v2  ;;  %v349_v21 = vrot.slane %v347_v7, 5  ;;  %v2422_v22 = vrot.slane %v2420_v9, 4  ;;  %1139 = vmatpush1.bf16.msra.mxu1 %v8906_v13  ;;  %v258_v5 = vld [vmem:[%s8899_s8 + $0x28] sm:$0xf] }
  0x3a   : > { %v7090_v24 = vcombine.low %v2408_v10, %v2418_v19  ;;  %v340_v25 = vsel %vm8924_vm4, %v335_v15, %v339_v2  ;;  %v2425_v26 = vrot.slane %v2423_v16, 5  ;;  %v2431_v28 = vrot.slane %v2429_v17, 5  ;;  %v287_v15 = vld [vmem:[%s8899_s8 + $0x2c] sm:$0x1]  ;;  %v7050_v16 = vld [vmem:[%s8899_s8 + $0x30] sm:$0xf] }
  0x3b   : > { %v345_v29 = vrot.slane %v344_v20, 4  ;;  %v2433_v30 = vshrl.u32 %v7045_v61, 16  ;;  %v2439_v31 = vshll.u32 %v7046_v8, 16  ;;  %v352_v33 = vshrl.u32 %v255_v18, 16 }
  0x3c   : > { %7108 = vmatmul.mubr.msk.bf16.vlgmr.msra.gmra.mrb[0].mxu0 %vm746_vm3, %v7090_v24  ;;  %v2426_v34 = vor.u32 %v2425_v26, %v2422_v22  ;;  %v355_v35 = vshll.u32 %v255_v18, 16  ;;  %v361_v36 = vshll.u32 %v256_v23, 16  ;;  %v365_v37 = vshrl.u32 %v256_v23, 16 }
  0x3d   : > { %3471 = vmatpush1.bf16.msra.mxu0 %v8902_v12  ;;  %2934 = vmatprep.mubr.bf16.mxu0 %v8766_v4  ;;  %v350_v13 = vsel %vm8924_vm4, %v345_v29, %v349_v21  ;;  %v2435_v39 = vrot.slane %v2433_v30, 4  ;;  %v2441_v40 = vrot.slane %v2439_v31, 5  ;;  %v354_v41 = vrot.slane %v352_v33, 4  ;;  %v7051_v29 = vld [vmem:[%s8899_s8 + $0x34] sm:$0xf] }
  0x3e   : > { %v6856_v44 = vcombine.low %v340_v25, %v350_v13  ;;  %v2427_v45 = vrot.slane %v2426_v34, 4  ;;  %v357_v46 = vrot.slane %v355_v35, 5  ;;  %v363_v47 = vrot.slane %v361_v36, 5  ;;  %7273 = vmatprep.subr.msk.bf16.mxu0 %vm795_vm0, %v3850_v27  ;;  %v7052_v34 = vld [vmem:[%s8899_s8 + $0x38] sm:$0x1] }
  0x3f   : > { %v2436_v12 = vor.u32 %v2435_v39, %v2431_v28  ;;  %v367_v48 = vrot.slane %v365_v37, 4  ;;  %v371_v49 = vshll.u32 %v286_v32, 16  ;;  %v2444_v50 = vshrl.u32 %v7047_v38, 16  ;;  %v259_v39 = vld [vmem:[%s8899_s8 + $0x30] sm:$0xf] }
  0x40   : > { %6874 = vmatmul.mubr.msk.bf16.gmra.mrb[4].mxu1 %vm746_vm3, %v6856_v44  ;;  %v2432_v51 = vsel %vm8924_vm4, %v2427_v45, %v2431_v28  ;;  %v358_v52 = vor.u32 %v357_v46, %v354_v41  ;;  %v2447_v54 = vshll.u32 %v7047_v38, 16  ;;  %v2453_v55 = vshll.u32 %v7048_v43, 16 }
  0x41   : > { %v2437_v57 = vrot.slane %v2436_v12, 4  ;;  %854 = vmatprep.mubr.bf16.mxu1 %v8766_v4  ;;  %v368_v11 = vor.u32 %v367_v48, %v363_v47  ;;  %v373_v27 = vrot.slane %v371_v49, 5  ;;  %v2446_v58 = vrot.slane %v2444_v50, 4  ;;  %v260_v48 = vld [vmem:[%s8899_s8 + $0x34] sm:$0xf] }
  0x42   : > { %v359_v59 = vrot.slane %v358_v52, 4  ;;  %v2449_v60 = vrot.slane %v2447_v54, 5  ;;  %v2455_v61 = vrot.slane %v2453_v55, 5  ;;  %v2457_v62 = vshrl.u32 %v7048_v43, 16  ;;  %v288_v52 = vld [vmem:[%s8899_s8 + $0x38] sm:$0x1] }
  0x43   : > { %v2442_v63 = vsel %vm8924_vm4, %v2437_v57, %v2441_v40  ;;  %v369_v0 = vrot.slane %v368_v11, 4  ;;  %v2463_v2 = vshll.u32 %v7049_v53, 16  ;;  %v376_v6 = vshrl.u32 %v257_v56, 16 }
  0x44   : > { %v7091_v7 = vcombine.low %v2432_v51, %v2442_v63  ;;  %v364_v8 = vsel %vm8924_vm4, %v359_v59, %v363_v47  ;;  %v2450_v9 = vor.u32 %v2449_v60, %v2446_v58  ;;  %v2459_v10 = vrot.slane %v2457_v62, 4  ;;  %v7053_v60 = vld [vmem:[%s8899_s8 + $0x3c] sm:$0xf] }
  0x45   : > { %v374_v17 = vsel %vm8924_vm4, %v369_v0, %v373_v27  ;;  %v2465_v18 = vrot.slane %v2463_v2, 5  ;;  %v378_v19 = vrot.slane %v376_v6, 4  ;;  %v379_v20 = vshll.u32 %v257_v56, 16  ;;  %v7054_v2 = vld [vmem:[%s8899_s8 + $0x40] sm:$0xf] }
  0x46   : > { %7109 = vmatmul.mubr.msk.bf16.gmra.mrb[4].mxu0 %vm746_vm3, %v7091_v7  ;;  %v6857_v21 = vcombine.low %v364_v8, %v374_v17  ;;  %v2451_v22 = vrot.slane %v2450_v9, 4  ;;  %v2460_v23 = vor.u32 %v2459_v10, %v2455_v61  ;;  %v385_v24 = vshll.u32 %v258_v5, 16 }
  0x47   : > { %2944 = vmatprep.mubr.bf16.mxu0 %v8766_v4  ;;  %v381_v25 = vrot.slane %v379_v20, 5  ;;  %v389_v26 = vshrl.u32 %v258_v5, 16  ;;  %v395_v28 = vshll.u32 %v287_v15, 16  ;;  %v2468_v30 = vshrl.u32 %v7050_v16, 16 }
  0x48   : > { %6875 = vmatmul.mubr.msk.bf16.gmra.mrb[8].mxu1 %vm746_vm3, %v6857_v21  ;;  %v2456_v31 = vsel %vm8924_vm4, %v2451_v22, %v2455_v61  ;;  %v2461_v32 = vrot.slane %v2460_v23, 4  ;;  %v387_v33 = vrot.slane %v385_v24, 5  ;;  %v2471_v35 = vshll.u32 %v7050_v16, 16  ;;  %v7055_v16 = vld [vmem:[%s8899_s8 + $0x44] sm:$0x1] }
  0x49   : > { %864 = vmatprep.mubr.bf16.mxu1 %v8766_v4  ;;  %v382_v36 = vor.u32 %v381_v25, %v378_v19  ;;  %v391_v37 = vrot.slane %v389_v26, 4  ;;  %v397_v38 = vrot.slane %v395_v28, 5  ;;  %v2470_v13 = vrot.slane %v2468_v30, 4  ;;  %v261_v22 = vld [vmem:[%s8899_s8 + $0x3c] sm:$0xf] }
  0x4a   : > { %v2466_v40 = vsel %vm8924_vm4, %v2461_v32, %v2465_v18  ;;  %v2473_v41 = vrot.slane %v2471_v35, 5  ;;  %v2477_v43 = vshll.u32 %v7051_v29, 16  ;;  %v2481_v44 = vshrl.u32 %v7051_v29, 16  ;;  %v262_v28 = vld [vmem:[%s8899_s8 + $0x40] sm:$0xf] }
  0x4b   : > { %v7092_v45 = vcombine.low %v2456_v31, %v2466_v40  ;;  %v383_v46 = vrot.slane %v382_v36, 4  ;;  %v392_v47 = vor.u32 %v391_v37, %v387_v33  ;;  %v2487_v12 = vshll.u32 %v7052_v34, 16 }
  0x4c   : > { %v2474_v49 = vor.u32 %v2473_v41, %v2470_v13  ;;  %v2479_v50 = vrot.slane %v2477_v43, 5  ;;  %v2483_v51 = vrot.slane %v2481_v44, 4  ;;  %v400_v53 = vshrl.u32 %v259_v39, 16  ;;  %v7056_v41 = vld [vmem:[%s8899_s8 + $0x48] sm:$0xf] }
  0x4d   : > { %v388_v54 = vsel %vm8924_vm4, %v383_v46, %v387_v33  ;;  %v393_v55 = vrot.slane %v392_v47, 4  ;;  %v2489_v56 = vrot.slane %v2487_v12, 5  ;;  %v403_v57 = vshll.u32 %v259_v39, 16  ;;  %v289_v39 = vld [vmem:[%s8899_s8 + $0x44] sm:$0x1] }
  0x4e   : > { %7110 = vmatmul.mubr.msk.bf16.gmra.mrb[8].mxu0 %vm746_vm3, %v7092_v45  ;;  %v2475_v11 = vrot.slane %v2474_v49, 4  ;;  %v2484_v27 = vor.u32 %v2483_v51, %v2479_v50  ;;  %v402_v58 = vrot.slane %v400_v53, 4  ;;  %v409_v59 = vshll.u32 %v260_v48, 16  ;;  %v7057_v47 = vld [vmem:[%s8899_s8 + $0x4c] sm:$0xf] }
  0x4f   : > { %2954 = vmatprep.mubr.bf16.mxu0 %v8766_v4  ;;  %v398_v61 = vsel %vm8924_vm4, %v393_v55, %v397_v38  ;;  %v405_v62 = vrot.slane %v403_v57, 5  ;;  %v413_v63 = vshrl.u32 %v260_v48, 16  ;;  %v419_v0 = vshll.u32 %v288_v52, 16  ;;  %v7058_v57 = vld [vmem:[%s8899_s8 + $0x50] sm:$0x1] }
  0x50   : > { %v6858_v5 = vcombine.low %v388_v54, %v398_v61  ;;  %v2480_v6 = vsel %vm8924_vm4, %v2475_v11, %v2479_v50  ;;  %v2485_v7 = vrot.slane %v2484_v27, 4  ;;  %v411_v8 = vrot.slane %v409_v59, 5 }
  0x51   : > { %v406_v9 = vor.u32 %v405_v62, %v402_v58  ;;  %v415_v10 = vrot.slane %v413_v63, 4  ;;  %v421_v15 = vrot.slane %v419_v0, 5  ;;  %v2492_v17 = vshrl.u32 %v7053_v60, 16  ;;  %v263_v58 = vld [vmem:[%s8899_s8 + $0x48] sm:$0xf] }
  0x52   : > { %6876 = vmatmul.mubr.msk.bf16.gmra.mrb[12].mxu1 %vm746_vm3, %v6858_v5  ;;  %v2490_v18 = vsel %vm8924_vm4, %v2485_v7, %v2489_v56  ;;  %v2495_v19 = vshll.u32 %v7053_v60, 16  ;;  %v2501_v20 = vshll.u32 %v7054_v2, 16  ;;  %v2505_v21 = vshrl.u32 %v7054_v2, 16  ;;  %v264_v63 = vld [vmem:[%s8899_s8 + $0x4c] sm:$0xf] }
  0x53   : > { %v7093_v23 = vcombine.low %v2480_v6, %v2490_v18  ;;  %874 = vmatprep.mubr.bf16.mxu1 %v8766_v4  ;;  %v407_v24 = vrot.slane %v406_v9, 4  ;;  %v416_v25 = vor.u32 %v415_v10, %v411_v8  ;;  %v2494_v26 = vrot.slane %v2492_v17, 4  ;;  %v290_v10 = vld [vmem:[%s8899_s8 + $0x50] sm:$0x1] }
  0x54   : > { %v2497_v29 = vrot.slane %v2495_v19, 5  ;;  %v2503_v30 = vrot.slane %v2501_v20, 5  ;;  %v2507_v31 = vrot.slane %v2505_v21, 4  ;;  %v2511_v32 = vshll.u32 %v7055_v16, 16  ;;  %v7059_v20 = vld [vmem:[%s8899_s8 + $0x54] sm:$0xf] }
  0x55   : > { %v412_v33 = vsel %vm8924_vm4, %v407_v24, %v411_v8  ;;  %v417_v34 = vrot.slane %v416_v25, 4  ;;  %v424_v35 = vshrl.u32 %v261_v22, 16  ;;  %v427_v36 = vshll.u32 %v261_v22, 16 }
  0x56   : > { %7111 = vmatmul.mubr.msk.bf16.gmra.mrb[12].mxu0 %vm746_vm3, %v7093_v23  ;;  %v2498_v37 = vor.u32 %v2497_v29, %v2494_v26  ;;  %v2508_v38 = vor.u32 %v2507_v31, %v2503_v30  ;;  %v2513_v13 = vrot.slane %v2511_v32, 5  ;;  %v433_v40 = vshll.u32 %v262_v28, 16 }
  0x57   : > { %2964 = vmatprep.mubr.bf16.mxu0 %v8766_v4  ;;  %v422_v43 = vsel %vm8924_vm4, %v417_v34, %v421_v15  ;;  %v426_v44 = vrot.slane %v424_v35, 4  ;;  %v429_v45 = vrot.slane %v427_v36, 5  ;;  %v437_v46 = vshrl.u32 %v262_v28, 16 }
  0x58   : > { %v6859_v12 = vcombine.low %v412_v33, %v422_v43  ;;  %v2499_v48 = vrot.slane %v2498_v37, 4  ;;  %v2509_v49 = vrot.slane %v2508_v38, 4  ;;  %v435_v50 = vrot.slane %v433_v40, 5  ;;  %v7061_v38 = vld [vmem:[%s8899_s8 + $0x5c] sm:$0x1] }
  0x59   : > { %v430_v51 = vor.u32 %v429_v45, %v426_v44  ;;  %v439_v52 = vrot.slane %v437_v46, 4  ;;  %v443_v53 = vshll.u32 %v289_v39, 16  ;;  %v2516_v54 = vshrl.u32 %v7056_v41, 16  ;;  %v265_v44 = vld [vmem:[%s8899_s8 + $0x54] sm:$0xf] }
  0x5a   : > { %6877 = vmatmul.mubr.msk.bf16.gmra.mrb[16].mxu1 %vm746_vm3, %v6859_v12  ;;  %v2504_v55 = vsel %vm8924_vm4, %v2499_v48, %v2503_v30  ;;  %v2514_v56 = vsel %vm8924_vm4, %v2509_v49, %v2513_v13  ;;  %v2519_v11 = vshll.u32 %v7056_v41, 16  ;;  %v2525_v27 = vshll.u32 %v7057_v47, 16  ;;  %v7060_v30 = vld [vmem:[%s8899_s8 + $0x58] sm:$0xf] }
  0x5b   : > { %v7094_v59 = vcombine.low %v2504_v55, %v2514_v56  ;;  %884 = vmatprep.mubr.bf16.mxu1 %v8766_v4  ;;  %v431_v60 = vrot.slane %v430_v51, 4  ;;  %v440_v61 = vor.u32 %v439_v52, %v435_v50  ;;  %v445_v62 = vrot.slane %v443_v53, 5  ;;  %v266_v48 = vld [vmem:[%s8899_s8 + $0x58] sm:$0xf]  ;;  %v291_v56 = vld [vmem:[%s8899_s8 + $0x5c] sm:$0x1] }
  0x5c   : > { %v2518_v0 = vrot.slane %v2516_v54, 4  ;;  %v2521_v2 = vrot.slane %v2519_v11, 5  ;;  %v2527_v5 = vrot.slane %v2525_v27, 5  ;;  %v2529_v6 = vshrl.u32 %v7057_v47, 16 }
  0x5d   : > { %v436_v7 = vsel %vm8924_vm4, %v431_v60, %v435_v50  ;;  %v441_v8 = vrot.slane %v440_v61, 4  ;;  %v2535_v9 = vshll.u32 %v7058_v57, 16  ;;  %v448_v15 = vshrl.u32 %v263_v58, 16  ;;  %v7062_v60 = vld [vmem:[%s8899_s8 + $0x60] sm:$0xf] }
  0x5e   : > { %7112 = vmatmul.mubr.msk.bf16.gmra.mrb[16].mxu0 %vm746_vm3, %v7094_v59  ;;  %v2522_v16 = vor.u32 %v2521_v2, %v2518_v0  ;;  %v2531_v17 = vrot.slane %v2529_v6, 4  ;;  %v451_v18 = vshll.u32 %v263_v58, 16  ;;  %v457_v19 = vshll.u32 %v264_v63, 16  ;;  %v7063_v2 = vld [vmem:[%s8899_s8 + $0x64] sm:$0xf] }
  0x5f   : > { %2974 = vmatprep.mubr.bf16.mxu0 %v8766_v4  ;;  %v446_v21 = vsel %vm8924_vm4, %v441_v8, %v445_v62  ;;  %v2537_v22 = vrot.slane %v2535_v9, 5  ;;  %v450_v23 = vrot.slane %v448_v15, 4  ;;  %v461_v24 = vshrl.u32 %v264_v63, 16  ;;  %v7064_v15 = vld [vmem:[%s8899_s8 + $0x68] sm:$0x1] }
  0x60   : > { %v6860_v25 = vcombine.low %v436_v7, %v446_v21  ;;  %v2523_v26 = vrot.slane %v2522_v16, 4  ;;  %v2532_v28 = vor.u32 %v2531_v17, %v2527_v5  ;;  %v453_v29 = vrot.slane %v451_v18, 5 }
  0x61   : > { %v459_v31 = vrot.slane %v457_v19, 5  ;;  %v463_v32 = vrot.slane %v461_v24, 4  ;;  %v467_v33 = vshll.u32 %v290_v10, 16  ;;  %v2540_v34 = vshrl.u32 %v7059_v20, 16 }
  0x62   : > { %6878 = vmatmul.mubr.msk.bf16.gmra.mrb[20].mxu1 %vm746_vm3, %v6860_v25  ;;  %v2528_v35 = vsel %vm8924_vm4, %v2523_v26, %v2527_v5  ;;  %v2533_v36 = vrot.slane %v2532_v28, 4  ;;  %v454_v37 = vor.u32 %v453_v29, %v450_v23  ;;  %v2543_v13 = vshll.u32 %v7059_v20, 16  ;;  %v268_v28 = vld [vmem:[%s8899_s8 + $0x64] sm:$0xf] }
  0x63   : > { %894 = vmatprep.mubr.bf16.mxu1 %v8766_v4  ;;  %v464_v39 = vor.u32 %v463_v32, %v459_v31  ;;  %v469_v40 = vrot.slane %v467_v33, 5  ;;  %v2542_v41 = vrot.slane %v2540_v34, 4  ;;  %v2549_v43 = vshll.u32 %v7060_v30, 16 }
  0x64   : > { %v2538_v45 = vsel %vm8924_vm4, %v2533_v36, %v2537_v22  ;;  %v455_v46 = vrot.slane %v454_v37, 4  ;;  %v2545_v47 = vrot.slane %v2543_v13, 5  ;;  %v2553_v12 = vshrl.u32 %v7060_v30, 16  ;;  %v267_v22 = vld [vmem:[%s8899_s8 + $0x60] sm:$0xf] }
  0x65   : > { %v7095_v49 = vcombine.low %v2528_v35, %v2538_v45  ;;  %v465_v50 = vrot.slane %v464_v39, 4  ;;  %v2551_v51 = vrot.slane %v2549_v43, 5  ;;  %v2559_v52 = vshll.u32 %v7061_v38, 16  ;;  %v292_v13 = vld [vmem:[%s8899_s8 + $0x68] sm:$0x1] }
  0x66   : > { %v460_v53 = vsel %vm8924_vm4, %v455_v46, %v459_v31  ;;  %v2546_v54 = vor.u32 %v2545_v47, %v2542_v41  ;;  %v2555_v55 = vrot.slane %v2553_v12, 4  ;;  %v472_v57 = vshrl.u32 %v265_v44, 16  ;;  %v7065_v46 = vld [vmem:[%s8899_s8 + $0x6c] sm:$0xf] }
  0x67   : > { %7113 = vmatmul.mubr.msk.bf16.gmra.mrb[20].mxu0 %vm746_vm3, %v7095_v49  ;;  %v470_v11 = vsel %vm8924_vm4, %v465_v50, %v469_v40  ;;  %v2561_v27 = vrot.slane %v2559_v52, 5  ;;  %v475_v58 = vshll.u32 %v265_v44, 16  ;;  %v481_v59 = vshll.u32 %v266_v48, 16  ;;  %v7066_v50 = vld [vmem:[%s8899_s8 + $0x70] sm:$0xf] }
  0x68   : > { %2984 = vmatprep.mubr.bf16.mxu0 %v8766_v4  ;;  %v6861_v61 = vcombine.low %v460_v53, %v470_v11  ;;  %v2547_v62 = vrot.slane %v2546_v54, 4  ;;  %v2556_v63 = vor.u32 %v2555_v55, %v2551_v51  ;;  %v474_v0 = vrot.slane %v472_v57, 4  ;;  %v7067_v57 = vld [vmem:[%s8899_s8 + $0x74] sm:$0x1] }
  0x69   : > { %v477_v5 = vrot.slane %v475_v58, 5  ;;  %v483_v6 = vrot.slane %v481_v59, 5  ;;  %v485_v7 = vshrl.u32 %v266_v48, 16  ;;  %v491_v8 = vshll.u32 %v291_v56, 16 }
  0x6a   : > { %6879 = vmatmul.mubr.msk.bf16.gmra.mrb[24].mxu1 %vm746_vm3, %v6861_v61  ;;  %v2552_v9 = vsel %vm8924_vm4, %v2547_v62, %v2551_v51  ;;  %v2557_v10 = vrot.slane %v2556_v63, 4  ;;  %v2564_v16 = vshrl.u32 %v7062_v60, 16  ;;  %v2567_v17 = vshll.u32 %v7062_v60, 16  ;;  %v269_v62 = vld [vmem:[%s8899_s8 + $0x6c] sm:$0xf] }
  0x6b   : > { %904 = vmatprep.mubr.bf16.mxu1 %v8766_v4  ;;  %v478_v18 = vor.u32 %v477_v5, %v474_v0  ;;  %v487_v19 = vrot.slane %v485_v7, 4  ;;  %v493_v20 = vrot.slane %v491_v8, 5  ;;  %v2573_v21 = vshll.u32 %v7063_v2, 16 }
  0x6c   : > { %v2562_v23 = vsel %vm8924_vm4, %v2557_v10, %v2561_v27  ;;  %v2566_v24 = vrot.slane %v2564_v16, 4  ;;  %v2569_v25 = vrot.slane %v2567_v17, 5  ;;  %v2577_v26 = vshrl.u32 %v7063_v2, 16 }
  0x6d   : > { %v7096_v29 = vcombine.low %v2552_v9, %v2562_v23  ;;  %v479_v30 = vrot.slane %v478_v18, 4  ;;  %v488_v31 = vor.u32 %v487_v19, %v483_v6  ;;  %v2575_v32 = vrot.slane %v2573_v21, 5 }
  0x6e   : > { %v2570_v33 = vor.u32 %v2569_v25, %v2566_v24  ;;  %v2579_v34 = vrot.slane %v2577_v26, 4  ;;  %v2583_v35 = vshll.u32 %v7064_v15, 16  ;;  %v496_v36 = vshrl.u32 %v267_v22, 16  ;;  %v7068_v24 = vld [vmem:[%s8899_s8 + $0x78] sm:$0xf] }
  0x6f   : > { %7114 = vmatmul.mubr.msk.bf16.gmra.mrb[24].mxu0 %vm746_vm3, %v7096_v29  ;;  %v484_v37 = vsel %vm8924_vm4, %v479_v30, %v483_v6  ;;  %v489_v38 = vrot.slane %v488_v31, 4  ;;  %v499_v39 = vshll.u32 %v267_v22, 16  ;;  %v505_v40 = vshll.u32 %v268_v28, 16  ;;  %v9076_v6 = vld [vmem:[%s8899_s8 + $0x70] sm:$0xf] }
  0x70   : > { %2994 = vmatprep.mubr.bf16.mxu0 %v8766_v4  ;;  %v2571_v41 = vrot.slane %v2570_v33, 4  ;;  %v2580_v43 = vor.u32 %v2579_v34, %v2575_v32  ;;  %v2585_v44 = vrot.slane %v2583_v35, 5  ;;  %v498_v45 = vrot.slane %v496_v36, 4  ;;  %v293_v22 = vld [vmem:[%s8899_s8 + $0x74] sm:$0x1] }
  0x71   : > { %v494_v47 = vsel %vm8924_vm4, %v489_v38, %v493_v20  ;;  %v501_v12 = vrot.slane %v499_v39, 5  ;;  %v507_v48 = vrot.slane %v505_v40, 5  ;;  %v509_v49 = vshrl.u32 %v268_v28, 16  ;;  %v7069_v30 = vld [vmem:[%s8899_s8 + $0x7c] sm:$0xf] }
  0x72   : > { %v6862_v51 = vcombine.low %v484_v37, %v494_v47  ;;  %v2576_v52 = vsel %vm8924_vm4, %v2571_v41, %v2575_v32  ;;  %v2581_v53 = vrot.slane %v2580_v43, 4  ;;  %v515_v54 = vshll.u32 %v292_v13, 16  ;;  %v7070_v40 = vld [vmem:[%s8899_s8 + $0x80] sm:$0x1] }
  0x73   : > { %v502_v55 = vor.u32 %v501_v12, %v498_v45  ;;  %v511_v56 = vrot.slane %v509_v49, 4  ;;  %v2588_v11 = vshrl.u32 %v7065_v46, 16  ;;  %v2591_v27 = vshll.u32 %v7065_v46, 16 }
  0x74   : > { %6880 = vmatmul.mubr.msk.bf16.gmra.mrb[28].mxu1 %vm746_vm3, %v6862_v51  ;;  %v2586_v58 = vsel %vm8924_vm4, %v2581_v53, %v2585_v44  ;;  %v517_v59 = vrot.slane %v515_v54, 5  ;;  %v2597_v60 = vshll.u32 %v7066_v50, 16  ;;  %v2601_v61 = vshrl.u32 %v7066_v50, 16  ;;  %v9096_v44 = vld [vmem:[%s8899_s8 + $0x78] sm:$0xf] }
  0x75   : > { %v7097_v63 = vcombine.low %v2576_v52, %v2586_v58  ;;  %914 = vmatprep.mubr.bf16.mxu1 %v8766_v4  ;;  %v503_v0 = vrot.slane %v502_v55, 4  ;;  %v512_v2 = vor.u32 %v511_v56, %v507_v48  ;;  %v2590_v5 = vrot.slane %v2588_v11, 4  ;;  %v294_v56 = vld [vmem:[%s8899_s8 + $0x80] sm:$0x1] }
  0x76   : > { %v2593_v7 = vrot.slane %v2591_v27, 5  ;;  %v2599_v8 = vrot.slane %v2597_v60, 5  ;;  %v2603_v9 = vrot.slane %v2601_v61, 4  ;;  %v2607_v10 = vshll.u32 %v7067_v57, 16  ;;  %v7071_v60 = vld [vmem:[%s8899_s8 + $0x84] sm:$0xf] }
  0x77   : > { %7115 = vmatmul.mubr.msk.bf16.gmra.mrb[28].mxu0 %vm746_vm3, %v7097_v63  ;;  %v508_v15 = vsel %vm8924_vm4, %v503_v0, %v507_v48  ;;  %v513_v16 = vrot.slane %v512_v2, 4  ;;  %v520_v17 = vshrl.u32 %v269_v62, 16  ;;  %v523_v18 = vshll.u32 %v269_v62, 16  ;;  %v9100_v48 = vld [vmem:[%s8899_s8 + $0x7c] sm:$0xf] }
  0x78   : > { %3004 = vmatprep.mubr.bf16.mxu0 %v8766_v4  ;;  %v2594_v19 = vor.u32 %v2593_v7, %v2590_v5  ;;  %v2604_v20 = vor.u32 %v2603_v9, %v2599_v8  ;;  %v2609_v21 = vrot.slane %v2607_v10, 5  ;;  %v529_v23 = vshll.u32 %v9076_v6, 16  ;;  %v7072_v9 = vld [vmem:[%s8899_s8 + $0x88] sm:$0xf] }
  0x79   : > { %v518_v25 = vsel %vm8924_vm4, %v513_v16, %v517_v59  ;;  %v522_v26 = vrot.slane %v520_v17, 4  ;;  %v525_v28 = vrot.slane %v523_v18, 5  ;;  %v533_v29 = vshrl.u32 %v9076_v6, 16 }
  0x7a   : > { %v6863_v31 = vcombine.low %v508_v15, %v518_v25  ;;  %v2595_v32 = vrot.slane %v2594_v19, 4  ;;  %v2605_v33 = vrot.slane %v2604_v20, 4  ;;  %v531_v34 = vrot.slane %v529_v23, 5 }
  0x7b   : > { %v526_v35 = vor.u32 %v525_v28, %v522_v26  ;;  %v535_v36 = vrot.slane %v533_v29, 4  ;;  %v539_v37 = vshll.u32 %v293_v22, 16  ;;  %v2612_v38 = vshrl.u32 %v7068_v24, 16  ;;  %v9121_v28 = vld [vmem:[%s8899_s8 + $0x84] sm:$0xf] }
  0x7c   : > { %6881 = vmatmul.mubr.msk.bf16.gmra.mrb[32].mxu1 %vm746_vm3, %v6863_v31  ;;  %v2600_v13 = vsel %vm8924_vm4, %v2595_v32, %v2599_v8  ;;  %v2610_v39 = vsel %vm8924_vm4, %v2605_v33, %v2609_v21  ;;  %v2615_v41 = vshll.u32 %v7068_v24, 16  ;;  %v2621_v43 = vshll.u32 %v7069_v30, 16  ;;  %v7073_v21 = vld [vmem:[%s8899_s8 + $0x8c] sm:$0x1]  ;;  %v9126_v33 = vld [vmem:[%s8899_s8 + $0x88] sm:$0xf] }
  0x7d   : > { %v7098_v45 = vcombine.low %v2600_v13, %v2610_v39  ;;  %924 = vmatprep.mubr.bf16.mxu1 %v8766_v4  ;;  %v527_v46 = vrot.slane %v526_v35, 4  ;;  %v536_v47 = vor.u32 %v535_v36, %v531_v34  ;;  %v541_v12 = vrot.slane %v539_v37, 5 }
  0x7e   : > { %v2614_v49 = vrot.slane %v2612_v38, 4  ;;  %v2617_v50 = vrot.slane %v2615_v41, 5  ;;  %v2623_v51 = vrot.slane %v2621_v43, 5  ;;  %v2625_v52 = vshrl.u32 %v7069_v30, 16  ;;  %v7124_v43 = vld [vmem:[%s8899_s8 + $0xc] sm:$0xe] }
  0x7f   : > { %7116 = vmatmul.mubr.msk.bf16.gmra.mrb[32].mxu0 %vm746_vm3, %v7098_v45  ;;  %v532_v53 = vsel %vm8924_vm4, %v527_v46, %v531_v34  ;;  %v537_v54 = vrot.slane %v536_v47, 4  ;;  %v2631_v55 = vshll.u32 %v7070_v40, 16  ;;  %v544_v57 = vshrl.u32 %v9096_v44, 16  ;;  %v295_v40 = vld [vmem:[%s8899_s8 + $0x8c] sm:$0x1] }
  0x80   : > { %3014 = vmatprep.mubr.bf16.mxu0 %v8766_v4  ;;  %v2618_v11 = vor.u32 %v2617_v50, %v2614_v49  ;;  %v2627_v27 = vrot.slane %v2625_v52, 4  ;;  %v547_v58 = vshll.u32 %v9096_v44, 16  ;;  %v553_v59 = vshll.u32 %v9100_v48, 16  ;;  %v7125_v49 = vld [vmem:[%s8899_s8 + $0x10] sm:$0xf] }
  0x81   : > { %v542_v61 = vsel %vm8924_vm4, %v537_v54, %v541_v12  ;;  %v2633_v62 = vrot.slane %v2631_v55, 5  ;;  %v546_v63 = vrot.slane %v544_v57, 4  ;;  %v557_v0 = vshrl.u32 %v9100_v48, 16  ;;  %v7126_v54 = vld [vmem:[%s8899_s8 + $0x14] sm:$0x1] }
  0x82   : > { %v6864_v2 = vcombine.low %v532_v53, %v542_v61  ;;  %v2619_v5 = vrot.slane %v2618_v11, 4  ;;  %v2628_v7 = vor.u32 %v2627_v27, %v2623_v51  ;;  %v549_v8 = vrot.slane %v547_v58, 5  ;;  %v9149_v58 = vld [vmem:[%s8899_s8 + $0x90] sm:$0xf] }
  0x83   : > { %v555_v10 = vrot.slane %v553_v59, 5  ;;  %v559_v15 = vrot.slane %v557_v0, 4  ;;  %v563_v16 = vshll.u32 %v294_v56, 16  ;;  %v2636_v17 = vshrl.u32 %v7071_v60, 16 }
  0x84   : > { %6882 = vmatmul.mubr.msk.bf16.gmra.mrb[36].mxu1 %vm746_vm3, %v6864_v2  ;;  %v2624_v18 = vsel %vm8924_vm4, %v2619_v5, %v2623_v51  ;;  %v2629_v19 = vrot.slane %v2628_v7, 4  ;;  %v550_v20 = vor.u32 %v549_v8, %v546_v63  ;;  %v2639_v22 = vshll.u32 %v7071_v60, 16  ;;  %v9155_v63 = vld [vmem:[%s8899_s8 + $0x94] sm:$0xf]  ;;  %v296_v8 = vld [vmem:[%s8899_s8 + $0x98] sm:$0x1] }
  0x85   : > { %934 = vmatprep.mubr.bf16.mxu1 %v8766_v4  ;;  %v560_v23 = vor.u32 %v559_v15, %v555_v10  ;;  %v565_v24 = vrot.slane %v563_v16, 5  ;;  %v2638_v25 = vrot.slane %v2636_v17, 4  ;;  %v2645_v26 = vshll.u32 %v7072_v9, 16 }
  0x86   : > { %v2634_v29 = vsel %vm8924_vm4, %v2629_v19, %v2633_v62  ;;  %v551_v30 = vrot.slane %v550_v20, 4  ;;  %v2641_v31 = vrot.slane %v2639_v22, 5  ;;  %v2649_v32 = vshrl.u32 %v7072_v9, 16  ;;  %v7127_v9 = vld [vmem:[%s8899_s8 + $0x18] sm:$0xe] }
  0x87   : > { %v7099_v34 = vcombine.low %v2624_v18, %v2634_v29  ;;  %v561_v35 = vrot.slane %v560_v23, 4  ;;  %v2647_v36 = vrot.slane %v2645_v26, 5  ;;  %v2655_v37 = vshll.u32 %v7073_v21, 16  ;;  %v7128_v18 = vld [vmem:[%s8899_s8 + $0x1c] sm:$0xf] }
  0x88   : > { %v556_v38 = vsel %vm8924_vm4, %v551_v30, %v555_v10  ;;  %v2642_v13 = vor.u32 %v2641_v31, %v2638_v25  ;;  %v2651_v39 = vrot.slane %v2649_v32, 4  ;;  %v568_v41 = vshrl.u32 %v9121_v28, 16  ;;  %v7129_v19 = vld [vmem:[%s8899_s8 + $0x20] sm:$0x1] }
  0x89   : > { %7117 = vmatmul.mubr.msk.bf16.gmra.mrb[36].mxu0 %vm746_vm3, %v7099_v34  ;;  %v566_v45 = vsel %vm8924_vm4, %v561_v35, %v565_v24  ;;  %v2657_v46 = vrot.slane %v2655_v37, 5  ;;  %v571_v47 = vshll.u32 %v9121_v28, 16  ;;  %v577_v12 = vshll.u32 %v9126_v33, 16  ;;  %v9169_v24 = vld [vmem:[%s8899_s8 + $0x9c] sm:$0xf] }
  0x8a   : > { %3024 = vmatprep.mubr.bf16.mxu0 %v8766_v4  ;;  %v6865_v50 = vcombine.low %v556_v38, %v566_v45  ;;  %v2643_v51 = vrot.slane %v2642_v13, 4  ;;  %v2652_v52 = vor.u32 %v2651_v39, %v2647_v36  ;;  %v570_v53 = vrot.slane %v568_v41, 4  ;;  %v9182_v45 = vld [vmem:[%s8899_s8 + $0xa0] sm:$0xf] }
  0x8b   : > { %v573_v55 = vrot.slane %v571_v47, 5  ;;  %v579_v56 = vrot.slane %v577_v12, 5  ;;  %v581_v57 = vshrl.u32 %v9126_v33, 16  ;;  %v587_v11 = vshll.u32 %v295_v40, 16 }
  0x8c   : > { %6883 = vmatmul.mubr.msk.bf16.gmra.mrb[40].mxu1 %vm746_vm3, %v6865_v50  ;;  %v2648_v59 = vsel %vm8924_vm4, %v2643_v51, %v2647_v36  ;;  %v2653_v60 = vrot.slane %v2652_v52, 4  ;;  %v7172_v61 = vrot.slane %v7124_v43, 9  ;;  %v3247_v62 = vrot.slane %v7125_v49, 5 }
  0x8d   : > { %944 = vmatprep.mubr.bf16.mxu1 %v8766_v4  ;;  %v574_v0 = vor.u32 %v573_v55, %v570_v53  ;;  %v583_v2 = vrot.slane %v581_v57, 4  ;;  %v589_v5 = vrot.slane %v587_v11, 5  ;;  %v3250_v7 = vrot.slane %v7126_v54, 5  ;;  %v7130_v55 = vld [vmem:[%s8899_s8 + $0x24] sm:$0xe] }
  0x8e   : > { %v2658_v10 = vsel %vm8924_vm4, %v2653_v60, %v2657_v46  ;;  %v3248_v15 = vsel %vm9144_vm7, %v7172_v61, %v3247_v62  ;;  %v3249_v16 = vrot.slane %v3247_v62, 4  ;;  %v592_v17 = vshrl.u32 %v9149_v58, 16  ;;  %v297_v46 = vld [vmem:[%s8899_s8 + $0xa4] sm:$0x1]  ;;  %v9192_v57 = vld [vmem:[%s8899_s8 + $0xa8] sm:$0xf] }
  0x8f   : > { %v7100_v20 = vcombine.low %v2648_v59, %v2658_v10  ;;  %v575_v21 = vrot.slane %v574_v0, 4  ;;  %v584_v22 = vor.u32 %v583_v2, %v579_v56  ;;  %v595_v23 = vshll.u32 %v9149_v58, 16  ;;  %v9198_v62 = vld [vmem:[%s8899_s8 + $0xac] sm:$0xf] }
  0x90   : > { %v3251_v25 = vsel %vm9144_vm7, %v3249_v16, %v3250_v7  ;;  %v594_v26 = vrot.slane %v592_v17, 4  ;;  %v601_v29 = vshll.u32 %v9155_v63, 16  ;;  %v605_v30 = vshrl.u32 %v9155_v63, 16 }
  0x91   : > { %7118 = vmatmul.mubr.msk.bf16.gmra.mrb[40].mxu0 %vm746_vm3, %v7100_v20  ;;  %v580_v31 = vsel %vm8924_vm4, %v575_v21, %v579_v56  ;;  %v585_v32 = vrot.slane %v584_v22, 4  ;;  %v7189_v34 = vcombine.low %v3248_v15, %v3251_v25  ;;  %v597_v35 = vrot.slane %v595_v23, 5  ;;  %v7131_v56 = vld [vmem:[%s8899_s8 + $0x28] sm:$0xf]  ;;  %v298_v20 = vld [vmem:[%s8899_s8 + $0xb0] sm:$0x1] }
  0x92   : > { %3502 = vmatprep.mubr.bf16.mxu0 %v8766_v4  ;;  %v603_v36 = vrot.slane %v601_v29, 5  ;;  %v607_v37 = vrot.slane %v605_v30, 4  ;;  %v611_v38 = vshll.u32 %v296_v8, 16  ;;  %v7173_v13 = vrot.slane %v7127_v9, 9  ;;  %v7132_v8 = vld [vmem:[%s8899_s8 + $0x2c] sm:$0x1] }
  0x93   : > { %v590_v39 = vsel %vm8924_vm4, %v585_v32, %v589_v5  ;;  %v598_v40 = vor.u32 %v597_v35, %v594_v26  ;;  %v3254_v41 = vrot.slane %v7128_v18, 5  ;;  %v3257_v43 = vrot.slane %v7129_v19, 5  ;;  %v9217_v32 = vld [vmem:[%s8899_s8 + $0xb4] sm:$0xf] }
  0x94   : > { %v6866_v47 = vcombine.low %v580_v31, %v590_v39  ;;  %v608_v12 = vor.u32 %v607_v37, %v603_v36  ;;  %v613_v49 = vrot.slane %v611_v38, 5  ;;  %v616_v50 = vshrl.u32 %v9169_v24, 16  ;;  %v7134_v37 = vld [vmem:[%s8899_s8 + $0x34] sm:$0xf] }
  0x95   : > { %v599_v51 = vrot.slane %v598_v40, 4  ;;  %v3255_v52 = vsel %vm9144_vm7, %v7173_v13, %v3254_v41  ;;  %v3256_v53 = vrot.slane %v3254_v41, 4  ;;  %v619_v54 = vshll.u32 %v9169_v24, 16 }
  0x96   : > { %6884 = vmatmul.mubr.msk.bf16.gmra.mrb[44].mxu1 %vm746_vm3, %v6866_v47  ;;  %v609_v11 = vrot.slane %v608_v12, 4  ;;  %v618_v59 = vrot.slane %v616_v50, 4  ;;  %v625_v60 = vshll.u32 %v9182_v45, 16  ;;  %v629_v61 = vshrl.u32 %v9182_v45, 16 }
  0x97   : > { %954 = vmatprep.mubr.bf16.mxu1 %v8766_v4  ;;  %v604_v0 = vsel %vm8924_vm4, %v599_v51, %v603_v36  ;;  %v3258_v2 = vsel %vm9144_vm7, %v3256_v53, %v3257_v43  ;;  %v621_v5 = vrot.slane %v619_v54, 5  ;;  %v635_v7 = vshll.u32 %v297_v46, 16  ;;  %v9226_v46 = vld [vmem:[%s8899_s8 + $0xb8] sm:$0xf] }
  0x98   : > { %v614_v9 = vsel %vm8924_vm4, %v609_v11, %v613_v49  ;;  %v627_v10 = vrot.slane %v625_v60, 5  ;;  %v631_v15 = vrot.slane %v629_v61, 4  ;;  %v7190_v17 = vcombine.low %v3255_v52, %v3258_v2  ;;  %v7133_v52 = vld [vmem:[%s8899_s8 + $0x30] sm:$0xe]  ;;  %v299_v11 = vld [vmem:[%s8899_s8 + $0xbc] sm:$0x1] }
  0x99   : > { %7207 = vmatmul.mubr.msk.bf16.vlgmr.msra.gmra.mrb[0].mxu0 %vm746_vm3, %v7189_v34  ;;  %v6867_v16 = vcombine.low %v604_v0, %v614_v9  ;;  %v622_v18 = vor.u32 %v621_v5, %v618_v59  ;;  %v637_v19 = vrot.slane %v635_v7, 5  ;;  %v7174_v22 = vrot.slane %v7130_v55, 9  ;;  %v7135_v55 = vld [vmem:[%s8899_s8 + $0x38] sm:$0x1] }
  0x9a   : > { %3906 = vmatpush1.bf16.msra.mxu0 %v8910_v14  ;;  %3512 = vmatprep.mubr.bf16.mxu0 %v8766_v4  ;;  %v632_v21 = vor.u32 %v631_v15, %v627_v10  ;;  %v3261_v23 = vrot.slane %v7131_v56, 5  ;;  %v640_v25 = vshrl.u32 %v9192_v57, 16  ;;  %v643_v29 = vshll.u32 %v9192_v57, 16 }
  0x9b   : > { %v623_v26 = vrot.slane %v622_v18, 4  ;;  %v649_v30 = vshll.u32 %v9198_v62, 16  ;;  %v653_v31 = vshrl.u32 %v9198_v62, 16  ;;  %v3264_v14 = vrot.slane %v7132_v8, 5 }
  0x9c   : > { %v633_v34 = vrot.slane %v632_v21, 4  ;;  %v3263_v35 = vrot.slane %v3261_v23, 4  ;;  %v642_v36 = vrot.slane %v640_v25, 4  ;;  %v645_v13 = vrot.slane %v643_v29, 5  ;;  %v7138_v29 = vld [vmem:[%s8899_s8 + $0x44] sm:$0x1] }
  0x9d   : > { %v628_v38 = vsel %vm8924_vm4, %v623_v26, %v627_v10  ;;  %v651_v39 = vrot.slane %v649_v30, 5  ;;  %v655_v40 = vrot.slane %v653_v31, 4  ;;  %v659_v43 = vshll.u32 %v298_v20, 16  ;;  %v7136_v26 = vld [vmem:[%s8899_s8 + $0x3c] sm:$0xe] }
  0x9e   : > { %6885 = vmatmul.mubr.msk.bf16.gmra.mrb[48].mxu1 %vm746_vm3, %v6867_v16  ;;  %v638_v41 = vsel %vm8924_vm4, %v633_v34, %v637_v19  ;;  %v646_v47 = vor.u32 %v645_v13, %v642_v36  ;;  %v3262_v50 = vsel %vm9144_vm7, %v7174_v22, %v3261_v23  ;;  %v3265_v51 = vsel %vm9144_vm7, %v3263_v35, %v3264_v14  ;;  %v7137_v23 = vld [vmem:[%s8899_s8 + $0x40] sm:$0xf] }
  0x9f   : > { %964 = vmatprep.mubr.bf16.mxu1 %v8766_v4  ;;  %v656_v12 = vor.u32 %v655_v40, %v651_v39  ;;  %v6868_v49 = vcombine.low %v628_v38, %v638_v41  ;;  %v664_v53 = vshrl.u32 %v9217_v32, 16  ;;  %v661_v54 = vrot.slane %v659_v43, 5  ;;  %v7140_v38 = vld [vmem:[%s8899_s8 + $0x4c] sm:$0xf] }
  0xa0   : > { %v3268_v56 = vrot.slane %v7134_v37, 5  ;;  %v667_v59 = vshll.u32 %v9217_v32, 16  ;;  %v673_v60 = vshll.u32 %v9226_v46, 16  ;;  %v647_v61 = vrot.slane %v646_v47, 4 }
  0xa1   : > { %7208 = vmatmul.mubr.msk.bf16.gmra.mrb[4].mxu0 %vm746_vm3, %v7190_v17  ;;  %v657_v0 = vrot.slane %v656_v12, 4  ;;  %v666_v2 = vrot.slane %v664_v53, 4  ;;  %v677_v5 = vshrl.u32 %v9226_v46, 16  ;;  %v7191_v10 = vcombine.low %v3262_v50, %v3265_v51  ;;  %v7139_v51 = vld [vmem:[%s8899_s8 + $0x48] sm:$0xe] }
  0xa2   : > { %3522 = vmatprep.mubr.bf16.mxu0 %v8766_v4  ;;  %v669_v7 = vrot.slane %v667_v59, 5  ;;  %v675_v8 = vrot.slane %v673_v60, 5  ;;  %v7175_v15 = vrot.slane %v7133_v52, 9  ;;  %v3270_v16 = vrot.slane %v3268_v56, 4  ;;  %v7141_v53 = vld [vmem:[%s8899_s8 + $0x50] sm:$0x1] }
  0xa3   : > { %v679_v9 = vrot.slane %v677_v5, 4  ;;  %v3271_v17 = vrot.slane %v7135_v55, 5  ;;  %v683_v18 = vshll.u32 %v299_v11, 16  ;;  %v652_v19 = vsel %vm8924_vm4, %v647_v61, %v651_v39  ;;  %v7143_v60 = vld [vmem:[%s8899_s8 + $0x58] sm:$0xf] }
  0xa4   : > { %v662_v20 = vsel %vm8924_vm4, %v657_v0, %v661_v54  ;;  %v670_v21 = vor.u32 %v669_v7, %v666_v2  ;;  %v3269_v25 = vsel %vm9144_vm7, %v7175_v15, %v3268_v56  ;;  %v3275_v35 = vrot.slane %v7137_v23, 5  ;;  %v6956_v47 = vld.sshfl [vmem:[%s10966_s3 + $0x8] sm:$0x33 pattern:$0x76325410] }
  0xa5   : > { %v680_v22 = vor.u32 %v679_v9, %v675_v8  ;;  %v6869_v30 = vcombine.low %v652_v19, %v662_v20  ;;  %v3272_v31 = vsel %vm9144_vm7, %v3270_v16, %v3271_v17  ;;  %v685_v34 = vrot.slane %v683_v18, 5  ;;  %v8668_v61 = vld [vmem:[%s8899_s8] sm:$0xf]  ;;  %v8669_v0 = vld [vmem:[%s8899_s8 + $0x4] sm:$0xf] }
  0xa6   : > { %6886 = vmatmul.mubr.msk.bf16.gmra.mrb[52].mxu1 %vm746_vm3, %v6868_v49  ;;  %v671_v14 = vrot.slane %v670_v21, 4  ;;  %v7192_v37 = vcombine.low %v3269_v25, %v3272_v31  ;;  %v7176_v13 = vrot.slane %v7136_v26, 9  ;;  %v3277_v39 = vrot.slane %v3275_v35, 4  ;;  %v7144_v15 = vld [vmem:[%s8899_s8 + $0x5c] sm:$0x1] }
  0xa7   : > { %974 = vmatprep.mubr.bf16.mxu1 %v8766_v4  ;;  %v681_v36 = vrot.slane %v680_v22, 4  ;;  %v3278_v40 = vrot.slane %v7138_v29, 5  ;;  %v3282_v52 = vrot.slane %v7140_v38, 5  ;;  %v1600_v54 = vcombine.high %v6956_v47, %v6956_v47  ;;  %v7146_v25 = vld [vmem:[%s8899_s8 + $0x64] sm:$0xf] }
  0xa8   : > { %v676_v41 = vsel %vm8924_vm4, %v671_v14, %v675_v8  ;;  %v3276_v49 = vsel %vm9144_vm7, %v7176_v13, %v3275_v35  ;;  %v7177_v56 = vrot.slane %v7139_v51, 9  ;;  %v3285_v59 = vrot.slane %v7141_v53, 5  ;;  %v9290_v9 = vld.sshfl [vmem:[%s10966_s3 + $0x1c] sm:$0x33 pattern:$0x76325410] }
  0xa9   : > { %7209 = vmatmul.mubr.msk.bf16.gmra.mrb[8].mxu0 %vm746_vm3, %v7191_v10  ;;  %v686_v43 = vsel %vm8924_vm4, %v681_v36, %v685_v34  ;;  %v3279_v50 = vsel %vm9144_vm7, %v3277_v39, %v3278_v40  ;;  %6957 = vmatprep.subr.msk.bf16.mxu1 %vm795_vm0, %v1600_v54  ;;  %v3284_v11 = vrot.slane %v3282_v52, 4  ;;  %v6889_v2 = vcombine.low %v8668_v61, %v8669_v0  ;;  %v7142_v10 = vld [vmem:[%s8899_s8 + $0x54] sm:$0xe]  ;;  %v8670_v34 = vld [vmem:[%s8899_s8 + $0xc] sm:$0xf] }
  0xaa   : > { %3532 = vmatprep.mubr.bf16.mxu0 %v8766_v4  ;;  %v6870_v12 = vcombine.low %v676_v41, %v686_v43  ;;  %v7193_v55 = vcombine.low %v3276_v49, %v3279_v50  ;;  %v3283_v5 = vsel %vm9144_vm7, %v7177_v56, %v3282_v52  ;;  %v3289_v8 = vrot.slane %v7143_v60, 5  ;;  %v8671_v35 = vld [vmem:[%s8899_s8 + $0x10] sm:$0xf]  ;;  %v7145_v13 = vld [vmem:[%s8899_s8 + $0x60] sm:$0xe] }
  0xab   : > { %v3286_v7 = vsel %vm9144_vm7, %v3284_v11, %v3285_v59  ;;  %v1650_v16 = vsel %vm795_vm0, %v6956_v47, 0  ;;  %v6899_v17 = vcombine.low %v9096_v44, %v9100_v48  ;;  %v4652_v19 = vcombine.high %v9290_v9, %v9290_v9  ;;  %v7147_v39 = vld [vmem:[%s8899_s8 + $0x68] sm:$0x1]  ;;  %v8672_v49 = vld [vmem:[%s8899_s8 + $0x18] sm:$0xf] }
  0xac   : > { %v7194_v18 = vcombine.low %v3283_v5, %v3286_v7  ;;  %v7178_v20 = vrot.slane %v7142_v10, 9  ;;  %v3291_v21 = vrot.slane %v3289_v8, 4  ;;  %v3292_v22 = vrot.slane %v7144_v15, 5  ;;  %v8673_v50 = vld [vmem:[%s8899_s8 + $0x1c] sm:$0xf] }
  0xad   : > { %v6900_v23 = vcombine.low %v9121_v28, %v9126_v33  ;;  %v6901_v26 = vcombine.low %v9149_v58, %v9155_v63  ;;  %7356 = vmatprep.subr.msk.bf16.mxu0 %vm795_vm0, %v4652_v19  ;;  %v6902_v29 = vcombine.low %v9169_v24, %v9182_v45  ;;  %v6904_v31 = vcombine.low %v9217_v32, %v9226_v46  ;;  %v7150_v56 = vld [vmem:[%s8899_s8 + $0x74] sm:$0x1]  ;;  %v7152_v0 = vld [vmem:[%s8899_s8 + $0x7c] sm:$0xf]  ;;  %v8675_v5 = vld [vmem:[%s8899_s8 + $0x28] sm:$0xf] }
  0xae   : > { %6887 = vmatmul.mubr.msk.bf16.gmra.mrb[56].mxu1 %vm746_vm3, %v6869_v30  ;;  %v6903_v30 = vcombine.low %v9192_v57, %v9198_v62  ;;  %v6890_v14 = vcombine.low %v8670_v34, %v8671_v35  ;;  %v3290_v36 = vsel %vm9144_vm7, %v7178_v20, %v3289_v8  ;;  %v3296_v38 = vrot.slane %v7146_v25, 5  ;;  %v7155_v25 = vld [vmem:[%s8899_s8 + $0x88] sm:$0xf]  ;;  %v8676_v34 = vld [vmem:[%s8899_s8 + $0x30] sm:$0xf]  ;;  %v8634_v63 = vld [vmem:[%s8899_s8 + $0x3c] sm:$0xff]  }
  0xaf   : > { %984 = vmatprep.mubr.bf16.mxu1 %v8766_v4  ;;  %v7179_v41 = vrot.slane %v7145_v13, 9  ;;  %v3299_v47 = vrot.slane %v7147_v39, 5  ;;  %v6891_v51 = vcombine.low %v8672_v49, %v8673_v50  ;;  %v3306_v61 = vrot.slane %v7150_v56, 5  ;;  %v8677_v35 = vld [vmem:[%s8899_s8 + $0x34] sm:$0xf]  ;;  %v8630_v28 = vld [vmem:[%s8899_s8 + $0x24] sm:$0xff]  }
  0xb0   : > { %v3298_v43 = vrot.slane %v3296_v38, 4  ;;  %v3310_v15 = vrot.slane %v7152_v0, 5  ;;  %v7154_v13 = vld [vmem:[%s8899_s8 + $0x84] sm:$0xe]  ;;  %v7156_v39 = vld [vmem:[%s8899_s8 + $0x8c] sm:$0x1] }
  0xb1   : > { %7210 = vmatmul.mubr.msk.bf16.gmra.mrb[12].mxu0 %vm746_vm3, %v7192_v37  ;;  %v3293_v37 = vsel %vm9144_vm7, %v3291_v21, %v3292_v22  ;;  %v3297_v52 = vsel %vm9144_vm7, %v7179_v41, %v3296_v38  ;;  %v3317_v38 = vrot.slane %v7155_v25, 5  ;;  %v7182_v41 = vrot.slane %v7154_v13, 9  ;;  %v8678_v49 = vld [vmem:[%s8899_s8 + $0x3c] sm:$0xf]  ;;  %v8679_v50 = vld [vmem:[%s8899_s8 + $0x40] sm:$0xf] }
  0xb2   : > { %3542 = vmatprep.mubr.bf16.mxu0 %v8766_v4  ;;  %v7195_v40 = vcombine.low %v3290_v36, %v3293_v37  ;;  %v3300_v53 = vsel %vm9144_vm7, %v3298_v43, %v3299_v47  ;;  %v3312_v21 = vrot.slane %v3310_v15, 4  ;;  %v3320_v47 = vrot.slane %v7156_v39, 5  ;;  %v7159_v56 = vld [vmem:[%s8899_s8 + $0x98] sm:$0x1]  ;;  %v7161_v0 = vld [vmem:[%s8899_s8 + $0xa0] sm:$0xf] }
  0xb3   : > { %v7196_v11 = vcombine.low %v3297_v52, %v3300_v53  ;;  %v3319_v43 = vrot.slane %v3317_v38, 4  ;;  %v3318_v52 = vsel %vm9144_vm7, %v7182_v41, %v3317_v38  ;;  %v7165_v41 = vld [vmem:[%s8899_s8 + $0xb0] sm:$0x1]  ;;  %v4702_v44 = vsel %vm795_vm0, %v9290_v9, 0  ;;  %v1332_v58 = vld [vmem:[%s8899_s8 + $0x4] sm:$0xf] }
  0xb4   : > { %v8632_v33 = vld [vmem:[%s8899_s8 + $0x30] sm:$0xff]   ;;  %v1432_v24 = vrot.slane %v1332_v58, 5  ;;  %v1331_v45 = vld [vmem:[%s8899_s8] sm:$0xe]  ;;  %v1333_v9 = vld [vmem:[%s8899_s8 + $0x8] sm:$0x1] }
  0xb5   : > { %v3321_v53 = vsel %vm9144_vm7, %v3319_v43, %v3320_v47  ;;  %v1348_v58 = vld [vmem:[%s8899_s8 + $0x44] sm:$0x1] }
  0xb6   : > { %6888 = vmatmul.mubr.msk.bf16.gmra.mrb[60].mxu1 %vm746_vm3, %v6870_v12  ;;  %v7149_v12 = vld [vmem:[%s8899_s8 + $0x70] sm:$0xf] }
  0xb7   : > { %1170 = vmatprep.mubr.bf16.mxu1 %v8766_v4  ;;  %v3303_v54 = vrot.slane %v7149_v12, 5  ;;  %v7158_v12 = vld [vmem:[%s8899_s8 + $0x94] sm:$0xf] }
  0xb9   : > { %7211 = vmatmul.mubr.msk.bf16.gmra.mrb[16].mxu0 %vm746_vm3, %v7193_v55  ;;  %v7148_v55 = vld [vmem:[%s8899_s8 + $0x6c] sm:$0xe]  ;;  %v3305_v60 = vrot.slane %v3303_v54, 4 }
  0xba   : > { %3552 = vmatprep.mubr.bf16.mxu0 %v8766_v4  ;;  %v7180_v59 = vrot.slane %v7148_v55, 9  ;;  %v7157_v55 = vld [vmem:[%s8899_s8 + $0x90] sm:$0xe] }
  0xbb   : > { %v3307_v10 = vsel %vm9144_vm7, %v3305_v60, %v3306_v61  ;;  %v3327_v61 = vrot.slane %v7159_v56, 5 }
  0xbc   : > { %v3304_v8 = vsel %vm9144_vm7, %v7180_v59, %v3303_v54  ;;  %v3324_v54 = vrot.slane %v7158_v12, 5  ;;  %v7183_v59 = vrot.slane %v7157_v55, 9 }
  0xbd   : > { %v7197_v19 = vcombine.low %v3304_v8, %v3307_v10  ;;  %v9384_v8 = vld.sshfl [vmem:[%s10966_s3 + $0xc] sm:$0x33 pattern:$0x76325410] }
  0xbe   : > { %6907 = vmatmul.mubr.msk.bf16.vlgmr.msra.gmra.mrb[0].mxu1 %vm746_vm3, %v6889_v2  ;;  %v8674_v2 = vld [vmem:[%s8899_s8 + $0x24] sm:$0xf]  ;;  %v3326_v60 = vrot.slane %v3324_v54, 4  ;;  %v3325_v10 = vsel %vm9144_vm7, %v7183_v59, %v3324_v54  ;;  %v7168_v59 = vld [vmem:[%s8899_s8 + $0xbc] sm:$0x1] }
  0xbf   : > { %1180 = vmatprep.mubr.bf16.mxu1 %v8766_v4  ;;  %1656 = vmatpush1.bf16.msra.mxu1 %v1650_v16  ;;  %v6892_v7 = vcombine.low %v8674_v2, %v8675_v5  ;;  %v7151_v16 = vld [vmem:[%s8899_s8 + $0x78] sm:$0xe]  ;;  %v8680_v2 = vld [vmem:[%s8899_s8 + $0x48] sm:$0xf]  ;;  %v8681_v5 = vld [vmem:[%s8899_s8 + $0x4c] sm:$0xf] }
  0xc0   : > { %v7181_v20 = vrot.slane %v7151_v16, 9  ;;  %v3331_v16 = vrot.slane %v7161_v0, 5 }
  0xc1   : > { %7212 = vmatmul.mubr.msk.bf16.gmra.mrb[20].mxu0 %vm746_vm3, %v7194_v18  ;;  %v7153_v18 = vld [vmem:[%s8899_s8 + $0x80] sm:$0x1] }
  0xc2   : > { %3562 = vmatprep.mubr.bf16.mxu0 %v8766_v4  ;;  %v3313_v22 = vrot.slane %v7153_v18, 5  ;;  %v3311_v36 = vsel %vm9144_vm7, %v7181_v20, %v3310_v15  ;;  %v3328_v15 = vsel %vm9144_vm7, %v3326_v60, %v3327_v61  ;;  %v2035_v18 = vcombine.high %v9384_v8, %v9384_v8  ;;  %v7162_v20 = vld [vmem:[%s8899_s8 + $0xa4] sm:$0x1] }
  0xc3   : > { %v3333_v25 = vrot.slane %v3331_v16, 4 }
  0xc4   : > { %v3314_v37 = vsel %vm9144_vm7, %v3312_v21, %v3313_v22  ;;  %7024 = vmatprep.subr.msk.bf16.mxu1 %vm795_vm0, %v2035_v18  ;;  %v7200_v21 = vcombine.low %v3325_v10, %v3328_v15 }
  0xc6   : > { %6908 = vmatmul.mubr.msk.bf16.gmra.mrb[4].mxu1 %vm746_vm3, %v6890_v14  ;;  %v6893_v14 = vcombine.low %v8676_v34, %v8677_v35  ;;  %v3334_v34 = vrot.slane %v7162_v20, 5  ;;  %v7164_v35 = vld [vmem:[%s8899_s8 + $0xac] sm:$0xf]  ;;  %v7171_v20 = vld [vmem:[%s8899_s8 + $0xc8] sm:$0x1] }
  0xc7   : > { %1190 = vmatprep.mubr.bf16.mxu1 %v8766_v4  ;;  %v3338_v39 = vrot.slane %v7164_v35, 5 }
  0xc8   : > { %v3335_v13 = vsel %vm9144_vm7, %v3333_v25, %v3334_v34  ;;  %v3355_v34 = vrot.slane %v7171_v20, 5 }
  0xc9   : > { %7213 = vmatmul.mubr.msk.bf16.gmra.mrb[24].mxu0 %vm746_vm3, %v7195_v40  ;;  %v7198_v40 = vcombine.low %v3311_v36, %v3314_v37  ;;  %v8683_v36 = vld [vmem:[%s8899_s8 + $0x58] sm:$0xf]  ;;  %v3340_v12 = vrot.slane %v3338_v39, 4 }
  0xca   : > { %3572 = vmatprep.mubr.bf16.mxu0 %v8766_v4 }
  0xce   : > { %6909 = vmatmul.mubr.msk.bf16.gmra.mrb[8].mxu1 %vm746_vm3, %v6891_v51  ;;  %v6894_v51 = vcombine.low %v8678_v49, %v8679_v50  ;;  %v3341_v49 = vrot.slane %v7165_v41, 5  ;;  %v7167_v50 = vld [vmem:[%s8899_s8 + $0xb8] sm:$0xf]  ;;  %v1338_v41 = vld [vmem:[%s8899_s8 + $0x1c] sm:$0xf] }
  0xcf   : > { %1200 = vmatprep.mubr.bf16.mxu1 %v8766_v4  ;;  %v3345_v56 = vrot.slane %v7167_v50, 5  ;;  %v1446_v50 = vrot.slane %v1338_v41, 5 }
  0xd0   : > { %v3342_v55 = vsel %vm9144_vm7, %v3340_v12, %v3341_v49 }
  0xd1   : > { %7214 = vmatmul.mubr.msk.bf16.gmra.mrb[28].mxu0 %vm746_vm3, %v7196_v11  ;;  %v7199_v11 = vcombine.low %v3318_v52, %v3321_v53  ;;  %v8685_v52 = vld [vmem:[%s8899_s8 + $0x64] sm:$0xf]  ;;  %v3347_v0 = vrot.slane %v3345_v56, 4 }
  0xd2   : > { %3582 = vmatprep.mubr.bf16.mxu0 %v8766_v4 }
  0xd6   : > { %6910 = vmatmul.mubr.msk.bf16.gmra.mrb[12].mxu1 %vm746_vm3, %v6892_v7  ;;  %v6895_v7 = vcombine.low %v8680_v2, %v8681_v5  ;;  %v3348_v2 = vrot.slane %v7168_v59, 5  ;;  %v7170_v5 = vld [vmem:[%s8899_s8 + $0xc4] sm:$0xf] }
  0xd7   : > { %1210 = vmatprep.mubr.bf16.mxu1 %v8766_v4  ;;  %v3352_v18 = vrot.slane %v7170_v5, 5 }
  0xd9   : > { %7215 = vmatmul.mubr.msk.bf16.gmra.mrb[32].mxu0 %vm746_vm3, %v7197_v19  ;;  %v7160_v19 = vld [vmem:[%s8899_s8 + $0x9c] sm:$0xe]  ;;  %v3354_v25 = vrot.slane %v3352_v18, 4 }
  0xda   : > { %3592 = vmatprep.mubr.bf16.mxu0 %v8766_v4  ;;  %v7184_v22 = vrot.slane %v7160_v19, 9  ;;  %v7169_v19 = vld [vmem:[%s8899_s8 + $0xc0] sm:$0xe] }
  0xdb   : > { %v3356_v35 = vsel %vm9144_vm7, %v3354_v25, %v3355_v34 }
  0xdc   : > { %v3332_v38 = vsel %vm9144_vm7, %v7184_v22, %v3331_v16  ;;  %v3349_v16 = vsel %vm9144_vm7, %v3347_v0, %v3348_v2  ;;  %v7187_v22 = vrot.slane %v7169_v19, 9  ;;  %v1342_v0 = vld [vmem:[%s8899_s8 + $0x2c] sm:$0x1] }
  0xdd   : > { %v7201_v43 = vcombine.low %v3332_v38, %v3335_v13  ;;  %v8636_v38 = vld [vmem:[%s8899_s8 + $0x48] sm:$0xff]  }
  0xde   : > { %6911 = vmatmul.mubr.msk.bf16.gmra.mrb[16].mxu1 %vm746_vm3, %v6893_v14  ;;  %v8682_v14 = vld [vmem:[%s8899_s8 + $0x54] sm:$0xf]  ;;  %v1334_v13 = vld [vmem:[%s8899_s8 + $0xc] sm:$0xe] }
  0xdf   : > { %1220 = vmatprep.mubr.bf16.mxu1 %v8766_v4  ;;  %v6896_v37 = vcombine.low %v8682_v14, %v8683_v36  ;;  %v9453_v36 = vld.sshfl [vmem:[%s10966_s3 + $0x20] sm:$0x33 pattern:$0x76325410]  ;;  %v6924_v46 = vrot.slane %v1334_v13, 9 }
  0xe0   : > { %v5230_v48 = vcombine.high %v9453_v36, %v9453_v36 }
  0xe1   : > { %7216 = vmatmul.mubr.msk.bf16.gmra.mrb[36].mxu0 %vm746_vm3, %v7198_v40  ;;  %v7163_v40 = vld [vmem:[%s8899_s8 + $0xa8] sm:$0xe] }
  0xe2   : > { %3602 = vmatprep.mubr.bf16.mxu0 %v8766_v4  ;;  %v7185_v47 = vrot.slane %v7163_v40, 9 }
  0xe4   : > { %v3339_v54 = vsel %vm9144_vm7, %v7185_v47, %v3338_v39  ;;  %v1336_v39 = vld [vmem:[%s8899_s8 + $0x14] sm:$0x1] }
  0xe5   : > { %v7202_v60 = vcombine.low %v3339_v54, %v3342_v55  ;;  %v1442_v40 = vrot.slane %v1336_v39, 5  ;;  %v8637_v47 = vld [vmem:[%s8899_s8 + $0x54] sm:$0xff]   ;;  %v1448_v54 = vrot.slane %v1446_v50, 4 }
  0xe6   : > { %6912 = vmatmul.mubr.msk.bf16.gmra.mrb[20].mxu1 %vm746_vm3, %v6894_v51  ;;  %v8684_v51 = vld [vmem:[%s8899_s8 + $0x60] sm:$0xf] }
  0xe7   : > { %1230 = vmatprep.mubr.bf16.mxu1 %v8766_v4  ;;  %v6897_v53 = vcombine.low %v8684_v51, %v8685_v52  ;;  %v1337_v51 = vld [vmem:[%s8899_s8 + $0x18] sm:$0xe]  ;;  %v1339_v52 = vld [vmem:[%s8899_s8 + $0x20] sm:$0x1] }
  0xe8   : > { %v1449_v55 = vrot.slane %v1339_v52, 5 }
  0xe9   : > { %7217 = vmatmul.mubr.msk.bf16.gmra.mrb[40].mxu0 %vm746_vm3, %v7199_v11  ;;  %v7166_v11 = vld [vmem:[%s8899_s8 + $0xb4] sm:$0xe] }
  0xea   : > { %3612 = vmatprep.mubr.bf16.mxu0 %v8766_v4  ;;  %v7186_v61 = vrot.slane %v7166_v11, 9  ;;  %v8638_v11 = vld [vmem:[%s8899_s8 + $0x60] sm:$0xff]  }
  0xec   : > { %v3346_v15 = vsel %vm9144_vm7, %v7186_v61, %v3345_v56  ;;  %v1341_v56 = vld [vmem:[%s8899_s8 + $0x28] sm:$0xf]  ;;  %v1340_v61 = vld [vmem:[%s8899_s8 + $0x24] sm:$0xe] }
  0xed   : > { %v6926_v5 = vrot.slane %v1340_v61, 9 }
  0xee   : > { %6913 = vmatmul.mubr.msk.bf16.gmra.mrb[24].mxu1 %vm746_vm3, %v6895_v7  ;;  %v8686_v7 = vld [vmem:[%s8899_s8 + $0x6c] sm:$0xf] }
  0xef   : > { %1240 = vmatprep.mubr.bf16.mxu1 %v8766_v4  ;;  %v6898_v10 = vcombine.low %v8686_v7, %v9076_v6  ;;  %v3353_v6 = vsel %vm9144_vm7, %v7187_v22, %v3352_v18  ;;  %v1345_v22 = vld [vmem:[%s8899_s8 + $0x38] sm:$0x1] }
  0xf0   : > { %v7204_v14 = vcombine.low %v3353_v6, %v3356_v35  ;;  %v1463_v35 = vrot.slane %v1345_v22, 5 }
  0xf1   : > { %7218 = vmatmul.mubr.msk.bf16.gmra.mrb[44].mxu0 %vm746_vm3, %v7200_v21  ;;  %v7203_v21 = vcombine.low %v3346_v15, %v3349_v16  ;;  %v1344_v15 = vld [vmem:[%s8899_s8 + $0x34] sm:$0xf]  ;;  %v8639_v16 = vld [vmem:[%s8899_s8 + $0x6c] sm:$0xff]  }
  0xf2   : > { %3622 = vmatprep.mubr.bf16.mxu0 %v8766_v4  ;;  %v1460_v20 = vrot.slane %v1344_v15, 5 }
  0xf4   : > { %v1462_v6 = vrot.slane %v1460_v20, 4 }
  0xf6   : > { %6914 = vmatmul.mubr.msk.bf16.gmra.mrb[28].mxu1 %vm746_vm3, %v6896_v37  ;;  %v8628_v37 = vld [vmem:[%s8899_s8 + $0x18] sm:$0xff]  }
  0xf7   : > { %1250 = vmatprep.mubr.bf16.mxu1 %v8766_v4 }
  0xf9   : > { %7219 = vmatmul.mubr.msk.bf16.gmra.mrb[48].mxu0 %vm746_vm3, %v7201_v43  ;;  %v2085_v43 = vsel %vm795_vm0, %v9384_v8, 0 }
  0xfa   : > { %3632 = vmatprep.mubr.bf16.mxu0 %v8766_v4 }
  0xfe   : > { %6915 = vmatmul.mubr.msk.bf16.gmra.mrb[32].mxu1 %vm746_vm3, %v6897_v53  ;;  %v6925_v53 = vrot.slane %v1337_v51, 9 }
  0xff   : > { %1260 = vmatprep.mubr.bf16.mxu1 %v8766_v4 }
 0x100   : > { %v1447_v59 = vsel %vm9144_vm7, %v6925_v53, %v1446_v50  ;;  %v8643_v53 = vld [vmem:[%s8899_s8 + $0x9c] sm:$0xff]  }
 0x101   : > { %7220 = vmatmul.mubr.msk.bf16.gmra.mrb[52].mxu0 %vm746_vm3, %v7202_v60  ;;  %v1453_v60 = vrot.slane %v1341_v56, 5 }
 0x102   : > { %3642 = vmatprep.mubr.bf16.mxu0 %v8766_v4 }
 0x103   : > { %v1455_v7 = vrot.slane %v1453_v60, 4  ;;  %v1454_v18 = vsel %vm9144_vm7, %v6926_v5, %v1453_v60  ;;  %v8644_v5 = vld [vmem:[%s8899_s8 + $0xa8] sm:$0xff]  }
 0x106   : > { %6916 = vmatmul.mubr.msk.bf16.gmra.mrb[36].mxu1 %vm746_vm3, %v6898_v10  ;;  %v1456_v10 = vrot.slane %v1342_v0, 5 }
 0x107   : > { %1270 = vmatprep.mubr.bf16.mxu1 %v8766_v4 }
 0x108   : > { %v1457_v19 = vsel %vm9144_vm7, %v1455_v7, %v1456_v10 }
 0x109   : > { %7221 = vmatmul.mubr.msk.bf16.gmra.mrb[56].mxu0 %vm746_vm3, %v7203_v21  ;;  %v1343_v21 = vld [vmem:[%s8899_s8 + $0x30] sm:$0xe]  ;;  %v6943_v25 = vcombine.low %v1454_v18, %v1457_v19  ;;  %v1360_v18 = vld [vmem:[%s8899_s8 + $0x74] sm:$0x1] }
 0x10a   : > { %3652 = vmatprep.mubr.bf16.mxu0 %v8766_v4  ;;  %v6927_v34 = vrot.slane %v1343_v21, 9  ;;  %v1498_v22 = vrot.slane %v1360_v18, 5 }
 0x10e   : > { %6917 = vmatmul.mubr.msk.bf16.gmra.mrb[40].mxu1 %vm746_vm3, %v6899_v17  ;;  %v6923_v17 = vrot.slane %v1331_v45, 9 }
 0x10f   : > { %1280 = vmatprep.mubr.bf16.mxu1 %v8766_v4 }
 0x110   : > { %v1433_v57 = vsel %vm9144_vm7, %v6923_v17, %v1432_v24  ;;  %v1350_v17 = vld [vmem:[%s8899_s8 + $0x4c] sm:$0xf] }
 0x111   : > { %7222 = vmatmul.mubr.msk.bf16.gmra.mrb[60].mxu0 %vm746_vm3, %v7204_v14  ;;  %v1347_v14 = vld [vmem:[%s8899_s8 + $0x40] sm:$0xf] }
 0x112   : > { %3937 = vmatprep.mubr.bf16.mxu0 %v8766_v4 }
 0x116   : > { %6918 = vmatmul.mubr.msk.bf16.gmra.mrb[44].mxu1 %vm746_vm3, %v6900_v23  ;;  %v1434_v23 = vrot.slane %v1432_v24, 4 }
 0x117   : > { %1290 = vmatprep.mubr.bf16.mxu1 %v8766_v4 }
 0x119   : > { %7274 = vmatmul.mubr.msk.bf16.vlgmr.msra.gmra.mrb[0].mxu0 %vm746_vm3, %v8628_v37  ;;  %v8640_v37 = vld [vmem:[%s8899_s8 + $0x78] sm:$0xff]  }
 0x11a   : > { %4708 = vmatpush1.bf16.msra.mxu0 %v4702_v44  ;;  %3947 = vmatprep.mubr.bf16.mxu0 %v8766_v4  ;;  %v1461_v44 = vsel %vm9144_vm7, %v6927_v34, %v1460_v20  ;;  %v8645_v34 = vld [vmem:[%s8899_s8 + $0xb4] sm:$0xff]  }
 0x11b   : > { %7455 = vmatprep.subr.msk.bf16.mxu0 %vm795_vm0, %v5230_v48  ;;  %v1464_v48 = vsel %vm9144_vm7, %v1462_v6, %v1463_v35 }
 0x11e   : > { %6919 = vmatmul.mubr.msk.bf16.gmra.mrb[48].mxu1 %vm746_vm3, %v6901_v26  ;;  %v1435_v26 = vrot.slane %v1333_v9, 5  ;;  %v1470_v9 = vrot.slane %v1348_v58, 5 }
 0x11f   : > { %1300 = vmatprep.mubr.bf16.mxu1 %v8766_v4 }
 0x120   : > { %v1436_v62 = vsel %vm9144_vm7, %v1434_v23, %v1435_v26  ;;  %v8641_v23 = vld [vmem:[%s8899_s8 + $0x84] sm:$0xff]  }
 0x121   : > { %7275 = vmatmul.mubr.msk.bf16.gmra.mrb[4].mxu0 %vm746_vm3, %v8630_v28  ;;  %v6940_v32 = vcombine.low %v1433_v57, %v1436_v62  ;;  %v1467_v28 = vrot.slane %v1347_v14, 5  ;;  %v1349_v57 = vld [vmem:[%s8899_s8 + $0x48] sm:$0xe]  ;;  %v1351_v62 = vld [vmem:[%s8899_s8 + $0x50] sm:$0x1] }
 0x122   : > { %3957 = vmatprep.mubr.bf16.mxu0 %v8766_v4  ;;  %v6929_v13 = vrot.slane %v1349_v57, 9  ;;  %v8646_v57 = vld [vmem:[%s8899_s8 + $0xc0] sm:$0xff]  }
 0x123   : > { %v1469_v45 = vrot.slane %v1467_v28, 4 }
 0x126   : > { %6920 = vmatmul.mubr.msk.bf16.gmra.mrb[52].mxu1 %vm746_vm3, %v6902_v29  ;;  %v1335_v29 = vld [vmem:[%s8899_s8 + $0x10] sm:$0xf] }
 0x127   : > { %1310 = vmatprep.mubr.bf16.mxu1 %v8766_v4 }
 0x129   : > { %7276 = vmatmul.mubr.msk.bf16.gmra.mrb[8].mxu0 %vm746_vm3, %v8632_v33  ;;  %v1346_v33 = vld [vmem:[%s8899_s8 + $0x3c] sm:$0xe] }
 0x12a   : > { %3967 = vmatprep.mubr.bf16.mxu0 %v8766_v4  ;;  %v6928_v24 = vrot.slane %v1346_v33, 9 }
 0x12c   : > { %v1468_v26 = vsel %vm9144_vm7, %v6928_v24, %v1467_v28  ;;  %v1363_v28 = vld [vmem:[%s8899_s8 + $0x80] sm:$0x1] }
 0x12e   : > { %6921 = vmatmul.mubr.msk.bf16.gmra.mrb[56].mxu1 %vm746_vm3, %v6903_v30  ;;  %v1439_v30 = vrot.slane %v1335_v29, 5  ;;  %v1471_v29 = vsel %vm9144_vm7, %v1469_v45, %v1470_v9 }
 0x12f   : > { %1320 = vmatprep.mubr.bf16.mxu1 %v8766_v4 }
 0x130   : > { %v1440_v12 = vsel %vm9144_vm7, %v6924_v46, %v1439_v30  ;;  %v1353_v46 = vld [vmem:[%s8899_s8 + $0x58] sm:$0xf] }
 0x131   : > { %7277 = vmatmul.mubr.msk.bf16.gmra.mrb[12].mxu0 %vm746_vm3, %v8634_v63  ;;  %v6944_v63 = vcombine.low %v1461_v44, %v1464_v48  ;;  %v7291_v44 = vld [vmem:[%s8899_s8 + $0x1c] sm:$0xf]  ;;  %v1361_v48 = vld [vmem:[%s8899_s8 + $0x78] sm:$0xe] }
 0x132   : > { %3977 = vmatprep.mubr.bf16.mxu0 %v8766_v4  ;;  %v4220_v24 = vshll.u32 %v7291_v44, 16  ;;  %v6933_v45 = vrot.slane %v1361_v48, 9 }
 0x136   : > { %6922 = vmatmul.mubr.msk.bf16.gmra.mrb[60].mxu1 %vm746_vm3, %v6904_v31  ;;  %v1441_v31 = vrot.slane %v1439_v30, 4  ;;  %v6945_v30 = vcombine.low %v1468_v26, %v1471_v29  ;;  %v1365_v26 = vld [vmem:[%s8899_s8 + $0x88] sm:$0xf]  ;;  %v7293_v29 = vld [vmem:[%s8899_s8 + $0x24] sm:$0xf] }
 0x137   : > { %1687 = vmatprep.mubr.bf16.mxu1 %v8766_v4 }
 0x138   : > { %v1443_v49 = vsel %vm9144_vm7, %v1441_v31, %v1442_v40  ;;  %v8642_v31 = vld [vmem:[%s8899_s8 + $0x90] sm:$0xff]  }
 0x139   : > { %7278 = vmatmul.mubr.msk.bf16.gmra.mrb[16].mxu0 %vm746_vm3, %v8636_v38  ;;  %v6941_v8 = vcombine.low %v1440_v12, %v1443_v49  ;;  %v1474_v38 = vrot.slane %v1350_v17, 5  ;;  %v1354_v12 = vld [vmem:[%s8899_s8 + $0x5c] sm:$0x1]  ;;  %v1505_v17 = vrot.slane %v1363_v28, 5 }
 0x13a   : > { %3987 = vmatprep.mubr.bf16.mxu0 %v8766_v4  ;;  %v1484_v52 = vrot.slane %v1354_v12, 5  ;;  %v4238_v12 = vshll.u32 %v7293_v29, 16 }
 0x13b   : > { %v1476_v39 = vrot.slane %v1474_v38, 4  ;;  %v1475_v40 = vsel %vm9144_vm7, %v6929_v13, %v1474_v38  ;;  %v7294_v38 = vld [vmem:[%s8899_s8 + $0x28] sm:$0xf]  ;;  %v9628_v13 = vrot.slane %v4220_v24, 5 }
 0x13e   : > { %6958 = vmatmul.mubr.msk.bf16.vlgmr.msra.gmra.mrb[0].mxu1 %vm746_vm3, %v6940_v32  ;;  %v1477_v32 = vrot.slane %v1351_v62, 5 }
 0x13f   : > { %1697 = vmatprep.mubr.bf16.mxu1 %v8766_v4  ;;  %2091 = vmatpush1.bf16.msra.mxu1 %v2085_v43  ;;  %v1481_v43 = vrot.slane %v1353_v46, 5  ;;  %v1364_v46 = vld [vmem:[%s8899_s8 + $0x84] sm:$0xe] }
 0x140   : > { %8053 = vmatprep.subr.msk.bf16.mxu1 %vm795_vm0, %v8862_v1  ;;  %v1450_v1 = vsel %vm9144_vm7, %v1448_v54, %v1449_v55  ;;  %v1478_v41 = vsel %vm9144_vm7, %v1476_v39, %v1477_v32 }
 0x141   : > { %7279 = vmatmul.mubr.msk.bf16.gmra.mrb[20].mxu0 %vm746_vm3, %v8637_v47  ;;  %v6942_v2 = vcombine.low %v1447_v59, %v1450_v1  ;;  %v1352_v47 = vld [vmem:[%s8899_s8 + $0x54] sm:$0xe]  ;;  %v6946_v49 = vcombine.low %v1475_v40, %v1478_v41  ;;  %v1483_v51 = vrot.slane %v1481_v43, 4  ;;  %v1357_v59 = vld [vmem:[%s8899_s8 + $0x68] sm:$0x1] }
 0x142   : > { %3997 = vmatprep.mubr.bf16.mxu0 %v8766_v4  ;;  %v6930_v50 = vrot.slane %v1352_v47, 9  ;;  %v1491_v0 = vrot.slane %v1357_v59, 5  ;;  %v7292_v40 = vld [vmem:[%s8899_s8 + $0x20] sm:$0x1]  ;;  %v4235_v47 = vshrl.u32 %v7293_v29, 16 }
 0x143   : > { %v1485_v55 = vsel %vm9144_vm7, %v1483_v51, %v1484_v52  ;;  %v6934_v52 = vrot.slane %v1364_v46, 9  ;;  %v9676_v29 = vld [vmem:[%s9670_s24] sm:$0xff] }
 0x144   : > { %v1482_v54 = vsel %vm9144_vm7, %v6930_v50, %v1481_v43  ;;  %v1366_v43 = vld [vmem:[%s8899_s8 + $0x8c] sm:$0x1]  ;;  %v4248_v50 = vshrl.u32 %v7294_v38, 16  ;;  %v4237_v59 = vrot.slane %v4235_v47, 4  ;;  %5777 = vperm.xlu0 %8614, %v9676_v29   ;;  %v1372_v47 = vld [vmem:[%s8899_s8 + $0xa4] sm:$0x1] }
 0x145   : > { %v6947_v1 = vcombine.low %v1482_v54, %v1485_v55  ;;  %v1512_v54 = vrot.slane %v1366_v43, 5 }
 0x146   : > { %6959 = vmatmul.mubr.msk.bf16.gmra.mrb[4].mxu1 %vm746_vm3, %v6941_v8  ;;  %v1356_v8 = vld [vmem:[%s8899_s8 + $0x64] sm:$0xf] }
 0x147   : > { %1707 = vmatprep.mubr.bf16.mxu1 %v8766_v4  ;;  %v1488_v56 = vrot.slane %v1356_v8, 5 }
 0x149   : > { %7280 = vmatmul.mubr.msk.bf16.gmra.mrb[24].mxu0 %vm746_vm3, %v8638_v11  ;;  %v1355_v11 = vld [vmem:[%s8899_s8 + $0x60] sm:$0xe]  ;;  %v1490_v61 = vrot.slane %v1488_v56, 4 }
 0x14a   : > { %4007 = vmatprep.mubr.bf16.mxu0 %v8766_v4  ;;  %v6931_v60 = vrot.slane %v1355_v11, 9  ;;  %v1368_v11 = vld [vmem:[%s8899_s8 + $0x94] sm:$0xf] }
 0x14b   : > { %v1492_v15 = vsel %vm9144_vm7, %v1490_v61, %v1491_v0  ;;  %v4250_v61 = vrot.slane %v4248_v50, 4  ;;  %v7295_v0 = vld [vmem:[%s8899_s8 + $0x2c] sm:$0x1] }
 0x14c   : > { %v1489_v10 = vsel %vm9144_vm7, %v6931_v60, %v1488_v56  ;;  %v4230_v56 = vshll.u32 %v7292_v40, 16  ;;  %v5280_v40 = vsel %vm795_vm0, %v9453_v36, 0 }
 0x14d   : > { %v6948_v19 = vcombine.low %v1489_v10, %v1492_v15  ;;  %v7296_v10 = vld [vmem:[%s8899_s8 + $0x30] sm:$0xf]  ;;  %v7297_v15 = vld [vmem:[%s8899_s8 + $0x34] sm:$0xf] }
 0x14e   : > { %6960 = vmatmul.mubr.msk.bf16.gmra.mrb[8].mxu1 %vm746_vm3, %v6942_v2  ;;  %v1359_v2 = vld [vmem:[%s8899_s8 + $0x70] sm:$0xf] }
 0x14f   : > { %1717 = vmatprep.mubr.bf16.mxu1 %v8766_v4  ;;  %v1495_v7 = vrot.slane %v1359_v2, 5  ;;  %v8647_v2 = vld [vmem:[%s8899_s8 + $0xcc] sm:$0xff]  }
 0x151   : > { %7281 = vmatmul.mubr.msk.bf16.gmra.mrb[28].mxu0 %vm746_vm3, %v8639_v16  ;;  %v1358_v16 = vld [vmem:[%s8899_s8 + $0x6c] sm:$0xe]  ;;  %v1497_v21 = vrot.slane %v1495_v7, 4 }
 0x152   : > { %4017 = vmatprep.mubr.bf16.mxu0 %v8766_v4  ;;  %v6932_v20 = vrot.slane %v1358_v16, 9 }
 0x153   : > { %v1499_v35 = vsel %vm9144_vm7, %v1497_v21, %v1498_v22  ;;  %v1367_v21 = vld [vmem:[%s8899_s8 + $0x90] sm:$0xe]  ;;  %v1369_v22 = vld [vmem:[%s8899_s8 + $0x98] sm:$0x1] }
 0x154   : > { %v1496_v6 = vsel %vm9144_vm7, %v6932_v20, %v1495_v7  ;;  %v1516_v20 = vrot.slane %v1368_v11, 5  ;;  %v1519_v24 = vrot.slane %v1369_v22, 5 }
 0x155   : > { %v6949_v33 = vcombine.low %v1496_v6, %v1499_v35  ;;  %v4254_v6 = vshll.u32 %v7295_v0, 16  ;;  %v4259_v35 = vshrl.u32 %v7296_v10, 16  ;;  %v1374_v0 = vld [vmem:[%s8899_s8 + $0xac] sm:$0xf] }
 0x156   : > { %6961 = vmatmul.mubr.msk.bf16.gmra.mrb[12].mxu1 %vm746_vm3, %v6943_v25  ;;  %v1362_v25 = vld [vmem:[%s8899_s8 + $0x7c] sm:$0xf] }
 0x157   : > { %1727 = vmatprep.mubr.bf16.mxu1 %v8766_v4  ;;  %v1502_v14 = vrot.slane %v1362_v25, 5 }
 0x159   : > { %7282 = vmatmul.mubr.msk.bf16.gmra.mrb[32].mxu0 %vm746_vm3, %v8640_v37  ;;  %v7290_v37 = vld [vmem:[%s8899_s8 + $0x18] sm:$0xf]  ;;  %v1504_v9 = vrot.slane %v1502_v14, 4  ;;  %v1503_v39 = vsel %vm9144_vm7, %v6933_v45, %v1502_v14  ;;  %v4262_v14 = vshll.u32 %v7296_v10, 16  ;;  %v1371_v45 = vld [vmem:[%s8899_s8 + $0xa0] sm:$0xf] }
 0x15a   : > { %4027 = vmatprep.mubr.bf16.mxu0 %v8766_v4  ;;  %v4211_v58 = vshrl.u32 %v7290_v37, 16  ;;  %v1523_v46 = vrot.slane %v1371_v45, 5 }
 0x15b   : > { %v1506_v32 = vsel %vm9144_vm7, %v1504_v9, %v1505_v17 }
 0x15c   : > { %v4213_v62 = vrot.slane %v4211_v58, 4  ;;  %v6950_v51 = vcombine.low %v1503_v39, %v1506_v32  ;;  %v6935_v58 = vrot.slane %v1367_v21, 9  ;;  %v1370_v32 = vld [vmem:[%s8899_s8 + $0x9c] sm:$0xe]  ;;  %v7301_v21 = vld [vmem:[%s8899_s8 + $0x44] sm:$0x1] }
 0x15e   : > { %6962 = vmatmul.mubr.msk.bf16.gmra.mrb[16].mxu1 %vm746_vm3, %v6944_v63  ;;  %v4214_v63 = vshll.u32 %v7290_v37, 16  ;;  %v4268_v37 = vshll.u32 %v7297_v15, 16 }
 0x15f   : > { %1737 = vmatprep.mubr.bf16.mxu1 %v8766_v4 }
 0x161   : > { %7283 = vmatmul.mubr.msk.bf16.gmra.mrb[36].mxu0 %vm746_vm3, %v8641_v23  ;;  %v4224_v23 = vshrl.u32 %v7291_v44, 16  ;;  %v4272_v44 = vshrl.u32 %v7297_v15, 16 }
 0x162   : > { %4037 = vmatprep.mubr.bf16.mxu0 %v8766_v4 }
 0x163   : > { %v4226_v41 = vrot.slane %v4224_v23, 4  ;;  %v4256_v23 = vrot.slane %v4254_v6, 5  ;;  %v1373_v6 = vld [vmem:[%s8899_s8 + $0xa8] sm:$0xe] }
 0x165   : > { %v4227_v55 = vor.u32 %v4226_v41, %v9628_v13  ;;  %v1517_v41 = vsel %vm9144_vm7, %v6935_v58, %v1516_v20 }
 0x166   : > { %6963 = vmatmul.mubr.msk.bf16.gmra.mrb[20].mxu1 %vm746_vm3, %v6945_v30  ;;  %v4216_v30 = vrot.slane %v4214_v63, 5  ;;  %v1518_v63 = vrot.slane %v1516_v20, 4 }
 0x167   : > { %1747 = vmatprep.mubr.bf16.mxu1 %v8766_v4  ;;  %v4228_v18 = vrot.slane %v4227_v55, 4  ;;  %v1525_v55 = vrot.slane %v1523_v46, 4 }
 0x168   : > { %v4217_v8 = vor.u32 %v4216_v30, %v4213_v62  ;;  %v9678_v62 = vrot.slane %v4268_v37, 5  ;;  %v4274_v30 = vrot.slane %v4272_v44, 4  ;;  %v1520_v43 = vsel %vm9144_vm7, %v1518_v63, %v1519_v24  ;;  %v1375_v37 = vld [vmem:[%s8899_s8 + $0xb0] sm:$0x1] }
 0x169   : > { %7284 = vmatmul.mubr.msk.bf16.gmra.mrb[40].mxu0 %vm746_vm3, %v8642_v31  ;;  %v1509_v31 = vrot.slane %v1365_v26, 5  ;;  %v9673_v26 = vld [vmem:[%s9670_s24 + $0x10] sm:$0xff]  ;;  %v4302_v63 = vshll.u32 %v7301_v21, 16  ;;  %v6937_v24 = vrot.slane %v1373_v6, 9 }
 0x16a   : > { %4047 = vmatprep.mubr.bf16.mxu0 %v8766_v4  ;;  %v4218_v7 = vrot.slane %v4217_v8, 4  ;;  %5787 = vperm.xlu1 %8615, %v9673_v26  }
 0x16c   : > { %v4223_v28 = vsel %vm8924_vm4, %v4218_v7, %v9628_v13  ;;  %v7299_v13 = vld [vmem:[%s8899_s8 + $0x3c] sm:$0xf] }
 0x16d   : > { %v4283_v36 = vshrl.u32 %v7299_v13, 16 }
 0x16e   : > { %6964 = vmatmul.mubr.msk.bf16.gmra.mrb[24].mxu1 %vm746_vm3, %v6946_v49  ;;  %v4244_v49 = vshll.u32 %v7294_v38, 16  ;;  %v4261_v38 = vrot.slane %v4259_v35, 4  ;;  %v1530_v35 = vrot.slane %v1374_v0, 5 }
 0x16f   : > { %1757 = vmatprep.mubr.bf16.mxu1 %v8766_v4 }
 0x170   : > { %v9643_v60 = vrot.slane %v4244_v49, 5 }
 0x171   : > { %7285 = vmatmul.mubr.msk.bf16.gmra.mrb[44].mxu0 %vm746_vm3, %v8643_v53  ;;  %v1511_v53 = vrot.slane %v1509_v31, 4 }
 0x172   : > { %4057 = vmatprep.mubr.bf16.mxu0 %v8766_v4 }
 0x173   : > { %v1513_v16 = vsel %vm9144_vm7, %v1511_v53, %v1512_v54  ;;  %v4275_v53 = vor.u32 %v4274_v30, %v9678_v62 }
 0x175   : > { %v4276_v15 = vrot.slane %v4275_v53, 4 }
 0x176   : > { %6965 = vmatmul.mubr.msk.bf16.gmra.mrb[28].mxu1 %vm746_vm3, %v6947_v1  ;;  %v4240_v1 = vrot.slane %v4238_v12, 5  ;;  %v7300_v12 = vld [vmem:[%s8899_s8 + $0x40] sm:$0xf] }
 0x177   : > { %1767 = vmatprep.mubr.bf16.mxu1 %v8766_v4  ;;  %v4292_v11 = vshll.u32 %v7300_v12, 16 }
 0x178   : > { %v4241_v25 = vor.u32 %v4240_v1, %v4237_v59  ;;  %v4296_v59 = vshrl.u32 %v7300_v12, 16  ;;  %v9703_v1 = vld [vmem:[%s9670_s24 + $0x18] sm:$0xff] }
 0x179   : > { %7286 = vmatmul.mubr.msk.bf16.gmra.mrb[48].mxu0 %vm746_vm3, %v8644_v5  ;;  %v1510_v5 = vsel %vm9144_vm7, %v6934_v52, %v1509_v31  ;;  %v7298_v31 = vld [vmem:[%s8899_s8 + $0x38] sm:$0x1]  ;;  %v6936_v52 = vrot.slane %v1370_v32, 9  ;;  %5792 = vperm.xlu1 %8615, %v9703_v1   ;;  %v9720_v22 = vrot.slane %v4292_v11, 5 }
 0x17a   : > { %4067 = vmatprep.mubr.bf16.mxu0 %v8766_v4  ;;  %v6951_v48 = vcombine.low %v1510_v5, %v1513_v16  ;;  %v4242_v9 = vrot.slane %v4241_v25, 4  ;;  %v4278_v54 = vshll.u32 %v7298_v31, 16  ;;  %v4298_v25 = vrot.slane %v4296_v59, 4  ;;  %v1377_v32 = vld [vmem:[%s8899_s8 + $0xb8] sm:$0xf] }
 0x17b   : > { %v4304_v31 = vrot.slane %v4302_v63, 5  ;;  %v1537_v53 = vrot.slane %v1377_v32, 5  ;;  %v9796_v63 = vld [vmem:[%s9670_s24 + $0x60] sm:$0xff] }
 0x17c   : > { %v4247_v49 = vsel %vm8924_vm4, %v4242_v9, %v9643_v60  ;;  %v4280_v16 = vrot.slane %v4278_v54, 5  ;;  %v4299_v45 = vor.u32 %v4298_v25, %v9720_v22 }
 0x17d   : > { %v1539_v21 = vrot.slane %v1537_v53, 4 }
 0x17e   : > { %6966 = vmatmul.mubr.msk.bf16.gmra.mrb[32].mxu1 %vm746_vm3, %v6948_v19  ;;  %v4232_v19 = vrot.slane %v4230_v56, 5  ;;  %v1526_v56 = vrot.slane %v1372_v47, 5  ;;  %v4281_v58 = vsel %vm8924_vm4, %v4276_v15, %v4280_v16  ;;  %v1531_v47 = vsel %vm9144_vm7, %v6937_v24, %v1530_v35  ;;  %v9778_v16 = vld [vmem:[%s9670_s24 + $0x58] sm:$0xff] }
 0x17f   : > { %1777 = vmatprep.mubr.bf16.mxu1 %v8766_v4  ;;  %v4300_v12 = vrot.slane %v4299_v45, 4 }
 0x180   : > { %v1527_v20 = vsel %vm9144_vm7, %v1525_v55, %v1526_v56  ;;  %v1378_v56 = vld [vmem:[%s8899_s8 + $0xbc] sm:$0x1] }
 0x181   : > { %7287 = vmatmul.mubr.msk.bf16.gmra.mrb[52].mxu0 %vm746_vm3, %v8645_v34  ;;  %v4251_v34 = vor.u32 %v4250_v61, %v9643_v60  ;;  %v9706_v60 = vld [vmem:[%s9670_s24 + $0x8] sm:$0xff]  ;;  %v6952_v61 = vcombine.low %v1517_v41, %v1520_v43  ;;  %v7306_v41 = vld [vmem:[%s8899_s8 + $0x58] sm:$0xf] }
 0x182   : > { %4077 = vmatprep.mubr.bf16.mxu0 %v8766_v4  ;;  %5782 = vperm.xlu0 %8614, %v9706_v60   ;;  %v9753_v43 = vld [vmem:[%s9670_s24 + $0x48] sm:$0xff]  ;;  %v4344_v0 = vshrl.u32 %v7306_v41, 16 }
 0x183   : > { %v4252_v17 = vrot.slane %v4251_v34, 4  ;;  %v9723_v34 = vld [vmem:[%s9670_s24 + $0x20] sm:$0xff] }
 0x185   : > { %v4257_v50 = vsel %vm8924_vm4, %v4252_v17, %v4256_v23  ;;  %v9741_v23 = vld [vmem:[%s9670_s24 + $0x38] sm:$0xff] }
 0x186   : > { %6967 = vmatmul.mubr.msk.bf16.gmra.mrb[36].mxu1 %vm746_vm3, %v6949_v33  ;;  %v4233_v33 = vsel %vm8924_vm4, %v4228_v18, %v4232_v19  ;;  %v7340_v7 = vcombine.low %v4247_v49, %v4257_v50  ;;  %v9713_v18 = vld [vmem:[%s9670_s24 + $0x28] sm:$0xff]  ;;  %v1524_v19 = vsel %vm9144_vm7, %v6936_v52, %v1523_v46  ;;  %5797 = vperm.xlu0 %8614, %v9723_v34   ;;  %v7304_v49 = vld [vmem:[%s8899_s8 + $0x50] sm:$0x1] }
 0x187   : > { %1787 = vmatprep.mubr.bf16.mxu1 %v8766_v4  ;;  %v7339_v39 = vcombine.low %v4223_v28, %v4233_v33  ;;  %5802 = vperm.xlu1 %8615, %v9713_v18   ;;  %v6953_v28 = vcombine.low %v1524_v19, %v1527_v20  ;;  %v4326_v15 = vshll.u32 %v7304_v49, 16  ;;  %v9781_v19 = vld [vmem:[%s9670_s24 + $0x50] sm:$0xff] }
 0x189   : > { %7288 = vmatmul.mubr.msk.bf16.gmra.mrb[56].mxu0 %vm746_vm3, %v8646_v57  ;;  %v4264_v57 = vrot.slane %v4262_v14, 5  ;;  %v7302_v14 = vld [vmem:[%s8899_s8 + $0x48] sm:$0xf] }
 0x18a   : > { %4087 = vmatprep.mubr.bf16.mxu0 %v8766_v4  ;;  %v4307_v9 = vshrl.u32 %v7302_v14, 16  ;;  %v4310_v17 = vshll.u32 %v7302_v14, 16 }
 0x18b   : > { %v4265_v8 = vor.u32 %v4264_v57, %v4261_v38  ;;  %v9744_v38 = vld [vmem:[%s9670_s24 + $0x30] sm:$0xff]  ;;  %v1532_v57 = vrot.slane %v1530_v35, 4  ;;  %5812 = vperm.xlu1 %8615, %v9741_v23  }
 0x18c   : > { %5807 = vperm.xlu0 %8614, %v9744_v38   ;;  %v4309_v50 = vrot.slane %v4307_v9, 4 }
 0x18d   : > { %v4266_v10 = vrot.slane %v4265_v8, 4  ;;  %v1376_v8 = vld [vmem:[%s8899_s8 + $0xb4] sm:$0xe] }
 0x18e   : > { %6968 = vmatmul.mubr.msk.bf16.gmra.mrb[40].mxu1 %vm746_vm3, %v6950_v51  ;;  %v4286_v51 = vshll.u32 %v7299_v13, 16  ;;  %v6938_v20 = vrot.slane %v1376_v8, 9 }
 0x18f   : > { %1797 = vmatprep.mubr.bf16.mxu1 %v8766_v4  ;;  %v4271_v33 = vsel %vm8924_vm4, %v4266_v10, %v9678_v62  ;;  %v1533_v62 = vrot.slane %v1375_v37, 5  ;;  %5822 = vperm.xlu1 %8615, %v9753_v43   ;;  %v4346_v37 = vrot.slane %v4344_v0, 4  ;;  %v7311_v0 = vld [vmem:[%s8899_s8 + $0x6c] sm:$0xf] }
 0x190   : > { %v4288_v5 = vrot.slane %v4286_v51, 5  ;;  %v7341_v46 = vcombine.low %v4271_v33, %v4281_v58  ;;  %v9759_v51 = vld [vmem:[%s9670_s24 + $0x40] sm:$0xff]  ;;  %v1538_v24 = vsel %vm9144_vm7, %v6938_v20, %v1537_v53 }
 0x191   : > { %7289 = vmatmul.mubr.msk.bf16.gmra.mrb[60].mxu0 %vm746_vm3, %v8647_v2  ;;  %v4285_v2 = vrot.slane %v4283_v36, 4  ;;  %v4312_v36 = vrot.slane %v4310_v17, 5  ;;  %v1534_v52 = vsel %vm9144_vm7, %v1532_v57, %v1533_v62  ;;  %5817 = vperm.xlu0 %8614, %v9759_v51   ;;  %v7308_v33 = vld [vmem:[%s8899_s8 + $0x60] sm:$0xf]  ;;  %v7309_v58 = vld [vmem:[%s8899_s8 + $0x64] sm:$0xf] }
 0x192   : > { %4739 = vmatprep.mubr.bf16.mxu0 %v8766_v4  ;;  %v4328_v17 = vrot.slane %v4326_v15, 5  ;;  %v4358_v32 = vshll.u32 %v7308_v33, 16 }
 0x193   : > { %v4289_v44 = vor.u32 %v4288_v5, %v4285_v2  ;;  %v6954_v5 = vcombine.low %v1531_v47, %v1534_v52  ;;  %v4313_v10 = vor.u32 %v4312_v36, %v4309_v50  ;;  %5832 = vperm.xlu1 %8615, %v9778_v16  }
 0x194   : > { %v4360_v53 = vrot.slane %v4358_v32, 5 }
 0x195   : > { %5827 = vperm.xlu0 %8614, %v9781_v19   ;;  %v4314_v45 = vrot.slane %v4313_v10, 4 }
 0x196   : > { %6969 = vmatmul.mubr.msk.bf16.gmra.mrb[44].mxu1 %vm746_vm3, %v6951_v48  ;;  %v7303_v48 = vld [vmem:[%s8899_s8 + $0x4c] sm:$0xf] }
 0x197   : > { %1807 = vmatprep.mubr.bf16.mxu1 %v8766_v4  ;;  %v4316_v30 = vshll.u32 %v7303_v48, 16  ;;  %v4320_v13 = vshrl.u32 %v7303_v48, 16  ;;  %v9791_v48 = vld [vmem:[%s9670_s24 + $0x68] sm:$0xff] }
 0x198   : > { %5842 = vperm.xlu1 %8615, %v9791_v48  }
 0x199   : > { %7357 = vmatmul.mubr.msk.bf16.vlgmr.msra.gmra.mrb[0].mxu0 %vm746_vm3, %v7339_v39  ;;  %v4290_v39 = vrot.slane %v4289_v44, 4  ;;  %v9765_v54 = vrot.slane %v4316_v30, 5  ;;  %v4322_v55 = vrot.slane %v4320_v13, 4  ;;  %v7307_v44 = vld [vmem:[%s8899_s8 + $0x5c] sm:$0x1]  ;;  %5837 = vperm.xlu0 %8614, %v9796_v63  }
 0x19a   : > { %5286 = vmatpush1.bf16.msra.mxu0 %v5280_v40  ;;  %4749 = vmatprep.mubr.bf16.mxu0 %v8766_v4  ;;  %v7305_v40 = vld [vmem:[%s8899_s8 + $0x54] sm:$0xf]  ;;  %v4350_v13 = vshll.u32 %v7307_v44, 16 }
 0x19b   : > { %v4331_v11 = vshrl.u32 %v7305_v40, 16  ;;  %v4334_v59 = vshll.u32 %v7305_v40, 16  ;;  %v4295_v2 = vsel %vm8924_vm4, %v4290_v39, %v9720_v22  ;;  %v1540_v22 = vrot.slane %v1378_v56, 5  ;;  %v9809_v40 = vld [vmem:[%s9670_s24 + $0x78] sm:$0xff] }
 0x19c   : > { %v4323_v25 = vor.u32 %v4322_v55, %v9765_v54  ;;  %v4355_v39 = vshrl.u32 %v7308_v33, 16  ;;  %v4352_v52 = vrot.slane %v4350_v13, 5  ;;  %5852 = vperm.xlu1 %8615, %v9809_v40   ;;  %v7314_v13 = vld [vmem:[%s8899_s8 + $0x78] sm:$0xf] }
 0x19d   : > { %v4333_v6 = vrot.slane %v4331_v11, 4  ;;  %v4336_v35 = vrot.slane %v4334_v59, 5  ;;  %v1541_v57 = vsel %vm9144_vm7, %v1539_v21, %v1540_v22  ;;  %v9825_v11 = vld [vmem:[%s9670_s24 + $0x88] sm:$0xff]  ;;  %v4379_v21 = vshrl.u32 %v7311_v0, 16 }
 0x19e   : > { %6970 = vmatmul.mubr.msk.bf16.gmra.mrb[48].mxu1 %vm746_vm3, %v6952_v61  ;;  %v4340_v61 = vshll.u32 %v7306_v41, 16  ;;  %v4324_v9 = vrot.slane %v4323_v25, 4  ;;  %v9812_v41 = vld [vmem:[%s9670_s24 + $0x70] sm:$0xff]  ;;  %v6955_v47 = vcombine.low %v1538_v24, %v1541_v57  ;;  %v4357_v8 = vrot.slane %v4355_v39, 4  ;;  %v7310_v59 = vld [vmem:[%s8899_s8 + $0x68] sm:$0x1] }
 0x19f   : > { %1817 = vmatprep.mubr.bf16.mxu1 %v8766_v4  ;;  %v4337_v62 = vor.u32 %v4336_v35, %v4333_v6  ;;  %5847 = vperm.xlu0 %8614, %v9812_v41   ;;  %v4374_v20 = vshll.u32 %v7310_v59, 16  ;;  %v4382_v22 = vshll.u32 %v7311_v0, 16  ;;  %v9845_v35 = vld [vmem:[%s9670_s24 + $0x98] sm:$0xff]  ;;  %v4381_v24 = vrot.slane %v4379_v21, 4  ;;  %v9857_v57 = vld [vmem:[%s9670_s24 + $0xa8] sm:$0xff] }
 0x1a0   : > { %v9785_v14 = vrot.slane %v4340_v61, 5  ;;  %v4329_v49 = vsel %vm8924_vm4, %v4324_v9, %v4328_v17  ;;  %v9829_v61 = vld [vmem:[%s9670_s24 + $0x80] sm:$0xff]  ;;  %5862 = vperm.xlu1 %8615, %v9825_v11   ;;  %v4361_v10 = vor.u32 %v4360_v53, %v4357_v8  ;;  %v7315_v39 = vld [vmem:[%s8899_s8 + $0x7c] sm:$0xf] }
 0x1a1   : > { %7358 = vmatmul.mubr.msk.bf16.gmra.mrb[4].mxu0 %vm746_vm3, %v7340_v7  ;;  %v4305_v7 = vsel %vm8924_vm4, %v4300_v12, %v4304_v31  ;;  %v4368_v31 = vshrl.u32 %v7309_v58, 16  ;;  %v4319_v12 = vsel %vm8924_vm4, %v4314_v45, %v9765_v54  ;;  %v4338_v50 = vrot.slane %v4337_v62, 4  ;;  %v9860_v62 = vld [vmem:[%s9670_s24 + $0xa0] sm:$0xff] }
 0x1a2   : > { %4759 = vmatprep.mubr.bf16.mxu0 %v8766_v4  ;;  %v4347_v30 = vor.u32 %v4346_v37, %v9785_v14  ;;  %v7343_v54 = vcombine.low %v4319_v12, %v4329_v49  ;;  %v8648_v37 = vld [vmem:[%s8899_s8 + $0xc] sm:$0xff]   ;;  %v4384_v45 = vrot.slane %v4382_v22, 5  ;;  %v4412_v8 = vshll.u32 %v7315_v39, 16  ;;  %v7316_v22 = vld [vmem:[%s8899_s8 + $0x80] sm:$0x1] }
 0x1a3   : > { %v4370_v56 = vrot.slane %v4368_v31, 4  ;;  %5857 = vperm.xlu0 %8614, %v9829_v61   ;;  %v9881_v49 = vld [vmem:[%s9670_s24 + $0xb0] sm:$0xff]  ;;  %v4416_v53 = vshrl.u32 %v7315_v39, 16 }
 0x1a4   : > { %v4348_v36 = vrot.slane %v4347_v30, 4  ;;  %5872 = vperm.xlu1 %8615, %v9845_v35   ;;  %v7313_v30 = vld [vmem:[%s8899_s8 + $0x74] sm:$0x1]  ;;  %v4385_v31 = vor.u32 %v4384_v45, %v4381_v24  ;;  %v8650_v24 = vld [vmem:[%s8899_s8 + $0x24] sm:$0xff]  }
 0x1a5   : > { %v4398_v12 = vshll.u32 %v7313_v30, 16  ;;  %v4418_v21 = vrot.slane %v4416_v53, 4 }
 0x1a6   : > { %6971 = vmatmul.mubr.msk.bf16.gmra.mrb[52].mxu1 %vm746_vm3, %v6953_v28  ;;  %v7342_v28 = vcombine.low %v4295_v2, %v4305_v7  ;;  %v7312_v2 = vld [vmem:[%s8899_s8 + $0x70] sm:$0xf]  ;;  %v4353_v7 = vsel %vm8924_vm4, %v4348_v36, %v4352_v52  ;;  %v4403_v36 = vshrl.u32 %v7314_v13, 16  ;;  %v4406_v52 = vshll.u32 %v7314_v13, 16 }
 0x1a7   : > { %1827 = vmatprep.mubr.bf16.mxu1 %v8766_v4  ;;  %v4388_v25 = vshll.u32 %v7312_v2, 16  ;;  %v4392_v6 = vshrl.u32 %v7312_v2, 16  ;;  %v4386_v59 = vrot.slane %v4385_v31, 4  ;;  %v4400_v2 = vrot.slane %v4398_v12, 5  ;;  %v7319_v31 = vld [vmem:[%s8899_s8 + $0x8c] sm:$0x1] }
 0x1a8   : > { %5882 = vperm.xlu1 %8615, %v9857_v57   ;;  %v4422_v13 = vshll.u32 %v7316_v22, 16  ;;  %v7320_v12 = vld [vmem:[%s8899_s8 + $0x90] sm:$0xf] }
 0x1a9   : > { %7359 = vmatmul.mubr.msk.bf16.gmra.mrb[8].mxu0 %vm746_vm3, %v7341_v46  ;;  %v4364_v46 = vshll.u32 %v7309_v58, 16  ;;  %v4376_v58 = vrot.slane %v4374_v20, 5  ;;  %v9854_v9 = vrot.slane %v4388_v25, 5  ;;  %v4394_v17 = vrot.slane %v4392_v6, 4  ;;  %v9940_v22 = vld [vmem:[%s9670_s24 + $0xf0] sm:$0xff] }
 0x1aa   : > { %4769 = vmatprep.mubr.bf16.mxu0 %v8766_v4  ;;  %v9896_v20 = vrot.slane %v4412_v8, 5  ;;  %v4424_v53 = vrot.slane %v4422_v13, 5  ;;  %v7506_v13 = vadd.f32 -1.0, %v9706_v60  ;;  %v7324_v60 = vld [vmem:[%s8899_s8 + $0xa0] sm:$0xf] }
 0x1ab   : > { %v9821_v55 = vrot.slane %v4364_v46, 5 }
 0x1ac   : > { %v4419_v30 = vor.u32 %v4418_v21, %v9896_v20  ;;  %v9937_v21 = vld [vmem:[%s9670_s24 + $0xf8] sm:$0xff] }
 0x1ad   : > { %v4371_v15 = vor.u32 %v4370_v56, %v9821_v55  ;;  %v7318_v56 = vld [vmem:[%s8899_s8 + $0x88] sm:$0xf] }
 0x1ae   : > { %6972 = vmatmul.mubr.msk.bf16.gmra.mrb[56].mxu1 %vm746_vm3, %v6954_v5  ;;  %v4343_v5 = vsel %vm8924_vm4, %v4338_v50, %v9785_v14  ;;  %v9848_v14 = vld [vmem:[%s9670_s24 + $0x90] sm:$0xff]  ;;  %v8649_v50 = vld [vmem:[%s8899_s8 + $0x18] sm:$0xff]   ;;  %v4420_v8 = vrot.slane %v4419_v30, 4  ;;  %v7505_v30 = vadd.f32 -1.0, %v9676_v29 }
 0x1af   : > { %1837 = vmatprep.mubr.bf16.mxu1 %v8766_v4  ;;  %v7344_v44 = vcombine.low %v4343_v5, %v4353_v7  ;;  %v4372_v33 = vrot.slane %v4371_v15, 4  ;;  %5867 = vperm.xlu0 %8614, %v9848_v14   ;;  %v9890_v5 = vld [vmem:[%s9670_s24 + $0xc8] sm:$0xff]  ;;  %v9893_v7 = vld [vmem:[%s9670_s24 + $0xc0] sm:$0xff]  ;;  %v4408_v15 = vrot.slane %v4406_v52, 5 }
 0x1b1   : > { %7360 = vmatmul.mubr.msk.bf16.gmra.mrb[12].mxu0 %vm746_vm3, %v7342_v28  ;;  %v4362_v28 = vrot.slane %v4361_v10, 4  ;;  %v4377_v46 = vsel %vm8924_vm4, %v4372_v33, %v4376_v58  ;;  %v4405_v10 = vrot.slane %v4403_v36, 4  ;;  %v9907_v33 = vld [vmem:[%s9670_s24 + $0xd8] sm:$0xff]  ;;  %v9910_v58 = vld [vmem:[%s9670_s24 + $0xd0] sm:$0xff]  ;;  %v9927_v36 = vld [vmem:[%s9670_s24 + $0xe0] sm:$0xff] }
 0x1b2   : > { %4779 = vmatprep.mubr.bf16.mxu0 %v8766_v4 }
 0x1b3   : > { %v4367_v32 = vsel %vm8924_vm4, %v4362_v28, %v9821_v55  ;;  %5877 = vperm.xlu0 %8614, %v9860_v62   ;;  %v7317_v55 = vld [vmem:[%s8899_s8 + $0x84] sm:$0xf]  ;;  %v4391_v28 = vsel %vm8924_vm4, %v4386_v59, %v9854_v9  ;;  %v4446_v59 = vshll.u32 %v7319_v31, 16  ;;  %v7323_v31 = vld [vmem:[%s8899_s8 + $0x9c] sm:$0xf] }
 0x1b4   : > { %v4427_v25 = vshrl.u32 %v7317_v55, 16  ;;  %v4430_v6 = vshll.u32 %v7317_v55, 16  ;;  %v7321_v55 = vld [vmem:[%s8899_s8 + $0x94] sm:$0xf] }
 0x1b6   : > { %6973 = vmatmul.mubr.msk.bf16.gmra.mrb[60].mxu1 %vm746_vm3, %v6955_v47  ;;  %v4395_v47 = vor.u32 %v4394_v17, %v9854_v9  ;;  %v4409_v17 = vor.u32 %v4408_v15, %v4405_v10  ;;  %v4429_v39 = vrot.slane %v4427_v25, 4  ;;  %v4432_v9 = vrot.slane %v4430_v6, 5  ;;  %v8651_v25 = vld [vmem:[%s8899_s8 + $0x30] sm:$0xff]  }
 0x1b7   : > { %2122 = vmatprep.mubr.bf16.mxu1 %v8766_v4  ;;  %5887 = vperm.xlu0 %8614, %v9881_v49   ;;  %v4460_v10 = vshll.u32 %v7321_v55, 16  ;;  %v4464_v15 = vshrl.u32 %v7321_v55, 16 }
 0x1b8   : > { %v4396_v0 = vrot.slane %v4395_v47, 4  ;;  %v4410_v52 = vrot.slane %v4409_v17, 4 }
 0x1b9   : > { %7361 = vmatmul.mubr.msk.bf16.gmra.mrb[16].mxu0 %vm746_vm3, %v7343_v54  ;;  %v7345_v54 = vcombine.low %v4367_v32, %v4377_v46 }
 0x1ba   : > { %4789 = vmatprep.mubr.bf16.mxu0 %v8766_v4  ;;  %v4401_v45 = vsel %vm8924_vm4, %v4396_v0, %v4400_v2  ;;  %v4451_v0 = vshrl.u32 %v7320_v12, 16  ;;  %v4454_v2 = vshll.u32 %v7320_v12, 16  ;;  %v4415_v6 = vsel %vm8924_vm4, %v4410_v52, %v9896_v20 }
 0x1bb   : > { %5897 = vperm.xlu0 %8614, %v9893_v7   ;;  %v7346_v47 = vcombine.low %v4391_v28, %v4401_v45  ;;  %v9953_v20 = vrot.slane %v4460_v10, 5  ;;  %v7507_v52 = vadd.f32 -1.0, %v9673_v26 }
 0x1bc   : > { %v4453_v45 = vrot.slane %v4451_v0, 4  ;;  %v4456_v17 = vrot.slane %v4454_v2, 5  ;;  %v4488_v0 = vshrl.u32 %v7324_v60, 16  ;;  %v7326_v2 = vld [vmem:[%s8899_s8 + $0xa8] sm:$0xf] }
 0x1be   : > { %7025 = vmatmul.mubr.msk.bf16.vlgmr.msra.gmra.mrb[0].mxu1 %vm746_vm3, %v8648_v37  ;;  %v4436_v37 = vshll.u32 %v7318_v56, 16  ;;  %v4457_v12 = vor.u32 %v4456_v17, %v4453_v45  ;;  %v4490_v45 = vrot.slane %v4488_v0, 4  ;;  %v4499_v17 = vshrl.u32 %v7326_v2, 16 }
 0x1bf   : > { %2132 = vmatprep.mubr.bf16.mxu1 %v8766_v4  ;;  %8054 = vmatpush1.bf16.msra.mxu1 %v8868_v3  ;;  %v9878_v3 = vld [vmem:[%s9670_s24 + $0xb8] sm:$0xff] }
 0x1c0   : > { %5892 = vperm.xlu1 %8615, %v9878_v3   ;;  %v9917_v32 = vrot.slane %v4436_v37, 5  ;;  %5907 = vperm.xlu0 %8614, %v9910_v58   ;;  %v4425_v37 = vsel %vm8924_vm4, %v4420_v8, %v4424_v53  ;;  %v7508_v8 = vadd.f32 -1.0, %v9703_v1  ;;  %v4458_v26 = vrot.slane %v4457_v12, 4 }
 0x1c1   : > { %7362 = vmatmul.mubr.msk.bf16.gmra.mrb[20].mxu0 %vm746_vm3, %v7344_v44  ;;  %v4440_v44 = vshrl.u32 %v7318_v56, 16  ;;  %v4433_v56 = vor.u32 %v4432_v9, %v4429_v39  ;;  %v7347_v39 = vcombine.low %v4415_v6, %v4425_v37  ;;  %v4466_v9 = vrot.slane %v4464_v15, 4  ;;  %v7327_v15 = vld [vmem:[%s8899_s8 + $0xac] sm:$0xf] }
 0x1c2   : > { %4799 = vmatprep.mubr.bf16.mxu0 %v8766_v4  ;;  %v7510_v1 = vadd.f32 -1.0, %v9713_v18  ;;  %v4508_v18 = vshll.u32 %v7327_v15, 16 }
 0x1c3   : > { %v4442_v46 = vrot.slane %v4440_v44, 4  ;;  %v4434_v44 = vrot.slane %v4433_v56, 4  ;;  %v4467_v53 = vor.u32 %v4466_v9, %v9953_v20  ;;  %v4475_v56 = vshrl.u32 %v7323_v31, 16 }
 0x1c4   : > { %5902 = vperm.xlu1 %8615, %v9890_v5   ;;  %5917 = vperm.xlu0 %8614, %v9927_v36   ;;  %v7511_v9 = vadd.f32 -1.0, %v9744_v38 }
 0x1c5   : > { %v4439_v29 = vsel %vm8924_vm4, %v4434_v44, %v9917_v32  ;;  %v4468_v6 = vrot.slane %v4467_v53, 4  ;;  %v4477_v44 = vrot.slane %v4475_v56, 4  ;;  %v7328_v53 = vld [vmem:[%s8899_s8 + $0xb0] sm:$0x1]  ;;  %v7513_v56 = vadd.f32 -1.0, %v9759_v51 }
 0x1c6   : > { %7026 = vmatmul.mubr.msk.bf16.gmra.mrb[4].mxu1 %vm746_vm3, %v8649_v50  ;;  %v9924_v50 = vld [vmem:[%s9670_s24 + $0xe8] sm:$0xff] }
 0x1c7   : > { %2142 = vmatprep.mubr.bf16.mxu1 %v8766_v4 }
 0x1c8   : > { %5912 = vperm.xlu1 %8615, %v9907_v33   ;;  %5927 = vperm.xlu0 %8614, %v9940_v22  }
 0x1c9   : > { %7363 = vmatmul.mubr.msk.bf16.gmra.mrb[24].mxu0 %vm746_vm3, %v7345_v54  ;;  %v4443_v54 = vor.u32 %v4442_v46, %v9917_v32  ;;  %v7322_v46 = vld [vmem:[%s8899_s8 + $0x98] sm:$0x1]  ;;  %v4478_v32 = vshll.u32 %v7323_v31, 16 }
 0x1ca   : > { %4809 = vmatprep.mubr.bf16.mxu0 %v8766_v4  ;;  %v4470_v55 = vshll.u32 %v7322_v46, 16  ;;  %v4463_v46 = vsel %vm8924_vm4, %v4458_v26, %v9953_v20  ;;  %v7514_v20 = vadd.f32 -1.0, %v9753_v43 }
 0x1cb   : > { %v4444_v28 = vrot.slane %v4443_v54, 4  ;;  %v8652_v54 = vld [vmem:[%s8899_s8 + $0x3c] sm:$0xff]  }
 0x1cc   : > { %5922 = vperm.xlu1 %8615, %v9924_v50   ;;  %6072 = vperm.xlu0 %8614, %v7505_v30   ;;  %v4472_v37 = vrot.slane %v4470_v55, 5  ;;  %v4502_v30 = vshll.u32 %v7326_v2, 16  ;;  %v7329_v55 = vld [vmem:[%s8899_s8 + $0xb4] sm:$0xf] }
 0x1cd   : > { %v4526_v43 = vshll.u32 %v7329_v55, 16 }
 0x1ce   : > { %7027 = vmatmul.mubr.msk.bf16.gmra.mrb[8].mxu1 %vm746_vm3, %v8650_v24  ;;  %v4448_v24 = vrot.slane %v4446_v59, 5  ;;  %v4484_v59 = vshll.u32 %v7324_v60, 16  ;;  %v4473_v31 = vsel %vm8924_vm4, %v4468_v6, %v4472_v37  ;;  %v4504_v12 = vrot.slane %v4502_v30, 5 }
 0x1cf   : > { %2152 = vmatprep.mubr.bf16.mxu1 %v8766_v4  ;;  %v7516_v6 = vadd.f32 -1.0, %v9778_v16  ;;  %v7515_v37 = vadd.f32 -1.0, %v9781_v19 }
 0x1d0   : > { %5932 = vperm.xlu1 %8615, %v9937_v21   ;;  %6082 = vperm.xlu0 %8614, %v7507_v52   ;;  %v9991_v52 = vrot.slane %v4508_v18, 5 }
 0x1d1   : > { %7364 = vmatmul.mubr.msk.bf16.gmra.mrb[28].mxu0 %vm746_vm3, %v7346_v47  ;;  %v4449_v47 = vsel %vm8924_vm4, %v4444_v28, %v4448_v24  ;;  %v4480_v28 = vrot.slane %v4478_v32, 5  ;;  %v9976_v24 = vrot.slane %v4484_v59, 5  ;;  %v7349_v32 = vcombine.low %v4463_v46, %v4473_v31  ;;  %v7331_v46 = vld [vmem:[%s8899_s8 + $0xbc] sm:$0x1]  ;;  %v7332_v31 = vld [vmem:[%s8899_s8 + $0xc0] sm:$0xf] }
 0x1d2   : > { %4819 = vmatprep.mubr.bf16.mxu0 %v8766_v4  ;;  %v7348_v10 = vcombine.low %v4439_v29, %v4449_v47  ;;  %v4501_v47 = vrot.slane %v4499_v17, 4 }
 0x1d3   : > { %v4481_v29 = vor.u32 %v4480_v28, %v4477_v44  ;;  %v4491_v60 = vor.u32 %v4490_v45, %v9976_v24  ;;  %v8654_v44 = vld [vmem:[%s8899_s8 + $0x54] sm:$0xff]  }
 0x1d4   : > { %6077 = vperm.xlu1 %8615, %v7506_v13   ;;  %v7325_v13 = vld [vmem:[%s8899_s8 + $0xa4] sm:$0x1] }
 0x1d5   : > { %v4494_v38 = vshll.u32 %v7325_v13, 16  ;;  %v4482_v59 = vrot.slane %v4481_v29, 4  ;;  %v4492_v0 = vrot.slane %v4491_v60, 4  ;;  %v4528_v13 = vrot.slane %v4526_v43, 5  ;;  %v7333_v29 = vld [vmem:[%s8899_s8 + $0xc4] sm:$0xf] }
 0x1d6   : > { %7028 = vmatmul.mubr.msk.bf16.gmra.mrb[12].mxu1 %vm746_vm3, %v8651_v25  ;;  %v7509_v25 = vadd.f32 -1.0, %v9723_v34  ;;  %v7512_v34 = vadd.f32 -1.0, %v9741_v23  ;;  %v8653_v23 = vld [vmem:[%s8899_s8 + $0x48] sm:$0xff]   ;;  %v7336_v43 = vld [vmem:[%s8899_s8 + $0xd0] sm:$0xf] }
 0x1d7   : > { %2162 = vmatprep.mubr.bf16.mxu1 %v8766_v4  ;;  %v4496_v2 = vrot.slane %v4494_v38, 5  ;;  %v4487_v28 = vsel %vm8924_vm4, %v4482_v59, %v9976_v24  ;;  %v4542_v38 = vshll.u32 %v7331_v46, 16  ;;  %v7521_v59 = vadd.f32 -1.0, %v9829_v61 }
 0x1d8   : > { %6087 = vperm.xlu1 %8615, %v7508_v8   ;;  %6092 = vperm.xlu0 %8614, %v7509_v25   ;;  %v7524_v61 = vadd.f32 -1.0, %v9845_v35  ;;  %v4584_v35 = vshrl.u32 %v7336_v43, 16 }
 0x1d9   : > { %7365 = vmatmul.mubr.msk.bf16.gmra.mrb[32].mxu0 %vm746_vm3, %v7347_v39  ;;  %v4512_v39 = vshrl.u32 %v7327_v15, 16  ;;  %v4518_v15 = vshll.u32 %v7328_v53, 16  ;;  %v4497_v45 = vsel %vm8924_vm4, %v4492_v0, %v4496_v2  ;;  %v4550_v53 = vshll.u32 %v7332_v31, 16 }
 0x1da   : > { %4829 = vmatprep.mubr.bf16.mxu0 %v8766_v4  ;;  %v7350_v24 = vcombine.low %v4487_v28, %v4497_v45  ;;  %v8656_v28 = vld [vmem:[%s8899_s8 + $0x6c] sm:$0xff]   ;;  %v4586_v46 = vrot.slane %v4584_v35, 4 }
 0x1db   : > { %v4514_v8 = vrot.slane %v4512_v39, 4  ;;  %v4520_v19 = vrot.slane %v4518_v15, 5  ;;  %v4552_v2 = vrot.slane %v4550_v53, 5  ;;  %v7334_v15 = vld [vmem:[%s8899_s8 + $0xc8] sm:$0x1] }
 0x1dc   : > { %6097 = vperm.xlu1 %8615, %v7510_v1   ;;  %6102 = vperm.xlu0 %8614, %v7511_v9   ;;  %v4523_v1 = vshrl.u32 %v7329_v55, 16  ;;  %v7517_v9 = vadd.f32 -1.0, %v9796_v63  ;;  %v4556_v55 = vshll.u32 %v7333_v29, 16 }
 0x1dd   : > { %v4515_v26 = vor.u32 %v4514_v8, %v9991_v52  ;;  %v4547_v8 = vshrl.u32 %v7332_v31, 16  ;;  %v7337_v31 = vld [vmem:[%s8899_s8 + $0xd4] sm:$0x1] }
 0x1de   : > { %7029 = vmatmul.mubr.msk.bf16.gmra.mrb[16].mxu1 %vm746_vm3, %v8652_v54  ;;  %v7330_v54 = vld [vmem:[%s8899_s8 + $0xb8] sm:$0xf]  ;;  %v4525_v30 = vrot.slane %v4523_v1, 4  ;;  %v7335_v1 = vld [vmem:[%s8899_s8 + $0xcc] sm:$0xf] }
 0x1df   : > { %2172 = vmatprep.mubr.bf16.mxu1 %v8766_v4  ;;  %v4532_v25 = vshll.u32 %v7330_v54, 16  ;;  %v4536_v51 = vshrl.u32 %v7330_v54, 16  ;;  %v4516_v17 = vrot.slane %v4515_v26, 4  ;;  %v4549_v0 = vrot.slane %v4547_v8, 4 }
 0x1e0   : > { %6107 = vperm.xlu1 %8615, %v7512_v34   ;;  %6112 = vperm.xlu0 %8614, %v7513_v56   ;;  %v7518_v34 = vadd.f32 -1.0, %v9791_v48  ;;  %v4529_v60 = vor.u32 %v4528_v13, %v4525_v30  ;;  %v4571_v45 = vshrl.u32 %v7335_v1, 16 }
 0x1e1   : > { %7366 = vmatmul.mubr.msk.bf16.gmra.mrb[36].mxu0 %vm746_vm3, %v7348_v10  ;;  %v4505_v10 = vor.u32 %v4504_v12, %v4501_v47  ;;  %v10011_v18 = vrot.slane %v4532_v25, 5  ;;  %v4538_v39 = vrot.slane %v4536_v51, 4  ;;  %v4521_v48 = vsel %vm8924_vm4, %v4516_v17, %v4520_v19 }
 0x1e2   : > { %4839 = vmatprep.mubr.bf16.mxu0 %v8766_v4  ;;  %v7520_v47 = vadd.f32 -1.0, %v9809_v40  ;;  %v7519_v12 = vadd.f32 -1.0, %v9812_v41  ;;  %v4544_v40 = vrot.slane %v4542_v38, 5  ;;  %v7522_v41 = vadd.f32 -1.0, %v9825_v11 }
 0x1e3   : > { %v4506_v16 = vrot.slane %v4505_v10, 4  ;;  %v4539_v63 = vor.u32 %v4538_v39, %v10011_v18  ;;  %v4558_v10 = vrot.slane %v4556_v55, 5  ;;  %v7523_v25 = vadd.f32 -1.0, %v9848_v14  ;;  %v7374_v55 = vld [vmem:[%s8899_s8 + $0x1c] sm:$0xf] }
 0x1e4   : > { %6117 = vperm.xlu1 %8615, %v7514_v20   ;;  %6122 = vperm.xlu0 %8614, %v7515_v37   ;;  %v4560_v20 = vshrl.u32 %v7333_v29, 16  ;;  %v4580_v17 = vshll.u32 %v7336_v43, 16  ;;  %v7526_v14 = vadd.f32 -1.0, %v9857_v57  ;;  %v7525_v19 = vadd.f32 -1.0, %v9860_v62 }
 0x1e5   : > { %v4540_v54 = vrot.slane %v4539_v63, 4  ;;  %v7528_v57 = vadd.f32 -1.0, %v9878_v3  ;;  %v7527_v62 = vadd.f32 -1.0, %v9881_v49  ;;  %v4590_v38 = vshll.u32 %v7337_v31, 16  ;;  %v7074_v31 = vld [vmem:[%s8899_s8 + $0x90] sm:$0xf] }
 0x1e6   : > { %7030 = vmatmul.mubr.msk.bf16.gmra.mrb[20].mxu1 %vm746_vm3, %v8653_v23  ;;  %v4511_v23 = vsel %vm8924_vm4, %v4506_v16, %v9991_v52  ;;  %v8655_v52 = vld [vmem:[%s8899_s8 + $0x60] sm:$0xff]   ;;  %v4562_v26 = vrot.slane %v4560_v20, 4  ;;  %v4574_v16 = vshll.u32 %v7335_v1, 16  ;;  %v7530_v3 = vadd.f32 -1.0, %v9890_v5 }
 0x1e7   : > { %2182 = vmatprep.mubr.bf16.mxu1 %v8766_v4  ;;  %v7351_v56 = vcombine.low %v4511_v23, %v4521_v48  ;;  %v4545_v51 = vsel %vm8924_vm4, %v4540_v54, %v4544_v40  ;;  %v8657_v23 = vld [vmem:[%s8899_s8 + $0x78] sm:$0xff]   ;;  %v7529_v49 = vadd.f32 -1.0, %v9893_v7  ;;  %v4592_v53 = vrot.slane %v4590_v38, 5  ;;  %v8658_v7 = vld [vmem:[%s8899_s8 + $0x84] sm:$0xff]   ;;  %v7375_v40 = vld [vmem:[%s8899_s8 + $0x20] sm:$0x1] }
 0x1e8   : > { %6127 = vperm.xlu1 %8615, %v7516_v6   ;;  %6132 = vperm.xlu0 %8614, %v7517_v9   ;;  %v4553_v6 = vor.u32 %v4552_v2, %v4549_v0  ;;  %v4563_v37 = vor.u32 %v4562_v26, %v4558_v10  ;;  %v4576_v9 = vrot.slane %v4574_v16, 5  ;;  %v7532_v20 = vadd.f32 -1.0, %v9907_v33  ;;  %v7373_v54 = vld [vmem:[%s8899_s8 + $0x18] sm:$0xe]  ;;  %v7379_v16 = vld [vmem:[%s8899_s8 + $0x30] sm:$0xe] }
 0x1e9   : > { %7367 = vmatmul.mubr.msk.bf16.gmra.mrb[40].mxu0 %vm746_vm3, %v7349_v32  ;;  %v4530_v32 = vrot.slane %v4529_v60, 4  ;;  %v7531_v5 = vadd.f32 -1.0, %v9910_v58  ;;  %v7534_v33 = vadd.f32 -1.0, %v9924_v50  ;;  %v7533_v58 = vadd.f32 -1.0, %v9927_v36  ;;  %v8659_v36 = vld [vmem:[%s8899_s8 + $0x90] sm:$0xff]  }
 0x1ea   : > { %4849 = vmatprep.mubr.bf16.mxu0 %v8766_v4  ;;  %v4554_v13 = vrot.slane %v4553_v6, 4  ;;  %v5065_v2 = vrot.slane %v7375_v40, 5  ;;  %v7536_v26 = vadd.f32 -1.0, %v9937_v21  ;;  %v7535_v50 = vadd.f32 -1.0, %v9940_v22  ;;  %v7378_v21 = vld [vmem:[%s8899_s8 + $0x2c] sm:$0x1] }
 0x1eb   : > { %v4535_v11 = vsel %vm8924_vm4, %v4530_v32, %v10011_v18  ;;  %v4564_v18 = vrot.slane %v4563_v37, 4  ;;  %v5062_v32 = vrot.slane %v7374_v55, 5  ;;  %v7380_v6 = vld [vmem:[%s8899_s8 + $0x34] sm:$0xf]  ;;  %v8660_v37 = vld [vmem:[%s8899_s8 + $0x9c] sm:$0xff]   ;;  %v2663_v38 = vshll.u32 %v7074_v31, 16 }
 0x1ec   : > { %6137 = vperm.xlu1 %8615, %v7518_v34   ;;  %6142 = vperm.xlu0 %8614, %v7519_v12   ;;  %v7352_v30 = vcombine.low %v4535_v11, %v4545_v51  ;;  %v4573_v34 = vrot.slane %v4571_v45, 4  ;;  %v4559_v29 = vsel %vm8924_vm4, %v4554_v13, %v4558_v10  ;;  %v7377_v10 = vld [vmem:[%s8899_s8 + $0x28] sm:$0xf]  ;;  %v7376_v11 = vld [vmem:[%s8899_s8 + $0x24] sm:$0xe]  ;;  %v5072_v51 = vrot.slane %v7378_v21, 5 }
 0x1ed   : > { %v5064_v0 = vrot.slane %v5062_v32, 4  ;;  %v5069_v43 = vrot.slane %v7377_v10, 5  ;;  %v5076_v45 = vrot.slane %v7380_v6, 5  ;;  %v7383_v13 = vld [vmem:[%s8899_s8 + $0x40] sm:$0xf] }
 0x1ee   : > { %7031 = vmatmul.mubr.msk.bf16.gmra.mrb[24].mxu1 %vm746_vm3, %v8654_v44  ;;  %v4566_v44 = vshll.u32 %v7334_v15, 16  ;;  %v4577_v60 = vor.u32 %v4576_v9, %v4573_v34  ;;  %v7382_v9 = vld [vmem:[%s8899_s8 + $0x3c] sm:$0xe]  ;;  %v7390_v21 = vld [vmem:[%s8899_s8 + $0x5c] sm:$0x1]  ;;  %v8663_v6 = vld [vmem:[%s8899_s8 + $0xc0] sm:$0xff]  }
 0x1ef   : > { %2192 = vmatprep.mubr.bf16.mxu1 %v8766_v4  ;;  %v5066_v1 = vsel %vm9144_vm7, %v5064_v0, %v5065_v2 }
 0x1f0   : > { %6147 = vperm.xlu1 %8615, %v7520_v47   ;;  %6152 = vperm.xlu0 %8614, %v7521_v59   ;;  %v4568_v39 = vrot.slane %v4566_v44, 5  ;;  %v4578_v12 = vrot.slane %v4577_v60, 4  ;;  %v7421_v59 = vrot.slane %v7373_v54, 9  ;;  %v7386_v60 = vld [vmem:[%s8899_s8 + $0x4c] sm:$0xf] }
 0x1f1   : > { %7368 = vmatmul.mubr.msk.bf16.gmra.mrb[44].mxu0 %vm746_vm3, %v7350_v24  ;;  %v4582_v24 = vrot.slane %v4580_v17, 5  ;;  %v7381_v17 = vld [vmem:[%s8899_s8 + $0x38] sm:$0x1] }
 0x1f2   : > { %4859 = vmatprep.mubr.bf16.mxu0 %v8766_v4  ;;  %v4569_v48 = vsel %vm8924_vm4, %v4564_v18, %v4568_v39  ;;  %v5063_v15 = vsel %vm9144_vm7, %v7421_v59, %v5062_v32  ;;  %v8661_v18 = vld [vmem:[%s8899_s8 + $0xa8] sm:$0xff]   ;;  %v7076_v32 = vld [vmem:[%s8899_s8 + $0x98] sm:$0x1] }
 0x1f3   : > { %v4587_v63 = vor.u32 %v4586_v46, %v4582_v24  ;;  %v7353_v47 = vcombine.low %v4559_v29, %v4569_v48  ;;  %v7438_v22 = vcombine.low %v5063_v15, %v5066_v1  ;;  %v7384_v46 = vld [vmem:[%s8899_s8 + $0x44] sm:$0x1]  ;;  %v7424_v29 = vrot.slane %v7382_v9, 9 }
 0x1f4   : > { %6157 = vperm.xlu1 %8615, %v7522_v41   ;;  %6162 = vperm.xlu0 %8614, %v7523_v25   ;;  %v5071_v25 = vrot.slane %v5069_v43, 4  ;;  %v5086_v48 = vrot.slane %v7384_v46, 5  ;;  %v2679_v1 = vshll.u32 %v7076_v32, 16  ;;  %v7084_v32 = vld [vmem:[%s8899_s8 + $0xb8] sm:$0xf] }
 0x1f5   : > { %v4588_v8 = vrot.slane %v4587_v63, 4  ;;  %v2660_v63 = vshrl.u32 %v7074_v31, 16 }
 0x1f6   : > { %7032 = vmatmul.mubr.msk.bf16.gmra.mrb[28].mxu1 %vm746_vm3, %v8655_v52  ;;  %v4583_v52 = vsel %vm8924_vm4, %v4578_v12, %v4582_v24  ;;  %v5083_v24 = vrot.slane %v7383_v13, 5  ;;  %v5090_v12 = vrot.slane %v7386_v60, 5  ;;  %v5100_v13 = vrot.slane %v7390_v21, 5 }
 0x1f7   : > { %2202 = vmatprep.mubr.bf16.mxu1 %v8766_v4 }
 0x1f8   : > { %6167 = vperm.xlu1 %8615, %v7524_v61   ;;  %6172 = vperm.xlu0 %8614, %v7525_v19   ;;  %v7422_v61 = vrot.slane %v7376_v11, 9  ;;  %v5078_v19 = vrot.slane %v5076_v45, 4  ;;  %v5084_v55 = vsel %vm9144_vm7, %v7424_v29, %v5083_v24 }
 0x1f9   : > { %7369 = vmatmul.mubr.msk.bf16.gmra.mrb[48].mxu0 %vm746_vm3, %v7351_v56  ;;  %v4593_v56 = vsel %vm8924_vm4, %v4588_v8, %v4592_v53  ;;  %v7077_v8 = vld [vmem:[%s8899_s8 + $0x9c] sm:$0xf]  ;;  %v7078_v53 = vld [vmem:[%s8899_s8 + $0xa0] sm:$0xf] }
 0x1fa   : > { %4869 = vmatprep.mubr.bf16.mxu0 %v8766_v4  ;;  %v7354_v41 = vcombine.low %v4583_v52, %v4593_v56  ;;  %v5070_v44 = vsel %vm9144_vm7, %v7422_v61, %v5069_v43  ;;  %v2662_v52 = vrot.slane %v2660_v63, 4  ;;  %v2665_v56 = vrot.slane %v2663_v38, 5  ;;  %v7388_v43 = vld [vmem:[%s8899_s8 + $0x54] sm:$0xe] }
 0x1fb   : > { %v2693_v59 = vshll.u32 %v7078_v53, 16  ;;  %v2697_v0 = vshrl.u32 %v7078_v53, 16 }
 0x1fc   : > { %6177 = vperm.xlu1 %8615, %v7526_v14   ;;  %6182 = vperm.xlu0 %8614, %v7527_v62   ;;  %v7423_v14 = vrot.slane %v7379_v16, 9  ;;  %v7426_v16 = vrot.slane %v7388_v43, 9 }
 0x1fe   : > { %7033 = vmatmul.mubr.msk.bf16.gmra.mrb[32].mxu1 %vm746_vm3, %v8656_v28  ;;  %v5073_v28 = vsel %vm9144_vm7, %v5071_v25, %v5072_v51  ;;  %v5077_v39 = vsel %vm9144_vm7, %v7423_v14, %v5076_v45  ;;  %v10143_v25 = vrot.slane %v2693_v59, 5  ;;  %v2699_v51 = vrot.slane %v2697_v0, 4 }
 0x1ff   : > { %2212 = vmatprep.mubr.bf16.mxu1 %v8766_v4  ;;  %v7439_v35 = vcombine.low %v5070_v44, %v5073_v28  ;;  %v7079_v28 = vld [vmem:[%s8899_s8 + $0xa4] sm:$0x1] }
 0x200   : > { %6187 = vperm.xlu1 %8615, %v7528_v57   ;;  %6192 = vperm.xlu0 %8614, %v7529_v49   ;;  %v7075_v57 = vld [vmem:[%s8899_s8 + $0x94] sm:$0xf]  ;;  %v2703_v9 = vshll.u32 %v7079_v28, 16 }
 0x201   : > { %7370 = vmatmul.mubr.msk.bf16.gmra.mrb[52].mxu0 %vm746_vm3, %v7352_v30  ;;  %v5079_v30 = vrot.slane %v7381_v17, 5  ;;  %v2673_v49 = vshrl.u32 %v7075_v57, 16  ;;  %v7080_v17 = vld [vmem:[%s8899_s8 + $0xa8] sm:$0xf] }
 0x202   : > { %4879 = vmatprep.mubr.bf16.mxu0 %v8766_v4  ;;  %v2708_v46 = vshrl.u32 %v7080_v17, 16  ;;  %v2711_v31 = vshll.u32 %v7080_v17, 16 }
 0x203   : > { %v5080_v34 = vsel %vm9144_vm7, %v5078_v19, %v5079_v30  ;;  %v2675_v40 = vrot.slane %v2673_v49, 4  ;;  %v2681_v19 = vrot.slane %v2679_v1, 5  ;;  %v7391_v49 = vld [vmem:[%s8899_s8 + $0x60] sm:$0xe] }
 0x204   : > { %6197 = vperm.xlu1 %8615, %v7530_v3   ;;  %6202 = vperm.xlu0 %8614, %v7531_v5   ;;  %v7440_v62 = vcombine.low %v5077_v39, %v5080_v34  ;;  %v2669_v3 = vshll.u32 %v7075_v57, 16  ;;  %v7385_v5 = vld [vmem:[%s8899_s8 + $0x48] sm:$0xe]  ;;  %v2700_v34 = vor.u32 %v2699_v51, %v10143_v25  ;;  %v2713_v53 = vrot.slane %v2711_v31, 5 }
 0x205   : > { %v7425_v10 = vrot.slane %v7385_v5, 9 }
 0x206   : > { %7034 = vmatmul.mubr.msk.bf16.gmra.mrb[36].mxu1 %vm746_vm3, %v8657_v23  ;;  %v5085_v23 = vrot.slane %v5083_v24, 4  ;;  %v10135_v54 = vrot.slane %v2669_v3, 5  ;;  %v7392_v24 = vld [vmem:[%s8899_s8 + $0x64] sm:$0xf]  ;;  %v2701_v38 = vrot.slane %v2700_v34, 4  ;;  %v2705_v3 = vrot.slane %v2703_v9, 5 }
 0x207   : > { %2222 = vmatprep.mubr.bf16.mxu1 %v8766_v4 }
 0x208   : > { %6207 = vperm.xlu1 %8615, %v7532_v20   ;;  %6212 = vperm.xlu0 %8614, %v7533_v58   ;;  %v5087_v20 = vsel %vm9144_vm7, %v5085_v23, %v5086_v48  ;;  %v2684_v58 = vshrl.u32 %v7077_v8, 16  ;;  %v2676_v15 = vor.u32 %v2675_v40, %v10135_v54  ;;  %v7427_v40 = vrot.slane %v7391_v49, 9  ;;  %v7397_v49 = vld [vmem:[%s8899_s8 + $0x78] sm:$0xe] }
 0x209   : > { %7371 = vmatmul.mubr.msk.bf16.gmra.mrb[56].mxu0 %vm746_vm3, %v7353_v47  ;;  %v8662_v47 = vld [vmem:[%s8899_s8 + $0xb4] sm:$0xff]   ;;  %v7441_v2 = vcombine.low %v5084_v55, %v5087_v20 }
 0x20a   : > { %4889 = vmatprep.mubr.bf16.mxu0 %v8766_v4  ;;  %v2677_v14 = vrot.slane %v2676_v15, 4  ;;  %v2745_v15 = vshrl.u32 %v7084_v32, 16 }
 0x20c   : > { %6217 = vperm.xlu1 %8615, %v7534_v33   ;;  %6222 = vperm.xlu0 %8614, %v7535_v50   ;;  %v7389_v33 = vld [vmem:[%s8899_s8 + $0x58] sm:$0xf]  ;;  %v2682_v23 = vsel %vm8924_vm4, %v2677_v14, %v2681_v19  ;;  %v7087_v14 = vld [vmem:[%s8899_s8 + $0xc4] sm:$0xf] }
 0x20d   : > { %v5097_v11 = vrot.slane %v7389_v33, 5 }
 0x20e   : > { %7035 = vmatmul.mubr.msk.bf16.gmra.mrb[40].mxu1 %vm746_vm3, %v8658_v7  ;;  %v7387_v7 = vld [vmem:[%s8899_s8 + $0x50] sm:$0x1] }
 0x20f   : > { %2232 = vmatprep.mubr.bf16.mxu1 %v8766_v4  ;;  %v5093_v50 = vrot.slane %v7387_v7, 5  ;;  %v5099_v30 = vrot.slane %v5097_v11, 4  ;;  %v5098_v48 = vsel %vm9144_vm7, %v7426_v16, %v5097_v11  ;;  %v7082_v7 = vld [vmem:[%s8899_s8 + $0xb0] sm:$0x1]  ;;  %v7085_v16 = vld [vmem:[%s8899_s8 + $0xbc] sm:$0x1] }
 0x210   : > { %6227 = vperm.xlu1 %8615, %v7536_v26   ;;  %v5092_v26 = vrot.slane %v5090_v12, 4 }
 0x211   : > { %7372 = vmatmul.mubr.msk.bf16.gmra.mrb[60].mxu0 %vm746_vm3, %v7354_v41  ;;  %v2687_v41 = vshll.u32 %v7077_v8, 16  ;;  %v5101_v60 = vsel %vm9144_vm7, %v5099_v30, %v5100_v13  ;;  %v2710_v8 = vrot.slane %v2708_v46, 4  ;;  %v7398_v46 = vld [vmem:[%s8899_s8 + $0x7c] sm:$0xf] }
 0x212   : > { %5317 = vmatprep.mubr.bf16.mxu0 %v8766_v4  ;;  %v5094_v44 = vsel %vm9144_vm7, %v5092_v26, %v5093_v50 }
 0x213   : > { %v2689_v61 = vrot.slane %v2687_v41, 5  ;;  %v2706_v41 = vsel %vm8924_vm4, %v2701_v38, %v2705_v3  ;;  %v2714_v59 = vor.u32 %v2713_v53, %v2710_v8 }
 0x215   : > { %v2715_v21 = vrot.slane %v2714_v59, 4  ;;  %v7401_v59 = vld [vmem:[%s8899_s8 + $0x88] sm:$0xf] }
 0x216   : > { %7036 = vmatmul.mubr.msk.bf16.gmra.mrb[44].mxu1 %vm746_vm3, %v8659_v36  ;;  %v2666_v36 = vor.u32 %v2665_v56, %v2662_v52  ;;  %v7443_v52 = vcombine.low %v5098_v48, %v5101_v60  ;;  %v7083_v56 = vld [vmem:[%s8899_s8 + $0xb4] sm:$0xf] }
 0x217   : > { %2242 = vmatprep.mubr.bf16.mxu1 %v8766_v4  ;;  %v2732_v26 = vshrl.u32 %v7083_v56, 16  ;;  %v2735_v50 = vshll.u32 %v7083_v56, 16  ;;  %v7429_v56 = vrot.slane %v7397_v49, 9 }
 0x218   : > { %v2667_v45 = vrot.slane %v2666_v36, 4  ;;  %v2741_v36 = vshll.u32 %v7084_v32, 16 }
 0x219   : > { %7456 = vmatmul.mubr.msk.bf16.vlgmr.msra.gmra.mrb[0].mxu0 %vm746_vm3, %v7438_v22  ;;  %v2686_v22 = vrot.slane %v2684_v58, 4 }
 0x21a   : > { %5327 = vmatprep.mubr.bf16.mxu0 %v8766_v4  ;;  %v2672_v29 = vsel %vm8924_vm4, %v2667_v45, %v10135_v54  ;;  %v2743_v28 = vrot.slane %v2741_v36, 5  ;;  %v2747_v45 = vrot.slane %v2745_v15, 4 }
 0x21b   : > { %v2690_v39 = vor.u32 %v2689_v61, %v2686_v22  ;;  %v7101_v5 = vcombine.low %v2672_v29, %v2682_v23  ;;  %v2769_v29 = vshrl.u32 %v7087_v14, 16 }
 0x21c   : > { %v2748_v9 = vor.u32 %v2747_v45, %v2743_v28 }
 0x21d   : > { %v2691_v63 = vrot.slane %v2690_v39, 4 }
 0x21e   : > { %7037 = vmatmul.mubr.msk.bf16.gmra.mrb[48].mxu1 %vm746_vm3, %v8660_v37  ;;  %v5091_v37 = vsel %vm9144_vm7, %v7425_v10, %v5090_v12  ;;  %v7393_v12 = vld [vmem:[%s8899_s8 + $0x68] sm:$0x1]  ;;  %v7395_v10 = vld [vmem:[%s8899_s8 + $0x70] sm:$0xf]  ;;  %v2749_v38 = vrot.slane %v2748_v9, 4 }
 0x21f   : > { %2252 = vmatprep.mubr.bf16.mxu1 %v8766_v4  ;;  %v2696_v54 = vsel %vm8924_vm4, %v2691_v63, %v10143_v25  ;;  %v5107_v58 = vrot.slane %v7393_v12, 5  ;;  %v7394_v25 = vld [vmem:[%s8899_s8 + $0x6c] sm:$0xe]  ;;  %v5111_v51 = vrot.slane %v7395_v10, 5  ;;  %v7399_v12 = vld [vmem:[%s8899_s8 + $0x80] sm:$0x1] }
 0x220   : > { %v7102_v1 = vcombine.low %v2696_v54, %v2706_v41  ;;  %v7428_v30 = vrot.slane %v7394_v25, 9  ;;  %v5121_v54 = vrot.slane %v7399_v12, 5  ;;  %v7408_v9 = vld [vmem:[%s8899_s8 + $0xa4] sm:$0x1]  ;;  %v7413_v12 = vld [vmem:[%s8899_s8 + $0xb8] sm:$0xf] }
 0x221   : > { %7457 = vmatmul.mubr.msk.bf16.gmra.mrb[4].mxu0 %vm746_vm3, %v7439_v35  ;;  %v7081_v35 = vld [vmem:[%s8899_s8 + $0xac] sm:$0xf]  ;;  %v5113_v13 = vrot.slane %v5111_v51, 4 }
 0x222   : > { %5337 = vmatprep.mubr.bf16.mxu0 %v8766_v4  ;;  %v2717_v57 = vshll.u32 %v7081_v35, 16  ;;  %v5112_v48 = vsel %vm9144_vm7, %v7428_v30, %v5111_v51  ;;  %v7407_v30 = vld [vmem:[%s8899_s8 + $0xa0] sm:$0xf] }
 0x224   : > { %v2719_v55 = vrot.slane %v2717_v57, 5 }
 0x226   : > { %7038 = vmatmul.mubr.msk.bf16.gmra.mrb[52].mxu1 %vm746_vm3, %v8661_v18  ;;  %v7442_v18 = vcombine.low %v5091_v37, %v5094_v44  ;;  %v2734_v37 = vrot.slane %v2732_v26, 4  ;;  %v2737_v44 = vrot.slane %v2735_v50, 5  ;;  %v2720_v19 = vsel %vm8924_vm4, %v2715_v21, %v2719_v55  ;;  %v7400_v26 = vld [vmem:[%s8899_s8 + $0x84] sm:$0xe] }
 0x227   : > { %2262 = vmatprep.mubr.bf16.mxu1 %v8766_v4  ;;  %v5125_v50 = vrot.slane %v7401_v59, 5  ;;  %v7430_v21 = vrot.slane %v7400_v26, 9  ;;  %v7417_v59 = vld [vmem:[%s8899_s8 + $0xc8] sm:$0x1] }
 0x228   : > { %v2738_v34 = vor.u32 %v2737_v44, %v2734_v37  ;;  %v5163_v26 = vrot.slane %v7417_v59, 5 }
 0x229   : > { %7458 = vmatmul.mubr.msk.bf16.gmra.mrb[8].mxu0 %vm746_vm3, %v7440_v62  ;;  %v2721_v62 = vshrl.u32 %v7081_v35, 16  ;;  %v7086_v35 = vld [vmem:[%s8899_s8 + $0xc0] sm:$0xf]  ;;  %v5126_v44 = vsel %vm9144_vm7, %v7430_v21, %v5125_v50 }
 0x22a   : > { %5347 = vmatprep.mubr.bf16.mxu0 %v8766_v4  ;;  %v2756_v31 = vshrl.u32 %v7086_v35, 16  ;;  %v2759_v57 = vshll.u32 %v7086_v35, 16  ;;  %v2739_v63 = vrot.slane %v2738_v34, 4  ;;  %v7406_v34 = vld [vmem:[%s8899_s8 + $0x9c] sm:$0xe] }
 0x22b   : > { %v2723_v20 = vrot.slane %v2721_v62, 4  ;;  %v2765_v62 = vshll.u32 %v7087_v14, 16 }
 0x22c   : > { %v2758_v8 = vrot.slane %v2756_v31, 4  ;;  %v2761_v53 = vrot.slane %v2759_v57, 5  ;;  %v5142_v57 = vrot.slane %v7408_v9, 5 }
 0x22d   : > { %v2724_v0 = vor.u32 %v2723_v20, %v2719_v55  ;;  %v2767_v55 = vrot.slane %v2765_v62, 5  ;;  %v2771_v20 = vrot.slane %v2769_v29, 4  ;;  %v7410_v62 = vld [vmem:[%s8899_s8 + $0xac] sm:$0xf] }
 0x22e   : > { %7039 = vmatmul.mubr.msk.bf16.gmra.mrb[56].mxu1 %vm746_vm3, %v8662_v47  ;;  %v5104_v47 = vrot.slane %v7392_v24, 5  ;;  %v2751_v24 = vshll.u32 %v7085_v16, 16  ;;  %v7403_v16 = vld [vmem:[%s8899_s8 + $0x90] sm:$0xe] }
 0x22f   : > { %2272 = vmatprep.mubr.bf16.mxu1 %v8766_v4  ;;  %v2725_v22 = vrot.slane %v2724_v0, 4  ;;  %v7431_v35 = vrot.slane %v7403_v16, 9 }
 0x230   : > { %v5106_v33 = vrot.slane %v5104_v47, 4  ;;  %v5105_v43 = vsel %vm9144_vm7, %v7427_v40, %v5104_v47  ;;  %v2753_v3 = vrot.slane %v2751_v24, 5  ;;  %v5118_v47 = vrot.slane %v7398_v46, 5 }
 0x231   : > { %7459 = vmatmul.mubr.msk.bf16.gmra.mrb[12].mxu0 %vm746_vm3, %v7441_v2  ;;  %v2727_v2 = vshll.u32 %v7082_v7, 16  ;;  %v7432_v46 = vrot.slane %v7406_v34, 9 }
 0x232   : > { %5357 = vmatprep.mubr.bf16.mxu0 %v8766_v4  ;;  %v5108_v11 = vsel %vm9144_vm7, %v5106_v33, %v5107_v58  ;;  %v5120_v32 = vrot.slane %v5118_v47, 4  ;;  %v2754_v40 = vsel %vm8924_vm4, %v2749_v38, %v2753_v3  ;;  %v2762_v33 = vor.u32 %v2761_v53, %v2758_v8 }
 0x233   : > { %v2729_v61 = vrot.slane %v2727_v2, 5  ;;  %v7444_v17 = vcombine.low %v5105_v43, %v5108_v11  ;;  %v2772_v58 = vor.u32 %v2771_v20, %v2767_v55  ;;  %v5119_v2 = vsel %vm9144_vm7, %v7429_v56, %v5118_v47  ;;  %v7402_v43 = vld [vmem:[%s8899_s8 + $0x8c] sm:$0x1]  ;;  %v7412_v20 = vld [vmem:[%s8899_s8 + $0xb4] sm:$0xe] }
 0x234   : > { %v5122_v10 = vsel %vm9144_vm7, %v5120_v32, %v5121_v54  ;;  %v2763_v36 = vrot.slane %v2762_v33, 4  ;;  %v7416_v54 = vld [vmem:[%s8899_s8 + $0xc4] sm:$0xf] }
 0x235   : > { %v2730_v39 = vsel %vm8924_vm4, %v2725_v22, %v2729_v61  ;;  %v2773_v15 = vrot.slane %v2772_v58, 4  ;;  %v7446_v11 = vcombine.low %v5119_v2, %v5122_v10  ;;  %v5127_v22 = vrot.slane %v5125_v50, 4  ;;  %v7419_v50 = vld [vmem:[%s8899_s8 + $0xd0] sm:$0xf] }
 0x236   : > { %7040 = vmatmul.mubr.msk.bf16.gmra.mrb[60].mxu1 %vm746_vm3, %v8663_v6  ;;  %v7396_v6 = vld [vmem:[%s8899_s8 + $0x74] sm:$0x1]  ;;  %v7103_v23 = vcombine.low %v2720_v19, %v2730_v39  ;;  %v5128_v61 = vrot.slane %v7402_v43, 5  ;;  %v2768_v25 = vsel %vm8924_vm4, %v2763_v36, %v2767_v55  ;;  %v5139_v39 = vrot.slane %v7407_v30, 5  ;;  %v7418_v43 = vld [vmem:[%s8899_s8 + $0xcc] sm:$0xe] }
 0x237   : > { %3034 = vmatprep.mubr.bf16.mxu1 %v8766_v4  ;;  %v5153_v55 = vrot.slane %v7413_v12, 5  ;;  %v5160_v58 = vrot.slane %v7416_v54, 5 }
 0x238   : > { %v5141_v31 = vrot.slane %v5139_v39, 4  ;;  %v5140_v29 = vsel %vm9144_vm7, %v7432_v46, %v5139_v39 }
 0x239   : > { %7460 = vmatmul.mubr.msk.bf16.gmra.mrb[16].mxu0 %vm746_vm3, %v7442_v18  ;;  %v5114_v18 = vrot.slane %v7396_v6, 5  ;;  %v7404_v6 = vld [vmem:[%s8899_s8 + $0x94] sm:$0xf]  ;;  %v5155_v56 = vrot.slane %v5153_v55, 4  ;;  %v5162_v10 = vrot.slane %v5160_v58, 4 }
 0x23a   : > { %5367 = vmatprep.mubr.bf16.mxu0 %v8766_v4  ;;  %v5132_v45 = vrot.slane %v7404_v6, 5 }
 0x23b   : > { %v5115_v60 = vsel %vm9144_vm7, %v5113_v13, %v5114_v18 }
 0x23c   : > { %v7445_v7 = vcombine.low %v5112_v48, %v5115_v60  ;;  %v5134_v14 = vrot.slane %v5132_v45, 4  ;;  %v5133_v13 = vsel %vm9144_vm7, %v7431_v35, %v5132_v45  ;;  %v5146_v48 = vrot.slane %v7410_v62, 5  ;;  %v7409_v60 = vld [vmem:[%s8899_s8 + $0xa8] sm:$0xe]  ;;  %v10307_v35 = vpop.permute.xlu1 %5787 }
 0x23d   : > { %v7433_v3 = vrot.slane %v7409_v60, 9 }
 0x23e   : > { %7119 = vmatmul.mubr.msk.bf16.vlgmr.msra.gmra.mrb[44].mxu1 %vm746_vm3, %v7101_v5  ;;  %v7088_v5 = vld [vmem:[%s8899_s8 + $0xc8] sm:$0x1]  ;;  %v5148_v49 = vrot.slane %v5146_v48, 4 }
 0x23f   : > { %3044 = vmatprep.mubr.bf16.mxu1 %v8766_v4  ;;  %v2775_v41 = vshll.u32 %v7088_v5, 16  ;;  %v5147_v8 = vsel %vm9144_vm7, %v7433_v3, %v5146_v48  ;;  %v7414_v5 = vld [vmem:[%s8899_s8 + $0xbc] sm:$0x1] }
 0x240   : > { %v5156_v32 = vrot.slane %v7414_v5, 5  ;;  %v10315_v30 = vpop.permute.xlu1 %5792 }
 0x241   : > { %7461 = vmatmul.mubr.msk.bf16.gmra.mrb[20].mxu0 %vm746_vm3, %v7443_v52  ;;  %v2744_v52 = vsel %vm8924_vm4, %v2739_v63, %v2743_v28  ;;  %v5129_v28 = vsel %vm9144_vm7, %v5127_v22, %v5128_v61  ;;  %v7411_v63 = vld [vmem:[%s8899_s8 + $0xb0] sm:$0x1]  ;;  %v7436_v22 = vrot.slane %v7418_v43, 9 }
 0x242   : > { %5377 = vmatprep.mubr.bf16.mxu0 %v8766_v4  ;;  %v7104_v0 = vcombine.low %v2744_v52, %v2754_v40  ;;  %v7447_v42 = vcombine.low %v5126_v44, %v5129_v28  ;;  %v5149_v47 = vrot.slane %v7411_v63, 5  ;;  %v7434_v52 = vrot.slane %v7412_v20, 9 }
 0x243   : > { %v5157_v33 = vsel %vm9144_vm7, %v5155_v56, %v5156_v32 }
 0x244   : > { %v5150_v53 = vsel %vm9144_vm7, %v5148_v49, %v5149_v47  ;;  %v5154_v40 = vsel %vm9144_vm7, %v7434_v52, %v5153_v55 }
 0x246   : > { %7120 = vmatmul.mubr.msk.bf16.gmra.mrb[48].mxu1 %vm746_vm3, %v7102_v1  ;;  %v2777_v1 = vrot.slane %v2775_v41, 5  ;;  %v7415_v41 = vld [vmem:[%s8899_s8 + $0xc0] sm:$0xe] }
 0x247   : > { %3054 = vmatprep.mubr.bf16.mxu1 %v8766_v4  ;;  %v7435_v2 = vrot.slane %v7415_v41, 9 }
 0x248   : > { %v2778_v51 = vsel %vm8924_vm4, %v2773_v15, %v2777_v1  ;;  %v5164_v15 = vsel %vm9144_vm7, %v5162_v10, %v5163_v26  ;;  %v5167_v1 = vrot.slane %v7419_v50, 5 }
 0x249   : > { %7462 = vmatmul.mubr.msk.bf16.gmra.mrb[24].mxu0 %vm746_vm3, %v7444_v17  ;;  %v7105_v37 = vcombine.low %v2768_v25, %v2778_v51  ;;  %v7405_v17 = vld [vmem:[%s8899_s8 + $0x98] sm:$0x1]  ;;  %v5161_v36 = vsel %vm9144_vm7, %v7435_v2, %v5160_v58 }
 0x24a   : > { %5387 = vmatprep.mubr.bf16.mxu0 %v8766_v4  ;;  %v5135_v19 = vrot.slane %v7405_v17, 5  ;;  %v7452_v21 = vcombine.low %v5161_v36, %v5164_v15  ;;  %v5169_v61 = vrot.slane %v5167_v1, 4  ;;  %v5168_v51 = vsel %vm9144_vm7, %v7436_v22, %v5167_v1  ;;  %v10301_v17 = vpop.permute.xlu0 %5777 }
 0x24c   : > { %v5136_v18 = vsel %vm9144_vm7, %v5134_v14, %v5135_v19 }
 0x24d   : > { %v7448_v24 = vcombine.low %v5133_v13, %v5136_v18 }
 0x24e   : > { %7121 = vmatmul.mubr.msk.bf16.gmra.mrb[52].mxu1 %vm746_vm3, %v7103_v23  ;;  %v5143_v23 = vsel %vm9144_vm7, %v5141_v31, %v5142_v57  ;;  %v10313_v19 = vpop.permute.xlu0 %5782 }
 0x24f   : > { %3064 = vmatprep.mubr.bf16.mxu1 %v8766_v4  ;;  %v7449_v38 = vcombine.low %v5140_v29, %v5143_v23 }
 0x251   : > { %7463 = vmatmul.mubr.msk.bf16.gmra.mrb[28].mxu0 %vm746_vm3, %v7445_v7  ;;  %v7450_v7 = vcombine.low %v5147_v8, %v5150_v53 }
 0x252   : > { %5397 = vmatprep.mubr.bf16.mxu0 %v8766_v4  ;;  %v10325_v9 = vpop.permute.xlu0 %5797 }
 0x256   : > { %7122 = vmatmul.mubr.msk.bf16.gmra.mrb[56].mxu1 %vm746_vm3, %v7104_v0  ;;  %v7451_v0 = vcombine.low %v5154_v40, %v5157_v33  ;;  %v10333_v57 = vpop.permute.xlu0 %5807 }
 0x257   : > { %3074 = vmatprep.mubr.bf16.mxu1 %v8766_v4 }
 0x259   : > { %7464 = vmatmul.mubr.msk.bf16.gmra.mrb[32].mxu0 %vm746_vm3, %v7446_v11  ;;  %v7420_v11 = vld [vmem:[%s8899_s8 + $0xd4] sm:$0x1]  ;;  %s237_s8 = sand.u32 1, %s8755_s27  }
 0x25a   : > { %5407 = vmatprep.mubr.bf16.mxu0 %v8766_v4  ;;  %v5170_v25 = vrot.slane %v7420_v11, 5  ;;  %v10341_v48 = vpop.permute.xlu0 %5817  ;;  %s10890_s9 = sshll.u32 %s237_s8, 7  ;;  %s10922_s18 = scalar_lea.sflag [#allocation5], %s237_s8 }
 0x25b   : > { %s10894_s14 = scalar_lea.vmem [#allocation4], %s10890_s9 }
 0x25c   : > { %v5171_v6 = vsel %vm9144_vm7, %v5169_v61, %v5170_v25  ;;  %s6772_s15 = sshll.u32 %s10894_s14, 4  ;;  %s10906_s15 = int_to_ptr.vmem [resolvable:$true] %s6772_s15 }
 0x25d   : > { %s8699_s20 = scalar_lea.vmem %s10906_s15, 2048  ;;  %p8706_p5 = scmp.lt.s32.totalorder %s10906_s15, %s8704_s22 }
 0x25e   : > { %7123 = vmatmul.mubr.msk.bf16.gmra.mrb[60].mxu1 %vm746_vm3, %v7105_v37  ;;  %v7453_v37 = vcombine.low %v5168_v51, %v5171_v6  ;;  %v10353_v47 = vpop.permute.xlu0 %5827  ;;  %p8700_p2 = scmp.ne.s32.totalorder %s10906_s15, %s8699_s20  ;;  %p8707_p6 = scmp.lt.s32.totalorder %s8705_s23, %s8699_s20 }
 0x260   : > { %p8701_p3 = pnand %p8700_p2, %p8849_p10  ;;  %p8708_p7 = por %p8707_p6, %p8706_p5 }
 0x261   : > { %7465 = vmatmul.mubr.msk.bf16.gmra.mrb[36].mxu0 %vm746_vm3, %v7447_v42 }
 0x262   : > { %5417 = vmatprep.mubr.bf16.mxu0 %v8766_v4  ;;  %v10365_v5 = vpop.permute.xlu0 %5837  ;;  %p8702_p4 = pneg %p8701_p3 }
 0x264   : > { %p8709_p8 = pnand %p8708_p7, %p8702_p4 }
 0x266   : > { %v10373_v32 = vpop.permute.xlu0 %5847 }
 0x269   : > { %7466 = vmatmul.mubr.msk.bf16.gmra.mrb[40].mxu0 %vm746_vm3, %v7448_v24  ;;  %v10327_v24 = vpop.permute.xlu1 %5802 }
 0x26a   : > { %5427 = vmatprep.mubr.bf16.mxu0 %v8766_v4  ;;  %v10381_v58 = vpop.permute.xlu0 %5857 }
 0x26b   : > { %10978 = vst [vmem:[#allocation8_spill] sm:$0xff] %v10381_v58 }
 0x26d   : > { %v10339_v23 = vpop.permute.xlu1 %5812 }
 0x26e   : > { %v10393_v26 = vpop.permute.xlu0 %5867 }
 0x26f   : > { %10980 = vst [vmem:[#allocation10_spill] sm:$0xff] %v10393_v26 }
 0x271   : > { %7467 = vmatmul.mubr.msk.bf16.gmra.mrb[44].mxu0 %vm746_vm3, %v7449_v38  ;;  %v10347_v38 = vpop.permute.xlu1 %5822 }
 0x272   : > { %5437 = vmatprep.mubr.bf16.mxu0 %v8766_v4  ;;  %v10405_v11 = vpop.permute.xlu0 %5877 }
 0x273   : > { %10985 = vst [vmem:[#allocation15_spill] sm:$0xff] %v10405_v11 }
 0x275   : > { %v10355_v12 = vpop.permute.xlu1 %5832 }
 0x276   : > { %v10413_v25 = vpop.permute.xlu0 %5887 }
 0x277   : > { %10989 = vst [vmem:[#allocation19_spill] sm:$0xff] %v10413_v25  ;;  %v6310_v25 = vld [vmem:[%s10968_s5] sm:$0xff] }
 0x279   : > { %7468 = vmatmul.mubr.msk.bf16.gmra.mrb[48].mxu0 %vm746_vm3, %v7450_v7  ;;  %v10367_v7 = vpop.permute.xlu1 %5842 }
 0x27a   : > { %5447 = vmatprep.mubr.bf16.mxu0 %v8766_v4  ;;  %v10427_v11 = vpop.permute.xlu0 %5897 }
 0x27b   : > { %10993 = vst [vmem:[#allocation23_spill] sm:$0xff] %v10427_v11 }
 0x27d   : > { %v10379_v33 = vpop.permute.xlu1 %5852 }
 0x281   : > { %7469 = vmatmul.mubr.msk.bf16.gmra.mrb[52].mxu0 %vm746_vm3, %v7451_v0  ;;  %v10387_v0 = vpop.permute.xlu1 %5862 }
 0x282   : > { %5457 = vmatprep.mubr.bf16.mxu0 %v8766_v4  ;;  %10979 = vst [vmem:[#allocation9_spill] sm:$0xff] %v10387_v0 }
 0x285   : > { %v10395_v50 = vpop.permute.xlu1 %5872 }
 0x286   : > { %10981 = vst [vmem:[#allocation11_spill] sm:$0xff] %v10395_v50  ;;  %v6326_v50 = vld [vmem:[%s10968_s5 + $0x80] sm:$0xff] }
 0x289   : > { %7470 = vmatmul.mubr.msk.bf16.gmra.mrb[56].mxu0 %vm746_vm3, %v7452_v21  ;;  %v10407_v21 = vpop.permute.xlu1 %5882 }
 0x28a   : > { %5467 = vmatprep.mubr.bf16.mxu0 %v8766_v4  ;;  %10986 = vst [vmem:[#allocation16_spill] sm:$0xff] %v10407_v21  ;;  %v6327_v21 = vld [vmem:[%s10968_s5 + $0x88] sm:$0xff] }
 0x291   : > { %7471 = vmatmul.mubr.msk.bf16.gmra.mrb[60].mxu0 %vm746_vm3, %v7453_v37  ;;  %v10293_v44 = vpop.f32.mrb[0].mxu1  ;;  %v10419_v37 = vpop.permute.xlu1 %5892 }
 0x292   : > { %v10295_v28 = vpop.f32.mrb[1].mxu1  ;;  %10992 = vst [vmem:[#allocation22_spill] sm:$0xff] %v10419_v37  ;;  %v6311_v37 = vld [vmem:[%s10968_s5 + $0x8] sm:$0xff] }
 0x293   : > { %v10297_v45 = vpop.f32.mrb[2].mxu1 }
 0x294   : > { %v10299_v16 = vpop.f32.mrb[3].mxu1 }
 0x299   : > { %v10303_v4 = vpop.f32.mrb[4].mxu1 }
 0x29a   : > { %v10305_v42 = vpop.f32.mrb[5].mxu1 }
 0x29b   : > { %v10309_v27 = vpop.f32.mrb[6].mxu1 }
 0x29c   : > { %v10311_v14 = vpop.f32.mrb[7].mxu1 }
 0x2a1   : > { %v10317_v13 = vpop.f32.mrb[8].mxu1 }
 0x2a2   : > { %v10319_v18 = vpop.f32.mrb[9].mxu1 }
 0x2a3   : > { %v10321_v39 = vpop.f32.mrb[10].mxu1 }
 0x2a4   : > { %v10323_v34 = vpop.f32.mrb[11].mxu1 }
 0x2a9   : > { %v10329_v46 = vpop.f32.mrb[12].mxu1 }
 0x2aa   : > { %v10331_v31 = vpop.f32.mrb[13].mxu1 }
 0x2ab   : > { %v10335_v62 = vpop.f32.mrb[14].mxu1 }
 0x2ac   : > { %v10337_v29 = vpop.f32.mrb[15].mxu1 }
 0x2b1   : > { %v10343_v60 = vpop.f32.mrb[16].mxu1 }
 0x2b2   : > { %v10345_v63 = vpop.f32.mrb[17].mxu1 }
 0x2b3   : > { %v10349_v3 = vpop.f32.mrb[18].mxu1 }
 0x2b4   : > { %v10351_v49 = vpop.f32.mrb[19].mxu1 }
 0x2b9   : > { %v10357_v8 = vpop.f32.mrb[20].mxu1 }
 0x2ba   : > { %v10359_v53 = vpop.f32.mrb[21].mxu1 }
 0x2bb   : > { %v10361_v55 = vpop.f32.mrb[22].mxu1 }
 0x2bc   : > { %v10363_v20 = vpop.f32.mrb[23].mxu1 }
 0x2c1   : > { %v10369_v52 = vpop.f32.mrb[24].mxu1 }
 0x2c2   : > { %v10371_v56 = vpop.f32.mrb[25].mxu1 }
 0x2c3   : > { %v10375_v54 = vpop.f32.mrb[26].mxu1 }
 0x2c4   : > { %v10377_v40 = vpop.f32.mrb[27].mxu1 }
 0x2c9   : > { %v10383_v41 = vpop.f32.mrb[28].mxu1 }
 0x2ca   : > { %v10385_v59 = vpop.f32.mrb[29].mxu1 }
 0x2cb   : > { %v10389_v2 = vpop.f32.mrb[30].mxu1 }
 0x2cc   : > { %v10391_v10 = vpop.f32.mrb[31].mxu1 }
 0x2d1   : > { %v10397_v36 = vpop.f32.mrb[32].mxu1 }
 0x2d2   : > { %v10399_v15 = vpop.f32.mrb[33].mxu1 }
 0x2d3   : > { %10982 = vst [vmem:[#allocation12_spill] sm:$0xff] %v10399_v15  ;;  %v10401_v1 = vpop.f32.mrb[34].mxu1 }
 0x2d4   : > { %10983 = vst [vmem:[#allocation13_spill] sm:$0xff] %v10401_v1  ;;  %v10403_v43 = vpop.f32.mrb[35].mxu1  ;;  %v6334_v1 = vld [vmem:[%s10968_s5 + $0xc0] sm:$0xff] }
 0x2d5   : > { %10984 = vst [vmem:[#allocation14_spill] sm:$0xff] %v10403_v43 }
 0x2d9   : > { %v10409_v22 = vpop.f32.mrb[36].mxu1 }
 0x2da   : > { %10987 = vst [vmem:[#allocation17_spill] sm:$0xff] %v10409_v22  ;;  %v10411_v61 = vpop.f32.mrb[37].mxu1  ;;  %v10439_v22 = vpop.permute.xlu1 %5902 }
 0x2db   : > { %10988 = vst [vmem:[#allocation18_spill] sm:$0xff] %v10411_v61  ;;  %v10415_v51 = vpop.f32.mrb[38].mxu1  ;;  %v7997_v61 = vpack.c.bf16 %v6327_v21, %v6326_v50  ;;  %10996 = vst [vmem:[#allocation26_spill] sm:$0xff] %v10439_v22  ;;  %v6328_v50 = vld [vmem:[%s10968_s5 + $0x90] sm:$0xff]  ;;  %v6329_v21 = vld [vmem:[%s10968_s5 + $0x98] sm:$0xff]  ;;  %v10457_v22 = vpop.permute.xlu0 %5907 }
 0x2dc   : > { %10990 = vst [vmem:[#allocation20_spill] sm:$0xff] %v10415_v51  ;;  %v10417_v6 = vpop.f32.mrb[39].mxu1  ;;  %v7999_v51 = vpack.c.bf16 %v6311_v37, %v6310_v25  ;;  %v6312_v25 = vld [vmem:[%s10968_s5 + $0x10] sm:$0xff]  ;;  %10999 = vst [vmem:[#allocation29_spill] sm:$0xff] %v10457_v22 }
 0x2dd   : > { %10991 = vst [vmem:[#allocation21_spill] sm:$0xff] %v10417_v6  ;;  %7998 = vmatprep.subr.bf16.mxu1 %v7997_v61  ;;  %v6313_v61 = vld [vmem:[%s10968_s5 + $0x18] sm:$0xff] }
 0x2de   : > { %8000 = vmatpush3.bf16.msra.mxu1 %v7999_v51  ;;  %v8003_v37 = vpack.c.bf16 %v6313_v61, %v6312_v25  ;;  %v6330_v51 = vld [vmem:[%s10968_s5 + $0xa0] sm:$0xff] }
 0x2e1   : > { %v10429_v26 = vpop.f32.mrb[40].mxu1 }
 0x2e2   : > { %10994 = vst [vmem:[#allocation24_spill] sm:$0xff] %v10429_v26  ;;  %v10437_v6 = vpop.f32.mrb[41].mxu1  ;;  %v8001_v26 = vpack.c.bf16 %v6329_v21, %v6328_v50  ;;  %v6331_v50 = vld [vmem:[%s10968_s5 + $0xa8] sm:$0xff]  ;;  %v10465_v21 = vpop.permute.xlu1 %5912 }
 0x2e3   : > { %10995 = vst [vmem:[#allocation25_spill] sm:$0xff] %v10437_v6  ;;  %v10441_v0 = vpop.f32.mrb[42].mxu1  ;;  %11000 = vst [vmem:[#allocation30_spill] sm:$0xff] %v10465_v21 }
 0x2e4   : > { %10997 = vst [vmem:[#allocation27_spill] sm:$0xff] %v10441_v0  ;;  %v10443_v11 = vpop.f32.mrb[43].mxu1  ;;  %8002 = vmatprep.subr.bf16.mxu1 %v8001_v26  ;;  %v6314_v0 = vld [vmem:[%s10968_s5 + $0x20] sm:$0xff]  ;;  %v6315_v26 = vld [vmem:[%s10968_s5 + $0x28] sm:$0xff] }
 0x2e5   : > { %10998 = vst [vmem:[#allocation28_spill] sm:$0xff] %v10443_v11  ;;  %8004 = vmatpush3.bf16.msra.mxu1 %v8003_v37  ;;  %v8005_v11 = vpack.c.bf16 %v6331_v50, %v6330_v51  ;;  %v8007_v25 = vpack.c.bf16 %v6315_v26, %v6314_v0  ;;  %v6332_v37 = vld [vmem:[%s10968_s5 + $0xb0] sm:$0xff]  ;;  %v6333_v51 = vld [vmem:[%s10968_s5 + $0xb8] sm:$0xff]  ;;  %v10479_v50 = vpop.permute.xlu0 %5917  ;;  %v10485_v0 = vld [vmem:[%s10967_s4] ss:$0 sm:$0xff] }
 0x2e6   : > { %11001 = vst [vmem:[#allocation31_spill] sm:$0xff] %v10479_v50  ;;  %v6316_v26 = vld [vmem:[%s10968_s5 + $0x30] sm:$0xff] }
 0x2e7   : > { %8006 = vmatprep.subr.bf16.mxu1 %v8005_v11  ;;  %v8009_v11 = vpack.c.bf16 %v6333_v51, %v6332_v37 }
 0x2e9   : > { %8008 = vmatpush3.bf16.msra.mxu1 %v8007_v25  ;;  %v6317_v25 = vld [vmem:[%s10968_s5 + $0x38] sm:$0xff] }
 0x2ea   : > { %v8011_v58 = vpack.c.bf16 %v6317_v25, %v6316_v26  ;;  %8010 = vmatprep.subr.bf16.mxu1 %v8009_v11  ;;  %v6336_v11 = vld [vmem:[%s10968_s5 + $0xd0] sm:$0xff] }
 0x2ec   : > { %v5319_v61 = vpop.f32.mrb[0].mxu0 }
 0x2ed   : > { %v8055_v21 = vadd.f32 %v5319_v61, %v10293_v44  ;;  %v5321_v22 = vpop.f32.mrb[1].mxu0  ;;  %v10494_v44 = vpop.permute.xlu1 %5922  ;;  %8012 = vmatpush3.bf16.msra.mxu1 %v8011_v58 }
 0x2ee   : > { %v8056_v6 = vadd.f32 %v5321_v22, %v10295_v28  ;;  %v5323_v50 = vpop.f32.mrb[2].mxu0  ;;  %11002 = vst [vmem:[#allocation32_spill] sm:$0xff] %v10494_v44  ;;  %v6335_v28 = vld [vmem:[%s10968_s5 + $0xc8] sm:$0xff] }
 0x2ef   : > { %v8057_v61 = vadd.f32 %v5323_v50, %v10297_v45  ;;  %v5325_v43 = vpop.f32.mrb[3].mxu0  ;;  %v8013_v26 = vpack.c.bf16 %v6335_v28, %v6334_v1  ;;  %v6318_v45 = vld [vmem:[%s10968_s5 + $0x40] sm:$0xff]  ;;  %v10517_v50 = vpop.permute.xlu0 %5927  ;;  %v6321_v28 = vld [vmem:[%s10968_s5 + $0x58] sm:$0xff] }
 0x2f0   : > { %v5743_v37 = vadd.f32 %v8056_v6, %v10485_v0  ;;  %v8058_v51 = vadd.f32 %v5325_v43, %v10299_v16  ;;  %v6319_v16 = vld [vmem:[%s10968_s5 + $0x48] sm:$0xff]  ;;  %11004 = vst [vmem:[#allocation34_spill] sm:$0xff] %v10517_v50 }
 0x2f1   : > { %v10505_v22 = vpack.c.bf16 %v8057_v61, %v8055_v21  ;;  %v8015_v6 = vpack.c.bf16 %v6319_v16, %v6318_v45  ;;  %8014 = vmatprep.subr.bf16.mxu1 %v8013_v26  ;;  %v10528_v25 = vpop.permute.xlu1 %5932 }
 0x2f2   : > { %v10514_v58 = vmul.f32 %v10301_v17, %v5743_v37  ;;  %v5744_v43 = vadd.f32 %v8058_v51, %v10485_v0  ;;  %v6337_v17 = vld [vmem:[%s10968_s5 + $0xd8] sm:$0xff]  ;;  %11005 = vst [vmem:[#allocation35_spill] sm:$0xff] %v10528_v25 }
 0x2f3   : > { %11003 = vst [vmem:[#allocation33_spill] sm:$0xff] %v10505_v22  ;;  %8016 = vmatpush3.bf16.msra.mxu1 %v8015_v6  ;;  %v8017_v51 = vpack.c.bf16 %v6337_v17, %v6336_v11  ;;  %v6338_v11 = vld [vmem:[%s10968_s5 + $0xe0] sm:$0xff]  ;;  %v6339_v17 = vld [vmem:[%s10968_s5 + $0xe8] sm:$0xff] }
 0x2f4   : > { %v10520_v21 = vmul.f32 %v10313_v19, %v5744_v43  ;;  %v5329_v1 = vpop.f32.mrb[4].mxu0  ;;  %v6320_v19 = vld [vmem:[%s10968_s5 + $0x50] sm:$0xff]  ;;  %v5967_v26 = vmax.f32 %v10514_v58, 0.0  ;;  %v6322_v58 = vld [vmem:[%s10968_s5 + $0x60] sm:$0xff] }
 0x2f5   : > { %v8059_v61 = vadd.f32 %v5329_v1, %v10303_v4  ;;  %v5331_v37 = vpop.f32.mrb[5].mxu0  ;;  %v8019_v6 = vpack.c.bf16 %v6321_v28, %v6320_v19  ;;  %8018 = vmatprep.subr.bf16.mxu1 %v8017_v51  ;;  %v6323_v51 = vld [vmem:[%s10968_s5 + $0x68] sm:$0xff]  ;;  %v6340_v19 = vld [vmem:[%s10968_s5 + $0xf0] sm:$0xff]  ;;  %v6341_v28 = vld [vmem:[%s10968_s5 + $0xf8] sm:$0xff]  ;;  %v6078_v44 = vpop.permute.xlu1 %6077 }
 0x2f6   : > { %v10971_v45 = vmax.f32 %v10520_v21, 0.0  ;;  %v8060_v16 = vadd.f32 %v5331_v37, %v10305_v42  ;;  %v5333_v43 = vpop.f32.mrb[6].mxu0  ;;  %v8025_v25 = vpack.c.bf16 %v6341_v28, %v6340_v19 }
 0x2f7   : > { %v8061_v4 = vadd.f32 %v5333_v43, %v10309_v27  ;;  %v5335_v1 = vpop.f32.mrb[7].mxu0  ;;  %8020 = vmatpush3.bf16.msra.mxu1 %v8019_v6  ;;  %v6073_v43 = vpop.permute.xlu0 %6072  ;;  %v6325_v6 = vld [vmem:[%s10968_s5 + $0x78] sm:$0xff] }
 0x2f8   : > { %v5999_v42 = vadd.f32 %v10971_v45, %v5967_v26  ;;  %v5745_v37 = vadd.f32 %v8060_v16, %v10485_v0  ;;  %v8062_v27 = vadd.f32 %v5335_v1, %v10311_v14  ;;  %v8021_v45 = vpack.c.bf16 %v6339_v17, %v6338_v11  ;;  %v6324_v14 = vld [vmem:[%s10968_s5 + $0x70] sm:$0xff] }
 0x2f9   : > { %v10563_v22 = vpack.c.bf16 %v8061_v4, %v8059_v61  ;;  %v8023_v16 = vpack.c.bf16 %v6323_v51, %v6322_v58  ;;  %v8027_v11 = vpack.c.bf16 %v6325_v6, %v6324_v14  ;;  %v8767_v14 = vmov 0.0|0.0  }
 0x2fa   : > { %v5937_v1 = vmul.f32 %v10307_v35, %v5745_v37  ;;  %v5746_v50 = vadd.f32 %v8062_v27, %v10485_v0  ;;  %8022 = vmatprep.subr.bf16.mxu1 %v8021_v45 }
 0x2fb   : > { %8024 = vmatpush3.bf16.msra.mxu1 %v8023_v16  ;;  %v6083_v27 = vpop.permute.xlu0 %6082  ;;  %v6088_v16 = vpop.permute.xlu1 %6087 }
 0x2fc   : > { %v5969_v15 = vmax.f32 %v5937_v1, 0.0  ;;  %v10574_v61 = vmul.f32 %v10315_v30, %v5746_v50  ;;  %v5339_v4 = vpop.f32.mrb[8].mxu0  ;;  %8026 = vmatprep.subr.bf16.mxu1 %v8025_v25 }
 0x2fd   : > { %v8063_v17 = vadd.f32 %v5339_v4, %v10317_v13  ;;  %v5341_v58 = vpop.f32.mrb[9].mxu0  ;;  %v10588_v4 = vadd.f32 %v6073_v43, %v5967_v26 }
 0x2fe   : > { %v6000_v51 = vadd.f32 %v5999_v42, %v5969_v15  ;;  %v5970_v19 = vmax.f32 %v10574_v61, 0.0  ;;  %v8064_v35 = vadd.f32 %v5341_v58, %v10319_v18  ;;  %v5343_v37 = vpop.f32.mrb[10].mxu0 }
 0x2ff   : > { %v8065_v45 = vadd.f32 %v5343_v37, %v10321_v39  ;;  %v5345_v28 = vpop.f32.mrb[11].mxu0  ;;  %8028 = vmatpush3.bf16.msra.mxu1 %v8027_v11  ;;  %v6093_v61 = vpop.permute.xlu0 %6092 }
 0x300   : > { %v6001_v1 = vadd.f32 %v6000_v51, %v5970_v19  ;;  %v5747_v30 = vadd.f32 %v8064_v35, %v10485_v0  ;;  %v8066_v50 = vadd.f32 %v5345_v28, %v10323_v34  ;;  %8029 = vmatprep.subr.bf16.mxu1 %v8767_v14  ;;  %v6098_v37 = vpop.permute.xlu1 %6097 }
 0x301   : > { %v10582_v13 = vpack.c.bf16 %v8065_v45, %v8063_v17  ;;  %v11006_v45 = vmax.f32 %v10520_v21, 0.0 }
 0x302   : > { %v5939_v25 = vmul.f32 %v10325_v9, %v5747_v30  ;;  %v5748_v42 = vadd.f32 %v8066_v50, %v10485_v0 }
 0x303   : > { %v10594_v28 = vadd.f32 %v6078_v44, %v11006_v45 }
 0x304   : > { %v5971_v18 = vmax.f32 %v5939_v25, 0.0  ;;  %v5940_v39 = vmul.f32 %v10327_v24, %v5748_v42  ;;  %v5349_v6 = vpop.f32.mrb[12].mxu0 }
 0x305   : > { %v8067_v34 = vadd.f32 %v5349_v6, %v10329_v46  ;;  %v5351_v11 = vpop.f32.mrb[13].mxu0 }
 0x306   : > { %v6002_v58 = vadd.f32 %v6001_v1, %v5971_v18  ;;  %v6234_v17 = vadd.f32 %v6093_v61, %v5971_v18  ;;  %v5972_v51 = vmax.f32 %v5940_v39, 0.0  ;;  %v8068_v9 = vadd.f32 %v5351_v11, %v10331_v31  ;;  %v5353_v35 = vpop.f32.mrb[14].mxu0 }
 0x307   : > { %v8069_v24 = vadd.f32 %v5353_v35, %v10335_v62  ;;  %v5355_v30 = vpop.f32.mrb[15].mxu0  ;;  %v6103_v62 = vpop.permute.xlu0 %6102 }
 0x308   : > { %v6262_v26 = vmax.f32 %v10588_v4, %v6234_v17  ;;  %v6003_v43 = vadd.f32 %v6002_v58, %v5972_v51  ;;  %v6235_v50 = vadd.f32 %v6098_v37, %v5972_v51  ;;  %v5749_v46 = vadd.f32 %v8068_v9, %v10485_v0  ;;  %v6108_v9 = vpop.permute.xlu1 %6107 }
 0x309   : > { %v10599_v1 = vpack.c.bf16 %v8069_v24, %v8067_v34  ;;  %v8070_v25 = vadd.f32 %v5355_v30, %v10337_v29  ;;  %v10607_v4 = vadd.f32 %v6083_v27, %v5969_v15  ;;  %v10617_v15 = vadd.f32 %v6088_v16, %v5970_v19 }
 0x30a   : > { %v6263_v31 = vmax.f32 %v10594_v28, %v6235_v50  ;;  %v5941_v42 = vmul.f32 %v10333_v57, %v5749_v46 }
 0x30b   : > { %v5750_v44 = vadd.f32 %v8070_v25, %v10485_v0  ;;  %v6113_v46 = vpop.permute.xlu0 %6112 }
 0x30c   : > { %v5973_v21 = vmax.f32 %v5941_v42, 0.0  ;;  %v5359_v18 = vpop.f32.mrb[16].mxu0 }
 0x30d   : > { %v5942_v39 = vmul.f32 %v10339_v23, %v5750_v44  ;;  %v8071_v6 = vadd.f32 %v5359_v18, %v10343_v60  ;;  %v5361_v61 = vpop.f32.mrb[17].mxu0 }
 0x30e   : > { %v6004_v34 = vadd.f32 %v6003_v43, %v5973_v21  ;;  %v10609_v11 = vadd.f32 %v6103_v62, %v5973_v21  ;;  %v8072_v29 = vadd.f32 %v5361_v61, %v10345_v63  ;;  %v5363_v58 = vpop.f32.mrb[18].mxu0 }
 0x30f   : > { %v5974_v17 = vmax.f32 %v5942_v39, 0.0  ;;  %v8073_v57 = vadd.f32 %v5363_v58, %v10349_v3  ;;  %v5365_v51 = vpop.f32.mrb[19].mxu0  ;;  %v6118_v39 = vpop.permute.xlu1 %6117 }
 0x310   : > { %v6264_v35 = vmax.f32 %v10607_v4, %v10609_v11  ;;  %v5751_v23 = vadd.f32 %v8072_v29, %v10485_v0  ;;  %v8074_v60 = vadd.f32 %v5365_v51, %v10351_v49 }
 0x311   : > { %v6005_v27 = vadd.f32 %v6004_v34, %v5974_v17  ;;  %v6237_v37 = vadd.f32 %v6108_v9, %v5974_v17  ;;  %v10619_v45 = vpack.c.bf16 %v8073_v57, %v8071_v6  ;;  %v10621_v63 = vpop.f32.mrb[44].mxu1 }
 0x312   : > { %v5943_v28 = vmul.f32 %v10341_v48, %v5751_v23  ;;  %v5752_v3 = vadd.f32 %v8074_v60, %v10485_v0  ;;  %v10625_v24 = vpop.f32.mrb[45].mxu1  ;;  %v6123_v60 = vpop.permute.xlu0 %6122 }
 0x313   : > { %v6265_v30 = vmax.f32 %v10617_v15, %v6237_v37  ;;  %v10628_v43 = vpop.f32.mrb[46].mxu1 }
 0x314   : > { %v5975_v50 = vmax.f32 %v5943_v28, 0.0  ;;  %v5944_v49 = vmul.f32 %v10347_v38, %v5752_v3  ;;  %v5369_v19 = vpop.f32.mrb[20].mxu0  ;;  %v10631_v16 = vpop.f32.mrb[47].mxu1 }
 0x315   : > { %v8075_v25 = vadd.f32 %v5369_v19, %v10357_v8  ;;  %v5371_v42 = vpop.f32.mrb[21].mxu0  ;;  %v6128_v19 = vpop.permute.xlu1 %6127 }
 0x316   : > { %v6006_v44 = vadd.f32 %v6005_v27, %v5975_v50  ;;  %v6238_v48 = vadd.f32 %v6113_v46, %v5975_v50  ;;  %v5976_v21 = vmax.f32 %v5944_v49, 0.0  ;;  %v8076_v18 = vadd.f32 %v5371_v42, %v10359_v53  ;;  %v5373_v62 = vpop.f32.mrb[22].mxu0 }
 0x317   : > { %v8077_v6 = vadd.f32 %v5373_v62, %v10361_v55  ;;  %v5375_v61 = vpop.f32.mrb[23].mxu0 }
 0x318   : > { %v10636_v4 = vmax.f32 %v6262_v26, %v6238_v48  ;;  %v6007_v38 = vadd.f32 %v6006_v44, %v5976_v21  ;;  %v6239_v34 = vadd.f32 %v6118_v39, %v5976_v21  ;;  %v5753_v11 = vadd.f32 %v8076_v18, %v10485_v0 }
 0x319   : > { %v10639_v29 = vpack.c.bf16 %v8077_v6, %v8075_v25  ;;  %v8078_v8 = vadd.f32 %v5375_v61, %v10363_v20  ;;  %v10642_v58 = vpop.f32.mrb[48].mxu1  ;;  %v6133_v61 = vpop.permute.xlu0 %6132 }
 0x31a   : > { %v10644_v17 = vmax.f32 %v6263_v31, %v6239_v34  ;;  %v5945_v53 = vmul.f32 %v10353_v47, %v5753_v11  ;;  %v10647_v57 = vpop.f32.mrb[49].mxu1 }
 0x31b   : > { %v5754_v55 = vadd.f32 %v8078_v8, %v10485_v0  ;;  %v10650_v26 = vpop.f32.mrb[50].mxu1 }
 0x31c   : > { %v5977_v51 = vmax.f32 %v5945_v53, 0.0  ;;  %v5379_v9 = vpop.f32.mrb[24].mxu0  ;;  %v10652_v23 = vpop.f32.mrb[51].mxu1 }
 0x31d   : > { %v5946_v15 = vmul.f32 %v10355_v12, %v5754_v55  ;;  %v8079_v20 = vadd.f32 %v5379_v9, %v10369_v52  ;;  %v5381_v27 = vpop.f32.mrb[25].mxu0 }
 0x31e   : > { %v6008_v31 = vadd.f32 %v6007_v38, %v5977_v51  ;;  %v6240_v37 = vadd.f32 %v6123_v60, %v5977_v51  ;;  %v8080_v47 = vadd.f32 %v5381_v27, %v10371_v56  ;;  %v5383_v28 = vpop.f32.mrb[26].mxu0 }
 0x31f   : > { %v5978_v3 = vmax.f32 %v5946_v15, 0.0  ;;  %v8081_v50 = vadd.f32 %v5383_v28, %v10375_v54  ;;  %v5385_v49 = vpop.f32.mrb[27].mxu0 }
 0x320   : > { %v10658_v46 = vmax.f32 %v6264_v35, %v6240_v37  ;;  %v5755_v25 = vadd.f32 %v8080_v47, %v10485_v0  ;;  %v8082_v42 = vadd.f32 %v5385_v49, %v10377_v40  ;;  %v6143_v49 = vpop.permute.xlu0 %6142 }
 0x321   : > { %v6009_v12 = vadd.f32 %v6008_v31, %v5978_v3  ;;  %v6241_v44 = vadd.f32 %v6128_v19, %v5978_v3  ;;  %v10662_v52 = vpack.c.bf16 %v8081_v50, %v8079_v20  ;;  %v10664_v48 = vpop.f32.mrb[52].mxu1 }
 0x322   : > { %v5947_v56 = vmul.f32 %v10365_v5, %v5755_v25  ;;  %v5756_v21 = vadd.f32 %v8082_v42, %v10485_v0  ;;  %v10668_v18 = vpop.f32.mrb[53].mxu1 }
 0x323   : > { %v10670_v54 = vmax.f32 %v6265_v30, %v6241_v44  ;;  %v10672_v35 = vpop.f32.mrb[54].mxu1  ;;  %v6138_v30 = vpop.permute.xlu1 %6137 }
 0x324   : > { %v5979_v62 = vmax.f32 %v5947_v56, 0.0  ;;  %v5948_v39 = vmul.f32 %v10367_v7, %v5756_v21  ;;  %v5389_v40 = vpop.f32.mrb[28].mxu0  ;;  %v10675_v6 = vpop.f32.mrb[55].mxu1  ;;  %v11008_v21 = vld [vmem:[#allocation13_spill] sm:$0xff] }
 0x325   : > { %v8083_v38 = vadd.f32 %v5389_v40, %v10383_v41  ;;  %v5391_v34 = vpop.f32.mrb[29].mxu0 }
 0x326   : > { %v6010_v11 = vadd.f32 %v6009_v12, %v5979_v62  ;;  %v6242_v5 = vadd.f32 %v6133_v61, %v5979_v62  ;;  %v5980_v8 = vmax.f32 %v5948_v39, 0.0  ;;  %v8084_v53 = vadd.f32 %v5391_v34, %v10385_v59  ;;  %v5393_v55 = vpop.f32.mrb[30].mxu0  ;;  %v11007_v12 = vld [vmem:[#allocation12_spill] sm:$0xff]  ;;  %v11009_v34 = vld [vmem:[#allocation14_spill] sm:$0xff] }
 0x327   : > { %v8085_v51 = vadd.f32 %v5393_v55, %v10389_v2  ;;  %v5395_v9 = vpop.f32.mrb[31].mxu0  ;;  %v6148_v40 = vpop.permute.xlu1 %6147 }
 0x328   : > { %v6270_v60 = vmax.f32 %v10636_v4, %v6242_v5  ;;  %v6011_v7 = vadd.f32 %v6010_v11, %v5980_v8  ;;  %v6243_v15 = vadd.f32 %v6138_v30, %v5980_v8  ;;  %v5757_v20 = vadd.f32 %v8084_v53, %v10485_v0  ;;  %v11010_v53 = vld [vmem:[#allocation8_spill] sm:$0xff] }
 0x329   : > { %v10682_v27 = vpack.c.bf16 %v8085_v51, %v8083_v38  ;;  %v8086_v41 = vadd.f32 %v5395_v9, %v10391_v10  ;;  %v10685_v31 = vpop.f32.mrb[56].mxu1 }
 0x32a   : > { %v6271_v37 = vmax.f32 %v10644_v17, %v6243_v15  ;;  %v5949_v59 = vmul.f32 %v10373_v32, %v5757_v20  ;;  %v10689_v47 = vpop.f32.mrb[57].mxu1  ;;  %v11011_v15 = vld [vmem:[#allocation9_spill] sm:$0xff] }
 0x32b   : > { %v5758_v2 = vadd.f32 %v8086_v41, %v10485_v0  ;;  %v10692_v28 = vpop.f32.mrb[58].mxu1 }
 0x32c   : > { %v5981_v4 = vmax.f32 %v5949_v59, 0.0  ;;  %v5399_v3 = vpop.f32.mrb[32].mxu0  ;;  %v10694_v50 = vpop.f32.mrb[59].mxu1 }
 0x32d   : > { %v5950_v19 = vmul.f32 %v10379_v33, %v5758_v2  ;;  %v8087_v10 = vadd.f32 %v5399_v3, %v10397_v36  ;;  %v5401_v25 = vpop.f32.mrb[33].mxu0  ;;  %v6153_v2 = vpop.permute.xlu0 %6152 }
 0x32e   : > { %v6012_v42 = vadd.f32 %v6011_v7, %v5981_v4  ;;  %v6244_v17 = vadd.f32 %v6143_v49, %v5981_v4  ;;  %v8088_v32 = vadd.f32 %v5401_v25, %v11007_v12  ;;  %v5403_v44 = vpop.f32.mrb[34].mxu0  ;;  %v11012_v4 = vld [vmem:[#allocation17_spill] sm:$0xff] }
 0x32f   : > { %v5982_v56 = vmax.f32 %v5950_v19, 0.0  ;;  %v8089_v62 = vadd.f32 %v5403_v44, %v11008_v21  ;;  %v5405_v39 = vpop.f32.mrb[35].mxu0 }
 0x330   : > { %v6272_v61 = vmax.f32 %v10658_v46, %v6244_v17  ;;  %v5759_v38 = vadd.f32 %v8088_v32, %v10485_v0  ;;  %v8090_v11 = vadd.f32 %v5405_v39, %v11009_v34  ;;  %v6158_v32 = vpop.permute.xlu1 %6157  ;;  %v11015_v34 = vld [vmem:[#allocation21_spill] sm:$0xff] }
 0x331   : > { %v6013_v33 = vadd.f32 %v6012_v42, %v5982_v56  ;;  %v6245_v5 = vadd.f32 %v6148_v40, %v5982_v56  ;;  %v10703_v36 = vpack.c.bf16 %v8089_v62, %v8087_v10  ;;  %v10705_v8 = vpop.f32.mrb[60].mxu1  ;;  %v11013_v42 = vld [vmem:[#allocation18_spill] sm:$0xff] }
 0x332   : > { %v5951_v55 = vmul.f32 %v11010_v53, %v5759_v38  ;;  %v5760_v30 = vadd.f32 %v8090_v11, %v10485_v0  ;;  %v10709_v51 = vpop.f32.mrb[61].mxu1 }
 0x333   : > { %v6273_v9 = vmax.f32 %v10670_v54, %v6245_v5  ;;  %v10712_v7 = vpop.f32.mrb[62].mxu1  ;;  %v11014_v54 = vld [vmem:[#allocation20_spill] sm:$0xff]  ;;  %v11016_v5 = vld [vmem:[#allocation10_spill] sm:$0xff] }
 0x334   : > { %v5983_v46 = vmax.f32 %v5951_v55, 0.0  ;;  %v5952_v20 = vmul.f32 %v11011_v15, %v5760_v30  ;;  %v5409_v41 = vpop.f32.mrb[36].mxu0  ;;  %v10715_v59 = vpop.f32.mrb[63].mxu1 }
 0x335   : > { %v8091_v3 = vadd.f32 %v5409_v41, %v11012_v4  ;;  %v5411_v49 = vpop.f32.mrb[37].mxu0  ;;  %v6163_v15 = vpop.permute.xlu0 %6162  ;;  %v11018_v41 = vld [vmem:[#allocation24_spill] sm:$0xff] }
 0x336   : > { %v6014_v19 = vadd.f32 %v6013_v33, %v5983_v46  ;;  %v6246_v10 = vadd.f32 %v6153_v2, %v5983_v46  ;;  %v5984_v25 = vmax.f32 %v5952_v20, 0.0  ;;  %v8092_v17 = vadd.f32 %v5411_v49, %v11013_v42  ;;  %v5413_v12 = vpop.f32.mrb[38].mxu0  ;;  %v11017_v20 = vld [vmem:[#allocation11_spill] sm:$0xff] }
 0x337   : > { %v8093_v44 = vadd.f32 %v5413_v12, %v11014_v54  ;;  %v5415_v56 = vpop.f32.mrb[39].mxu0 }
 0x338   : > { %v10720_v21 = vmax.f32 %v6270_v60, %v6246_v10  ;;  %v6015_v62 = vadd.f32 %v6014_v19, %v5984_v25  ;;  %v6247_v39 = vadd.f32 %v6158_v32, %v5984_v25  ;;  %v5761_v40 = vadd.f32 %v8092_v17, %v10485_v0  ;;  %v6168_v32 = vpop.permute.xlu1 %6167 }
 0x339   : > { %v10723_v38 = vpack.c.bf16 %v8093_v44, %v8091_v3  ;;  %v8094_v11 = vadd.f32 %v5415_v56, %v11015_v34  ;;  %v11019_v3 = vld [vmem:[#allocation25_spill] sm:$0xff]  ;;  %v11021_v56 = vld [vmem:[#allocation28_spill] sm:$0xff] }
 0x33a   : > { %v10726_v33 = vmax.f32 %v6271_v37, %v6247_v39  ;;  %v5953_v53 = vmul.f32 %v11016_v5, %v5761_v40  ;;  %v11020_v37 = vld [vmem:[#allocation27_spill] sm:$0xff] }
 0x33b   : > { %v5762_v55 = vadd.f32 %v8094_v11, %v10485_v0 }
 0x33c   : > { %v5985_v30 = vmax.f32 %v5953_v53, 0.0  ;;  %v5419_v46 = vpop.f32.mrb[40].mxu0 }
 0x33d   : > { %v5954_v60 = vmul.f32 %v11017_v20, %v5762_v55  ;;  %v8095_v2 = vadd.f32 %v5419_v46, %v11018_v41  ;;  %v5421_v4 = vpop.f32.mrb[41].mxu0  ;;  %v11023_v46 = vld [vmem:[#allocation16_spill] sm:$0xff] }
 0x33e   : > { %v6016_v49 = vadd.f32 %v6015_v62, %v5985_v30  ;;  %v6248_v19 = vadd.f32 %v6163_v15, %v5985_v30  ;;  %v8096_v10 = vadd.f32 %v5421_v4, %v11019_v3  ;;  %v5423_v25 = vpop.f32.mrb[42].mxu0  ;;  %v11022_v62 = vld [vmem:[#allocation15_spill] sm:$0xff] }
 0x33f   : > { %v5986_v42 = vmax.f32 %v5954_v60, 0.0  ;;  %v8097_v17 = vadd.f32 %v5423_v25, %v11020_v37  ;;  %v5425_v12 = vpop.f32.mrb[43].mxu0 }
 0x340   : > { %v10734_v54 = vmax.f32 %v6272_v61, %v6248_v19  ;;  %v5763_v44 = vadd.f32 %v8096_v10, %v10485_v0  ;;  %v8098_v39 = vadd.f32 %v5425_v12, %v11021_v56  ;;  %v6173_v61 = vpop.permute.xlu0 %6172  ;;  %v6178_v10 = vpop.permute.xlu1 %6177  ;;  %v11024_v56 = vld [vmem:[#allocation19_spill] sm:$0xff] }
 0x341   : > { %v6017_v40 = vadd.f32 %v6016_v49, %v5986_v42  ;;  %v6249_v34 = vadd.f32 %v6168_v32, %v5986_v42  ;;  %v10738_v11 = vpack.c.bf16 %v8097_v17, %v8095_v2 }
 0x342   : > { %v5955_v5 = vmul.f32 %v11022_v62, %v5763_v44  ;;  %v5764_v53 = vadd.f32 %v8098_v39, %v10485_v0  ;;  %v11025_v62 = vld [vmem:[#allocation22_spill] sm:$0xff] }
 0x343   : > { %v10742_v55 = vmax.f32 %v6273_v9, %v6249_v34 }
 0x344   : > { %v5987_v30 = vmax.f32 %v5955_v5, 0.0  ;;  %v5956_v15 = vmul.f32 %v11023_v46, %v5764_v53  ;;  %v5429_v20 = vpop.f32.mrb[44].mxu0 }
 0x345   : > { %v8099_v60 = vadd.f32 %v5429_v20, %v10621_v63  ;;  %v5431_v41 = vpop.f32.mrb[45].mxu0 }
 0x346   : > { %v6018_v4 = vadd.f32 %v6017_v40, %v5987_v30  ;;  %v6250_v19 = vadd.f32 %v6173_v61, %v5987_v30  ;;  %v5988_v49 = vmax.f32 %v5956_v15, 0.0  ;;  %v8100_v2 = vadd.f32 %v5431_v41, %v10625_v24  ;;  %v5433_v3 = vpop.f32.mrb[46].mxu0 }
 0x347   : > { %v8101_v25 = vadd.f32 %v5433_v3, %v10628_v43  ;;  %v5435_v42 = vpop.f32.mrb[47].mxu0  ;;  %v6183_v43 = vpop.permute.xlu0 %6182  ;;  %v11026_v3 = vld [vmem:[#allocation23_spill] sm:$0xff] }
 0x348   : > { %v6278_v9 = vmax.f32 %v10720_v21, %v6250_v19  ;;  %v6019_v37 = vadd.f32 %v6018_v4, %v5988_v49  ;;  %v6251_v17 = vadd.f32 %v6178_v10, %v5988_v49  ;;  %v5765_v12 = vadd.f32 %v8100_v2, %v10485_v0 }
 0x349   : > { %v10750_v32 = vpack.c.bf16 %v8101_v25, %v8099_v60  ;;  %v8102_v63 = vadd.f32 %v5435_v42, %v10631_v16  ;;  %v6188_v60 = vpop.permute.xlu1 %6187  ;;  %v11027_v42 = vld [vmem:[#allocation26_spill] sm:$0xff] }
 0x34a   : > { %v6279_v44 = vmax.f32 %v10726_v33, %v6251_v17  ;;  %v5957_v39 = vmul.f32 %v11024_v56, %v5765_v12 }
 0x34b   : > { %v5766_v24 = vadd.f32 %v8102_v63, %v10485_v0 }
 0x34c   : > { %v5989_v40 = vmax.f32 %v5957_v39, 0.0  ;;  %v5439_v34 = vpop.f32.mrb[48].mxu0 }
 0x34d   : > { %v5958_v5 = vmul.f32 %v11025_v62, %v5766_v24  ;;  %v8103_v21 = vadd.f32 %v5439_v34, %v10642_v58  ;;  %v5441_v53 = vpop.f32.mrb[49].mxu0  ;;  %v6198_v34 = vpop.permute.xlu1 %6197 }
 0x34e   : > { %v6020_v30 = vadd.f32 %v6019_v37, %v5989_v40  ;;  %v6252_v46 = vadd.f32 %v6183_v43, %v5989_v40  ;;  %v8104_v15 = vadd.f32 %v5441_v53, %v10647_v57  ;;  %v5443_v20 = vpop.f32.mrb[50].mxu0 }
 0x34f   : > { %v5990_v16 = vmax.f32 %v5958_v5, 0.0  ;;  %v8105_v33 = vadd.f32 %v5443_v20, %v10650_v26  ;;  %v5445_v61 = vpop.f32.mrb[51].mxu0 }
 0x350   : > { %v6280_v41 = vmax.f32 %v10734_v54, %v6252_v46  ;;  %v5767_v4 = vadd.f32 %v8104_v15, %v10485_v0  ;;  %v8106_v19 = vadd.f32 %v5445_v61, %v10652_v23  ;;  %v6193_v54 = vpop.permute.xlu0 %6192  ;;  %v11028_v15 = vld [vmem:[#allocation29_spill] sm:$0xff] }
 0x351   : > { %v6021_v49 = vadd.f32 %v6020_v30, %v5990_v16  ;;  %v6253_v2 = vadd.f32 %v6188_v60, %v5990_v16  ;;  %v10763_v58 = vpack.c.bf16 %v8105_v33, %v8103_v21 }
 0x352   : > { %v5959_v10 = vmul.f32 %v11026_v3, %v5767_v4  ;;  %v5768_v57 = vadd.f32 %v8106_v19, %v10485_v0 }
 0x353   : > { %v6281_v25 = vmax.f32 %v10742_v55, %v6253_v2 }
 0x354   : > { %v5991_v26 = vmax.f32 %v5959_v10, 0.0  ;;  %v5960_v37 = vmul.f32 %v11027_v42, %v5768_v57  ;;  %v5449_v17 = vpop.f32.mrb[52].mxu0  ;;  %v6203_v61 = vpop.permute.xlu0 %6202  ;;  %v5735_v57 = vstv %s5734_s30 }
 0x355   : > { %v8107_v12 = vadd.f32 %v5449_v17, %v10664_v48  ;;  %v5451_v63 = vpop.f32.mrb[53].mxu0  ;;  %8664 = vrsqrt.f32 %v5735_v57  ;;  %vm6301_vm8 = vcmp.eq.f32.partialorder %v5735_v57, inf  ;;  %vm6303_vm9 = vcmp.eq.f32.partialorder %v5735_v57, 0.0 }
 0x356   : > { %v6022_v23 = vadd.f32 %v6021_v49, %v5991_v26  ;;  %v6254_v56 = vadd.f32 %v6193_v54, %v5991_v26  ;;  %v5992_v39 = vmax.f32 %v5960_v37, 0.0  ;;  %v8108_v24 = vadd.f32 %v5451_v63, %v10668_v18  ;;  %v5453_v40 = vpop.f32.mrb[54].mxu0  ;;  %v6208_v26 = vpop.permute.xlu1 %6207  ;;  %v11030_v63 = vld [vmem:[#allocation31_spill] sm:$0xff] }
 0x357   : > { %v8109_v43 = vadd.f32 %v5453_v40, %v10672_v35  ;;  %v5455_v62 = vpop.f32.mrb[55].mxu0  ;;  %v11029_v35 = vld [vmem:[#allocation30_spill] sm:$0xff]  ;;  %8666 = vrcp.f32 %v5735_v57 }
 0x358   : > { %v6282_v55 = vmax.f32 %v6278_v9, %v6254_v56  ;;  %v6023_v5 = vadd.f32 %v6022_v23, %v5992_v39  ;;  %v6255_v21 = vadd.f32 %v6198_v34, %v5992_v39  ;;  %v5769_v53 = vadd.f32 %v8108_v24, %v10485_v0  ;;  %v6213_v34 = vpop.permute.xlu0 %6212 }
 0x359   : > { %v10774_v30 = vpack.c.bf16 %v8109_v43, %v8107_v12  ;;  %v8110_v48 = vadd.f32 %v5455_v62, %v10675_v6 }
 0x35a   : > { %v6283_v46 = vmax.f32 %v6279_v44, %v6255_v21  ;;  %v5961_v20 = vmul.f32 %v11028_v15, %v5769_v53 }
 0x35b   : > { %v5770_v18 = vadd.f32 %v8110_v48, %v10485_v0  ;;  %v6218_v48 = vpop.permute.xlu1 %6217 }
 0x35c   : > { %v5993_v16 = vmax.f32 %v5961_v20, 0.0  ;;  %v5459_v33 = vpop.f32.mrb[56].mxu0 }
 0x35d   : > { %v5962_v60 = vmul.f32 %v11029_v35, %v5770_v18  ;;  %v8111_v9 = vadd.f32 %v5459_v33, %v10685_v31  ;;  %v5461_v4 = vpop.f32.mrb[57].mxu0 }
 0x35e   : > { %v6024_v19 = vadd.f32 %v6023_v5, %v5993_v16  ;;  %v6256_v49 = vadd.f32 %v6203_v61, %v5993_v16  ;;  %v8112_v2 = vadd.f32 %v5461_v4, %v10689_v47  ;;  %v5463_v3 = vpop.f32.mrb[58].mxu0 }
 0x35f   : > { %v5994_v10 = vmax.f32 %v5962_v60, 0.0  ;;  %v8113_v6 = vadd.f32 %v5463_v3, %v10692_v28  ;;  %v5465_v44 = vpop.f32.mrb[59].mxu0  ;;  %v11031_v28 = vld [vmem:[#allocation32_spill] sm:$0xff]  ;;  %v11032_v60 = vld [vmem:[#allocation34_spill] sm:$0xff] }
 0x360   : > { %v6284_v42 = vmax.f32 %v6280_v41, %v6256_v49  ;;  %v5771_v37 = vadd.f32 %v8112_v2, %v10485_v0  ;;  %v8114_v17 = vadd.f32 %v5465_v44, %v10694_v50  ;;  %v6223_v2 = vpop.permute.xlu0 %6222 }
 0x361   : > { %v6025_v54 = vadd.f32 %v6024_v19, %v5994_v10  ;;  %v6257_v12 = vadd.f32 %v6208_v26, %v5994_v10  ;;  %v10785_v31 = vpack.c.bf16 %v8113_v6, %v8111_v9  ;;  %v6228_v26 = vpop.permute.xlu1 %6227 }
 0x362   : > { %v5963_v23 = vmul.f32 %v11030_v63, %v5771_v37  ;;  %v5772_v47 = vadd.f32 %v8114_v17, %v10485_v0 }
 0x363   : > { %v6285_v56 = vmax.f32 %v6281_v25, %v6257_v12 }
 0x364   : > { %v5995_v39 = vmax.f32 %v5963_v23, 0.0  ;;  %v5964_v24 = vmul.f32 %v11031_v28, %v5772_v47  ;;  %v5469_v40 = vpop.f32.mrb[60].mxu0 }
 0x365   : > { %v8115_v41 = vadd.f32 %v5469_v40, %v10705_v8  ;;  %v5471_v43 = vpop.f32.mrb[61].mxu0 }
 0x366   : > { %v6026_v62 = vadd.f32 %v6025_v54, %v5995_v39  ;;  %v6258_v50 = vadd.f32 %v6213_v34, %v5995_v39  ;;  %v5996_v5 = vmax.f32 %v5964_v24, 0.0  ;;  %v8116_v21 = vadd.f32 %v5471_v43, %v10709_v51  ;;  %v5473_v53 = vpop.f32.mrb[62].mxu0  ;;  %v8665_v51 = vpop.eup %8664 }
 0x367   : > { %v8117_v15 = vadd.f32 %v5473_v53, %v10712_v7  ;;  %v5475_v20 = vpop.f32.mrb[63].mxu0  ;;  %v11033_v7 = vld [vmem:[#allocation35_spill] sm:$0xff]  ;;  %v6300_v44 = vmul.f32 %v8665_v51, %v5735_v57  ;;  %v6352_v51 = vld [vmem:[%s10968_s5 + $0x150] sm:$0xff] }
 0x368   : > { %v6286_v18 = vmax.f32 %v6282_v55, %v6258_v50  ;;  %v6027_v25 = vadd.f32 %v6026_v62, %v5996_v5  ;;  %v6259_v16 = vadd.f32 %v6218_v48, %v5996_v5  ;;  %v5773_v33 = vadd.f32 %v8116_v21, %v10485_v0  ;;  %v6342_v62 = vld [vmem:[%s10968_s5 + $0x100] sm:$0xff]  ;;  %v6344_v21 = vld [vmem:[%s10968_s5 + $0x110] sm:$0xff]  ;;  %v6345_v53 = vld [vmem:[%s10968_s5 + $0x118] sm:$0xff] }
 0x369   : > { %v10794_v61 = vpack.c.bf16 %v8117_v15, %v8115_v41  ;;  %v8118_v8 = vadd.f32 %v5475_v20, %v10715_v59  ;;  %v8667_v41 = vpop.eup %8666  ;;  %v8033_v48 = vpack.c.bf16 %v6345_v53, %v6344_v21  ;;  %v8769_v15 = vmov 0.0   ;;  %v6346_v20 = vld [vmem:[%s10968_s5 + $0x120] sm:$0xff] }
 0x36a   : > { %v6287_v35 = vmax.f32 %v6283_v46, %v6259_v16  ;;  %v5965_v9 = vmul.f32 %v11032_v60, %v5773_v33  ;;  %v6304_v46 = vand.u32 2147483648, %v5735_v57  ;;  %v6348_v16 = vld [vmem:[%s10968_s5 + $0x130] sm:$0xff]  ;;  %v6349_v33 = vld [vmem:[%s10968_s5 + $0x138] sm:$0xff]  ;;  %v6351_v60 = vld [vmem:[%s10968_s5 + $0x148] sm:$0xff]  ;;  %v7756_v21 = vunpack.c.h.bf16 %v10703_v36 }
 0x36b   : > { %v5774_v4 = vadd.f32 %v8118_v8, %v10485_v0  ;;  %v6302_v0 = vsel %vm6301_vm8, %v5735_v57, %v6300_v44  ;;  %v8039_v8 = vpack.c.bf16 %v6349_v33, %v6348_v16  ;;  %v6357_v44 = vld [vmem:[%s10968_s5 + $0x178] sm:$0xff]  ;;  %v7775_v16 = vunpack.c.l.bf16 %v10774_v30 }
 0x36c   : > { %v6290_v19 = vmax.f32 %v6286_v18, %v6287_v35  ;;  %v5997_v49 = vmax.f32 %v5965_v9, 0.0  ;;  %v6305_v47 = vsel %vm6303_vm9, %v6304_v46, %v6302_v0  ;;  %v6347_v18 = vld [vmem:[%s10968_s5 + $0x128] sm:$0xff]  ;;  %v6350_v35 = vld [vmem:[%s10968_s5 + $0x140] sm:$0xff]  ;;  %v6562_v0 = vlaneseq }
 0x36d   : > { %v5966_v3 = vmul.f32 %v11033_v7, %v5774_v4  ;;  %v7537_v40 = vadd.f32 -14.0, %v6305_v47  ;;  %v8042_v4 = vpack.c.bf16 %v6351_v60, %v6350_v35  ;;  %v6354_v7 = vld [vmem:[%s10968_s5 + $0x160] sm:$0xff]  ;;  %v7780_v35 = vunpack.c.h.bf16 %v10785_v31 }
 0x36e   : > { %v6028_v55 = vadd.f32 %v6027_v25, %v5997_v49  ;;  %v6260_v10 = vadd.f32 %v6223_v2, %v5997_v49  ;;  %v8036_v25 = vpack.c.bf16 %v6347_v18, %v6346_v20  ;;  %v7767_v18 = vunpack.c.l.bf16 %v10750_v32 }
 0x36f   : > { %v5998_v6 = vmax.f32 %v5966_v3, 0.0  ;;  %v6355_v3 = vld [vmem:[%s10968_s5 + $0x168] sm:$0xff]  ;;  %v7784_v60 = vunpack.c.h.bf16 %v10794_v61 }
 0x370   : > { %v6288_v37 = vmax.f32 %v6284_v42, %v6260_v10  ;;  %v6308_v42 = vmul.f32 0.1, %v7537_v40  ;;  %v8048_v10 = vpack.c.bf16 %v6355_v3, %v6354_v7  ;;  %v7731_v40 = vunpack.c.l.bf16 %v10582_v13 }
 0x371   : > { %v6029_v17 = vadd.f32 %v6028_v55, %v5998_v6  ;;  %v6261_v59 = vadd.f32 %v6228_v26, %v5998_v6  ;;  %v6356_v6 = vld [vmem:[%s10968_s5 + $0x170] sm:$0xff] }
 0x373   : > { %v6030_v54 = vrot.slane %v6029_v17, 4  ;;  %v6289_v12 = vmax.f32 %v6285_v56, %v6261_v59  ;;  %v6343_v56 = vld [vmem:[%s10968_s5 + $0x108] sm:$0xff] }
 0x374   : > { %v8030_v5 = vpack.c.bf16 %v6343_v56, %v6342_v62  ;;  %v7743_v62 = vunpack.c.l.bf16 %v10639_v29  ;;  %v7744_v56 = vunpack.c.h.bf16 %v10639_v29  ;;  %v7763_v29 = vunpack.c.l.bf16 %v10738_v11 }
 0x375   : > { %v6031_v63 = vadd.f32 %v6030_v54, %v6029_v17  ;;  %v6291_v23 = vmax.f32 %v6288_v37, %v6289_v12  ;;  %v8051_v37 = vpack.c.bf16 %v6357_v44, %v6356_v6 }
 0x377   : > { %v6032_v39 = vrot.slane %v6031_v63, 2  ;;  %v6292_v28 = vmax.f32 %v6290_v19, %v6291_v23  ;;  %v6353_v19 = vld [vmem:[%s10968_s5 + $0x158] sm:$0xff]  ;;  %v11034_v23 = vld [vmem:[#allocation33_spill] sm:$0xff] }
 0x378   : > { %v8045_v2 = vpack.c.bf16 %v6353_v19, %v6352_v51  ;;  %v7723_v47 = vunpack.c.l.bf16 %v11034_v23 }
 0x379   : > { %v6033_v24 = vadd.f32 %v6032_v39, %v6031_v63  ;;  %v6293_v9 = vrot.slane %v6292_v28, 4  ;;  %v6563_v63 = vshrl.u32 %v6562_v0, 7  ;;  %v7724_v39 = vunpack.c.h.bf16 %v11034_v23 }
 0x37b   : > { %v6034_v34 = vrot.slane %v6033_v24, 1  ;;  %v6294_v49 = vmax.f32 %v6292_v28, %v6293_v9  ;;  %v7727_v28 = vunpack.c.l.bf16 %v10563_v22 }
 0x37d   : > { %v6035_v43 = vadd.f32 %v6034_v34, %v6033_v24  ;;  %v6295_v55 = vrot.slane %v6294_v49, 2  ;;  %v7728_v24 = vunpack.c.h.bf16 %v10563_v22  ;;  %v7735_v34 = vunpack.c.l.bf16 %v10599_v1 }
 0x37e   : > { %v7748_v22 = vunpack.c.h.bf16 %v10662_v52 }
 0x37f   : > { %v6037_v57 = vmul.f32 %v8667_v41, %v6035_v43  ;;  %v6296_v26 = vmax.f32 %v6294_v49, %v6295_v55  ;;  %v7736_v41 = vunpack.c.h.bf16 %v10599_v1  ;;  %v7739_v43 = vunpack.c.l.bf16 %v10619_v45 }
 0x380   : > { %v7755_v1 = vunpack.c.l.bf16 %v10703_v36  ;;  %v7772_v36 = vunpack.c.h.bf16 %v10763_v58 }
 0x381   : > { %v6309_v50 = vmul.f32 %v6308_v42, %v6037_v57  ;;  %v6297_v17 = vrot.slane %v6296_v26, 1  ;;  %v7740_v42 = vunpack.c.h.bf16 %v10619_v45  ;;  %v7759_v45 = vunpack.c.l.bf16 %v10723_v38 }
 0x383   : > { %6422 = vmatprep.mubr.f32.mxu1 %v6309_v50  ;;  %v6298_v59 = vmax.f32 %v6296_v26, %v6297_v17  ;;  %v6564_v50 = vsub.s32 0, %v6563_v63 }
 0x384   : > { %6423 = vmatmul.mubr.f32.vlgmr.msra.gmra.mrb[64].mxu1 %v6037_v57  ;;  %v7747_v57 = vunpack.c.l.bf16 %v10662_v52  ;;  %v7764_v52 = vunpack.c.h.bf16 %v10738_v11  ;;  %v7783_v11 = vunpack.c.l.bf16 %v10794_v61 }
 0x385   : > { %8031 = vmatpush3.bf16.msra.mxu1 %v8030_v5  ;;  %7994 = vmatprep.mubr.msk.f32.mxu1 %vm8768_vm10, %v8769_v15  ;;  %v7752_v5 = vunpack.c.h.bf16 %v10682_v27 }
 0x386   : > { %8032 = vmatprep.subr.bf16.mxu1 %v8767_v14 }
 0x389   : > { %8034 = vmatpush3.bf16.msra.mxu1 %v8033_v48  ;;  %v7760_v48 = vunpack.c.h.bf16 %v10723_v38  ;;  %v7776_v38 = vunpack.c.h.bf16 %v10774_v30 }
 0x38a   : > { %8035 = vmatprep.subr.bf16.mxu1 %v8767_v14 }
 0x38d   : > { %8037 = vmatpush3.bf16.msra.mxu1 %v8036_v25  ;;  %v7771_v25 = vunpack.c.l.bf16 %v10763_v58 }
 0x38e   : > { %8038 = vmatprep.subr.bf16.mxu1 %v8767_v14 }
 0x391   : > { %8040 = vmatpush3.bf16.msra.mxu1 %v8039_v8  ;;  %v7779_v8 = vunpack.c.l.bf16 %v10785_v31 }
 0x392   : > { %8041 = vmatprep.subr.bf16.mxu1 %v8767_v14 }
 0x395   : > { %8043 = vmatpush3.bf16.msra.mxu1 %v8042_v4 }
 0x396   : > { %8044 = vmatprep.subr.bf16.mxu1 %v8767_v14 }
 0x399   : > { %8046 = vmatpush3.bf16.msra.mxu1 %v8045_v2 }
 0x39a   : > { %8047 = vmatprep.subr.bf16.mxu1 %v8767_v14 }
 0x39d   : > { %8049 = vmatpush3.bf16.msra.mxu1 %v8048_v10 }
 0x39e   : > { %8050 = vmatprep.subr.bf16.mxu1 %v8767_v14  ;;  %v7732_v14 = vunpack.c.h.bf16 %v10582_v13  ;;  %v7751_v13 = vunpack.c.l.bf16 %v10682_v27  ;;  %v7768_v27 = vunpack.c.h.bf16 %v10750_v32 }
 0x3a1   : > { %8052 = vmatpush3.bf16.msra.mxu1 %v8051_v37 }
 0x3a4   : > { %7995 = vmatmul.mubr.f32.vlgmr.msra.gmra.mrb[66].mxu1 %v6298_v59 }
 0x457   : > { %v7942_v46 = vpop.f32.mrb[64].mxu1 }
 0x458   : > { %v7943_v54 = vpop.f32.mrb[65].mxu1 }
 0x459   : > { %v7944_v12 = vadd.f32 %v7943_v54, %v7942_v46 }
 0x477   : > { %v6494_v53 = vpop.f32.mrb[66].mxu1 }
 0x478   : > { %v6495_v15 = vadd.f32 %v7944_v12, %v6494_v53  ;;  %v7996_v20 = vpop.f32.mrb[67].mxu1 }
 0x47a   : > { %v6565_v33 = vrot.slane %v6495_v15, %v6564_v50 }
 0x47c   : > { %v6566_v9 = vadd.f32 %v7723_v47, %v6565_v33  ;;  %v6567_v32 = vadd.f32 %v7724_v39, %v6565_v33  ;;  %v6568_v4 = vadd.f32 %v7727_v28, %v6565_v33  ;;  %v6569_v51 = vadd.f32 %v7728_v24, %v6565_v33 }
 0x47d   : > { %v6570_v58 = vadd.f32 %v7731_v40, %v6565_v33  ;;  %v6571_v19 = vadd.f32 %v7732_v14, %v6565_v33  ;;  %v6572_v49 = vadd.f32 %v7735_v34, %v6565_v33  ;;  %v6573_v30 = vadd.f32 %v7736_v41, %v6565_v33 }
 0x47e   : > { %v6574_v2 = vadd.f32 %v7739_v43, %v6565_v33  ;;  %v6575_v7 = vadd.f32 %v7740_v42, %v6565_v33  ;;  %v6576_v3 = vadd.f32 %v7743_v62, %v6565_v33  ;;  %v6577_v55 = vadd.f32 %v7744_v56, %v6565_v33 }
 0x47f   : > { %v6578_v31 = vadd.f32 %v7747_v57, %v6565_v33  ;;  %v6579_v10 = vadd.f32 %v7748_v22, %v6565_v33  ;;  %v6580_v6 = vadd.f32 %v7751_v13, %v6565_v33  ;;  %v6581_v44 = vadd.f32 %v7752_v5, %v6565_v33 }
 0x480   : > { %v6582_v61 = vadd.f32 %v7755_v1, %v6565_v33  ;;  %v6583_v26 = vadd.f32 %v7756_v21, %v6565_v33  ;;  %v6584_v37 = vadd.f32 %v7759_v45, %v6565_v33  ;;  %v6585_v17 = vadd.f32 %v7760_v48, %v6565_v33 }
 0x481   : > { %v6586_v59 = vadd.f32 %v7763_v29, %v6565_v33  ;;  %v6587_v46 = vadd.f32 %v7764_v52, %v6565_v33  ;;  %v6588_v54 = vadd.f32 %v7767_v18, %v6565_v33  ;;  %v6589_v12 = vadd.f32 %v7768_v27, %v6565_v33 }
 0x482   : > { %v6590_v0 = vadd.f32 %v7771_v25, %v6565_v33  ;;  %v6591_v63 = vadd.f32 %v7772_v36, %v6565_v33  ;;  %v6592_v23 = vadd.f32 %v7775_v16, %v6565_v33  ;;  %v6593_v47 = vadd.f32 %v7776_v38, %v6565_v33 }
 0x483   : > { %v6594_v39 = vadd.f32 %v7779_v8, %v6565_v33  ;;  %v6595_v28 = vadd.f32 %v7780_v35, %v6565_v33  ;;  %v6596_v24 = vadd.f32 %v7783_v11, %v6565_v33  ;;  %v6597_v40 = vadd.f32 %v7784_v60, %v6565_v33 }
 0x484   : > { %v7788_v14 = vpack.c.bf16 %v6567_v32, %v6566_v9  ;;  %v7793_v34 = vpack.c.bf16 %v6569_v51, %v6568_v4  ;;  %v7798_v41 = vpack.c.bf16 %v6571_v19, %v6570_v58  ;;  %v7803_v43 = vpack.c.bf16 %v6573_v30, %v6572_v49 }
 0x485   : > { %v7808_v42 = vpack.c.bf16 %v6575_v7, %v6574_v2  ;;  %v7813_v62 = vpack.c.bf16 %v6577_v55, %v6576_v3  ;;  %v7818_v56 = vpack.c.bf16 %v6579_v10, %v6578_v31  ;;  %v7823_v57 = vpack.c.bf16 %v6581_v44, %v6580_v6 }
 0x486   : > { %v7828_v22 = vpack.c.bf16 %v6583_v26, %v6582_v61  ;;  %v7833_v50 = vpack.c.bf16 %v6585_v17, %v6584_v37  ;;  %v7838_v13 = vpack.c.bf16 %v6587_v46, %v6586_v59  ;;  %v7843_v5 = vpack.c.bf16 %v6589_v12, %v6588_v54  ;;  %7789 = vst [vmem:[%s10894_s14] sm:$0xff] %v7788_v14  }
 0x487   : > { %7895 = vst [vmem:[%s10894_s14 + $0x8] sm:$0xff] %v7793_v34   ;;  %7896 = vst [vmem:[%s10894_s14 + $0x10] sm:$0xff] %v7798_v41   ;;  %v7848_v1 = vpack.c.bf16 %v6591_v63, %v6590_v0  ;;  %v7853_v21 = vpack.c.bf16 %v6593_v47, %v6592_v23  ;;  %v7858_v53 = vpack.c.bf16 %v6595_v28, %v6594_v39 }
 0x488   : > { %7897 = vst [vmem:[%s10894_s14 + $0x18] sm:$0xff] %v7803_v43   ;;  %v7863_v45 = vpack.c.bf16 %v6597_v40, %v6596_v24  ;;  %7898 = vst [vmem:[%s10894_s14 + $0x20] sm:$0xff] %v7808_v42  }
 0x489   : > { %7899 = vst [vmem:[%s10894_s14 + $0x28] sm:$0xff] %v7813_v62   ;;  %7900 = vst [vmem:[%s10894_s14 + $0x30] sm:$0xff] %v7818_v56  }
 0x48a   : > { %7901 = vst [vmem:[%s10894_s14 + $0x38] sm:$0xff] %v7823_v57   ;;  %7902 = vst [vmem:[%s10894_s14 + $0x40] sm:$0xff] %v7828_v22  }
 0x48b   : > { %7903 = vst [vmem:[%s10894_s14 + $0x48] sm:$0xff] %v7833_v50   ;;  %7904 = vst [vmem:[%s10894_s14 + $0x50] sm:$0xff] %v7838_v13  }
 0x48c   : > { %7905 = vst [vmem:[%s10894_s14 + $0x58] sm:$0xff] %v7843_v5   ;;  %7906 = vst [vmem:[%s10894_s14 + $0x60] sm:$0xff] %v7848_v1  }
 0x48d   : > { %7907 = vst [vmem:[%s10894_s14 + $0x68] sm:$0xff] %v7853_v21   ;;  %7908 = vst [vmem:[%s10894_s14 + $0x70] sm:$0xff] %v7858_v53  }
 0x48e   : > { %7909 = vst [vmem:[%s10894_s14 + $0x78] sm:$0xff] %v7863_v45  }
 0x48f   : > { %8712 = shalt.err (!%p8709_p8)
}
 0x490   : > { %s8713_s24 = scalar_lea.hbm %s10904_s17, 2048  ;;  %s8717_s30 = scalar_lea.hbm %s10969_s6, 4096 }
 0x491   : > { %p8714_p9 = scmp.ne.s32.totalorder %s10904_s17, %s8713_s24  ;;  %p8718_p0 = scmp.lt.u32.totalorder %s10904_s17, %s10969_s6 }
 0x492   : > { %p8719_p1 = scmp.lt.u32.totalorder %s8717_s30, %s8713_s24  ;;  %p8721_p3 = scmp.lt.u32.totalorder %s8713_s24, %s10904_s17 }
 0x493   : > { %p8715_p12 = pnand %p8714_p9, %p8849_p10 }
 0x494   : > { %p8720_p2 = por %p8719_p1, %p8718_p0 }
 0x495   : > { %p8716_p13 = pneg %p8715_p12 }
 0x496   : > { %p8722_p4 = por %p8721_p3, %p8720_p2 }
 0x498   : > { %p8723_p5 = pnand %p8722_p4, %p8716_p13 }
 0x49a   : > { %8726 = shalt.err (!%p8723_p5)
}
 0x49b   : > { %s8771_s13 = smov 64   ;;  %s8772_s14 = smov 4  }
 0x49c   : > { %8568 = dma.vmem_to_hbm [thread:$0]  (%p8849_p10), %s10906_s15, 2048, %s10904_s17, %s10922_s18, %s8771_s13, %s8771_s13, %s8772_s14  }
 0x49d PF: > { %p8574_p6 = scmp.ge.s32.totalorder %s8763_s28, 2  ;;  %s6787_s29 = sand.u32 1, %s8751_s26  }
 0x49e   : > { %s6788_s16 = scalar_lea.sflag [#allocation5], %s6787_s29 }
 0x49f   : > { %p8571_p7 = pnand %p8574_p6, %p8853_p11 }
 0x4a1   : > { %8746 = dma.done.wait (!%p8571_p7), %s6788_s16, 2048  }
 0x4a2   : > { %8748 = vsyncadd (!%p8571_p7), %s6788_s16, 4294965248  ;;  %p22_p8 = scmp.ge.s32.totalorder %s8836_s7, 4   ;;  %s11035_s26 = smov %s8755_s27 }
 0x4a3   : > { %s11036_s27 = smov %s8759_s0  ;;  %s11037_s0 = smov %s8847_s10 }
 0x4a4   : > { %s11038_s28 = smov %s8836_s7  ;;  %24 = sbr.rel (!%p22_p8) target bundleno = 18 (0x12), region = 88 }
 0x4ab   :  { %6793 = vsyncpa [#allocation5], 1 }
 0x4ac   :  { %6795 = vsyncpa [#allocation5 + $0x1], 1 }

</bundles_post_ra>
